<compile_context>
chip_gen: v6e
topology: v6e:2x2x1
jax: 0.10.0
libtpu: 0.0.40
codegen_flags: <defaults>
</compile_context>

<pallas_src>
import functools

import jax
import jax.numpy as jnp
from jax import lax
from jax.experimental import pallas as pl
from jax.experimental.pallas import tpu as pltpu

# TODO(synk): solvers.torch_solve (fixed-point competitive-binding solver) is
# an external dependency with unknown iteration count / tolerance.  We run a
# fixed number of fixed-point sweeps: the bulk uses EUP approx reciprocals,
# followed by a short Newton-refined (~f32-exact) tail so the converged answer
# is at full fixed-point accuracy before the refinement steps written in
# CompetitiveLayer.forward.
N_APPROX_ITERS = 36
N_EXACT_ITERS = 4

LANES = 128
DEFAULT_CHUNK_SUB = 16     # sublanes per inner chunk (2 f32 vregs / live array)
MAX_BLOCK_SUB = 512        # sublanes per grid step (64K batch elems / step)


def _round_up(x, m):
    return ((x + m - 1) // m) * m


def _competitive_kernel(nA, nB, nY, n_chunks, chunk_sub,
                        at_ref, k_ref, bt_ref, wk_ref, bias_ref, y_ref):
    """One batch block of the CompetitiveNetwork forward pass.

    at_ref   : VMEM (nA, block_sub, 128)   total A, batch packed sublane x lane
    k_ref    : SMEM (nA*nB,)               effective K, a-major
    bt_ref   : SMEM (nB,)                  effective total B
    wk_ref   : SMEM (nY*nA*nB,)            fused W[y, a*nB+b] * K[a, b]
    bias_ref : SMEM (nY,)                  linear bias
    y_ref    : VMEM (nY, block_sub, 128)   output, batch packed sublane x lane
    """
    slab = (chunk_sub, LANES)

    # Hoist SMEM scalar reads and splat them to slab constants ONCE, outside
    # the unrolled solver loop (avoids re-broadcast on the VALU-bound path).
    K = [[jnp.full(slab, k_ref[a * nB + b], jnp.float32)
          for b in range(nB)] for a in range(nA)]
    BT = [jnp.full(slab, bt_ref[b], jnp.float32) for b in range(nB)]
    WK = [[[jnp.full(slab, wk_ref[(y * nA + a) * nB + b], jnp.float32)
            for b in range(nB)] for a in range(nA)] for y in range(nY)]
    BIAS = [jnp.full(slab, bias_ref[y], jnp.float32) for y in range(nY)]

    def approx_recip(den):
        return pl.reciprocal(den, approx=True)

    def nr_recip(den):
        # EUP approx reciprocal + one Newton step: ~f32-exact, no f32 divide.
        r = pl.reciprocal(den, approx=True)
        return r * (2.0 - den * r)

    def bf_from_af(af, recip):
        bf = []
        for j in range(nB):
            den = 1.0 + sum(K[a][j] * af[a] for a in range(nA))
            bf.append(BT[j] * recip(den))
        return bf

    def af_from_bf(at, bf, recip):
        af = []
        for a in range(nA):
            den = 1.0 + sum(K[a][j] * bf[j] for j in range(nB))
            af.append(at[a] * recip(den))
        return af

    @pl.loop(0, n_chunks)
    def _(c):
        s = pl.multiple_of(c * chunk_sub, chunk_sub)
        at = [at_ref[a, pl.ds(s, chunk_sub), :] for a in range(nA)]

        # --- mode == 'comp': fixed-point competitive-binding solve.  Fully
        # unrolled, pure VPU/EUP elementwise math: no MXU, no cross-lane ops.
        # TODO(synk): an optional bf16 bulk phase (v6e/v7x) would halve VALU
        # work; left in f32 to keep a single numerically-safe path.
        def one_iter(_, af):
            return tuple(af_from_bf(at, bf_from_af(list(af), approx_recip),
                                    approx_recip))

        af = list(lax.fori_loop(0, N_APPROX_ITERS, one_iter, tuple(at),
                                unroll=True))

        # Newton-refined tail: restores full f32 fixed-point accuracy.
        for _ in range(N_EXACT_ITERS):
            af = af_from_bf(at, bf_from_af(af, nr_recip), nr_recip)

        # Post-solver refinement exactly as written in CompetitiveLayer.forward.
        bf = bf_from_af(af, nr_recip)
        af = af_from_bf(at, bf, nr_recip)
        bf = bf_from_af(af, nr_recip)

        # output == 'C' + ConstrainedLinear('none') + last_layer 'none', fused:
        #   Y[y] = sum_{a,b} (W[y, a*nB+b] * K[a, b]) * AF_a * BF_b + bias[y]
        prod = [[af[a] * bf[b] for b in range(nB)] for a in range(nA)]
        for y in range(nY):
            acc = BIAS[y]
            for a in range(nA):
                for b in range(nB):
                    acc = acc + WK[y][a][b] * prod[a][b]
            y_ref[y, pl.ds(s, chunk_sub), :] = acc


def competitive_network_forward(AT, K_eff, BT_eff, W_eff, b_eff, *,
                                block_sub=None, chunk_sub=DEFAULT_CHUNK_SUB):
    """Wrapper: sublane+lane-packed batch, scalar params in SMEM, even grid."""
    B, nA = AT.shape
    nB = K_eff.shape[1]
    nY = W_eff.shape[0]

    chunk_sub = _round_up(max(int(chunk_sub), 8), 8)

    # Tile selection: pad the batch so the grid is always even and >= 2
    # (keeps both v7x TensorCores busy); blocks are large, the inner chunk
    # loop bounds vreg pressure, so single-TC chips (v5e/v6e) pay the
    # per-grid-step overhead only a handful of times.
    sub_needed = -(-B // LANES)
    if block_sub is None:
        block_sub = min(MAX_BLOCK_SUB,
                        max(chunk_sub,
                            _round_up(-(-sub_needed // 2), chunk_sub)))
    block_sub = _round_up(max(int(block_sub), chunk_sub), chunk_sub)
    grid = max(2, -(-sub_needed // block_sub))
    if grid % 2:
        grid += 1
    B_pad = grid * block_sub * LANES
    n_chunks = block_sub // chunk_sub

    # Batch packed onto (sublane, lane): AT -> (nA, B_pad/128, 128).
    # Zero padding is safe: every denominator is 1 + nonnegative terms
    # (the module assumes AT, K, BT >= 0 concentrations / constants).
    AT_t = jnp.asarray(AT, jnp.float32).T                       # (nA, B)
    AT_t = jnp.pad(AT_t, ((0, 0), (0, B_pad - B)))              # (nA, B_pad)
    AT_p = AT_t.reshape(nA, B_pad // LANES, LANES)

    k_flat = jnp.asarray(K_eff, jnp.float32).reshape(nA * nB)
    bt = jnp.asarray(BT_eff, jnp.float32).reshape(nB)
    # Fuse the linear weight with K:  WK[y, a*nB+b] = W[y, a*nB+b] * K[a, b].
    wk = (jnp.asarray(W_eff, jnp.float32).reshape(nY, nA, nB)
          * jnp.asarray(K_eff, jnp.float32)[None]).reshape(nY * nA * nB)
    bias = jnp.asarray(b_eff, jnp.float32).reshape(nY)

    kernel = functools.partial(_competitive_kernel, nA, nB, nY,
                               n_chunks, chunk_sub)
    smem = pl.BlockSpec(memory_space=pltpu.MemorySpace.SMEM)

    y_p = pl.pallas_call(
        kernel,
        out_shape=jax.ShapeDtypeStruct((nY, B_pad // LANES, LANES), jnp.float32),
        grid_spec=pltpu.PrefetchScalarGridSpec(
            num_scalar_prefetch=0,
            grid=(grid,),
            in_specs=[
                pl.BlockSpec((nA, block_sub, LANES), lambda i: (0, i, 0)),  # AT
                smem,                                                       # K
                smem,                                                       # BT
                smem,                                                       # W*K
                smem,                                                       # bias
            ],
            out_specs=pl.BlockSpec((nY, block_sub, LANES), lambda i: (0, i, 0)),
        ),
        compiler_params=pltpu.CompilerParams(
            dimension_semantics=("parallel",)),
    )(AT_p, k_flat, bt, wk, bias)

    y = y_p.reshape(nY, B_pad).T[:B]                            # (B, nY)
    # torch.squeeze(Y, dim=1): only squeezes when that dim has size 1.
    return jnp.squeeze(y, axis=1) if nY == 1 else y


if __name__ == "__main__":
    nA, nB, nY = 2, 2, 1
    B = 16

    key = jax.random.PRNGKey(0)
    k_key, at_key, w_key = jax.random.split(key, 3)

    # CompetitiveLayer params (comp_constrain='exp'):
    #   stored K <- rand in (0,1); effective K = clamp(exp(log(clamp(K,1e-6))), 0, 1000) == K
    #   stored BT <- 1;           effective BT = 1
    K_raw = jax.random.uniform(k_key, (nA, nB), dtype=jnp.float32)
    K_eff = jnp.clip(jnp.exp(jnp.log(jnp.clip(K_raw, 1e-6))), 0.0, 1000.0)
    BT_eff = jnp.clip(
        jnp.exp(jnp.log(jnp.clip(jnp.ones((nB,), jnp.float32), 1e-6))), 0.0, 1000.0
    )

    # ConstrainedLinear params (linear_constrain='none'):
    #   weight ~ N(0,1) clamped to [-10, 10]; bias = 0
    W_eff = jnp.clip(jax.random.normal(w_key, (nY, nA * nB), dtype=jnp.float32),
                     -10.0, 10.0)
    b_eff = jnp.zeros((nY,), jnp.float32)

    # Input: AT >= 0 concentrations, shape (batch, nA)
    AT = jax.random.uniform(at_key, (B, nA), dtype=jnp.float32)

    y = competitive_network_forward(AT, K_eff, BT_eff, W_eff, b_eff)
    y = jax.block_until_ready(y)

    # plain-JAX reference of the same forward pass (for validation)
    def ref_forward(AT):
        AF = AT
        for _ in range(N_APPROX_ITERS + N_EXACT_ITERS):
            BF = BT_eff[None, :] / (AF @ K_eff + 1.0)
            AF = AT / (BF @ K_eff.T + 1.0)
        BF = BT_eff[None, :] / (AF @ K_eff + 1.0)
        AF = AT / (BF @ K_eff.T + 1.0)
        BF = BT_eff[None, :] / (AF @ K_eff + 1.0)
        C = AF[:, :, None] * BF[:, None, :] * K_eff[None, :, :]
        H = C.reshape(B, nA * nB)
        Y = H @ W_eff.T + b_eff[None, :]
        return jnp.squeeze(Y, axis=1)

    y_ref = ref_forward(AT)
    assert y.shape == (B,)
    assert bool(jnp.allclose(y, y_ref, atol=1e-4, rtol=1e-4)), (y, y_ref)

    print("KERNEL_OK")
</pallas_src>

<mosaic_0001>
module attributes {stable_mosaic.version = 11 : i64} {
  func.func @_competitive_kernel(%arg0: i32, %arg1: memref<2x16x128xf32, #tpu.memory_space<vmem>>, %arg2: memref<4xf32, #tpu.memory_space<smem>>, %arg3: memref<2xf32, #tpu.memory_space<smem>>, %arg4: memref<4xf32, #tpu.memory_space<smem>>, %arg5: memref<1xf32, #tpu.memory_space<smem>>, %arg6: memref<1x16x128xf32, #tpu.memory_space<vmem>>) attributes {dimension_semantics = [#tpu.dimension_semantics<parallel>], iteration_bounds = array<i64: 2>, scalar_prefetch = 0 : i64, scratch_operands = 0 : i64, tpu.core_type = #tpu.core_type<tc>, window_params = [{transform_indices = @transform_0, window_bounds = array<i64: 2, 16, 128>}, {transform_indices = @transform_1, window_bounds = array<i64: 4>}, {transform_indices = @transform_2, window_bounds = array<i64: 2>}, {transform_indices = @transform_3, window_bounds = array<i64: 4>}, {transform_indices = @transform_4, window_bounds = array<i64: 1>}, {transform_indices = @transform_5, window_bounds = array<i64: 1, 16, 128>}]} {
    %c0 = arith.constant 0 : index
    %0 = memref.load %arg2[%c0] : memref<4xf32, #tpu.memory_space<smem>>
    %1 = vector.broadcast %0 : f32 to vector<16x128xf32>
    %c1 = arith.constant 1 : index
    %2 = memref.load %arg2[%c1] : memref<4xf32, #tpu.memory_space<smem>>
    %3 = vector.broadcast %2 : f32 to vector<16x128xf32>
    %c2 = arith.constant 2 : index
    %4 = memref.load %arg2[%c2] : memref<4xf32, #tpu.memory_space<smem>>
    %5 = vector.broadcast %4 : f32 to vector<16x128xf32>
    %c3 = arith.constant 3 : index
    %6 = memref.load %arg2[%c3] : memref<4xf32, #tpu.memory_space<smem>>
    %7 = vector.broadcast %6 : f32 to vector<16x128xf32>
    %c0_0 = arith.constant 0 : index
    %8 = memref.load %arg3[%c0_0] : memref<2xf32, #tpu.memory_space<smem>>
    %9 = vector.broadcast %8 : f32 to vector<16x128xf32>
    %c1_1 = arith.constant 1 : index
    %10 = memref.load %arg3[%c1_1] : memref<2xf32, #tpu.memory_space<smem>>
    %11 = vector.broadcast %10 : f32 to vector<16x128xf32>
    %c0_2 = arith.constant 0 : index
    %12 = memref.load %arg4[%c0_2] : memref<4xf32, #tpu.memory_space<smem>>
    %13 = vector.broadcast %12 : f32 to vector<16x128xf32>
    %c1_3 = arith.constant 1 : index
    %14 = memref.load %arg4[%c1_3] : memref<4xf32, #tpu.memory_space<smem>>
    %15 = vector.broadcast %14 : f32 to vector<16x128xf32>
    %c2_4 = arith.constant 2 : index
    %16 = memref.load %arg4[%c2_4] : memref<4xf32, #tpu.memory_space<smem>>
    %17 = vector.broadcast %16 : f32 to vector<16x128xf32>
    %c3_5 = arith.constant 3 : index
    %18 = memref.load %arg4[%c3_5] : memref<4xf32, #tpu.memory_space<smem>>
    %19 = vector.broadcast %18 : f32 to vector<16x128xf32>
    %c0_6 = arith.constant 0 : index
    %20 = memref.load %arg5[%c0_6] : memref<1xf32, #tpu.memory_space<smem>>
    %21 = vector.broadcast %20 : f32 to vector<16x128xf32>
    %c0_i32 = arith.constant 0 : i32
    %c1_i32 = arith.constant 1 : i32
    %22 = arith.muli %c0_i32, %c1_i32 : i32
    %c0_i32_7 = arith.constant 0 : i32
    %23 = arith.addi %c0_i32_7, %22 : i32
    %c16_i32 = arith.constant 16 : i32
    %24 = arith.muli %23, %c16_i32 : i32
    %25 = tpu.assume_multiple %24, 16 : i32
    %c0_8 = arith.constant 0 : index
    %26 = arith.index_cast %25 : i32 to index
    %c0_9 = arith.constant 0 : index
    %27 = vector.load %arg1[%c0_8, %26, %c0_9] : memref<2x16x128xf32, #tpu.memory_space<vmem>>, vector<1x16x128xf32>
    %28 = vector.shape_cast %27 : vector<1x16x128xf32> to vector<16x128xf32>
    %c1_10 = arith.constant 1 : index
    %29 = arith.index_cast %25 : i32 to index
    %c0_11 = arith.constant 0 : index
    %30 = vector.load %arg1[%c1_10, %29, %c0_11] : memref<2x16x128xf32, #tpu.memory_space<vmem>>, vector<1x16x128xf32>
    %31 = vector.shape_cast %30 : vector<1x16x128xf32> to vector<16x128xf32>
    %c0_i32_12 = arith.constant 0 : i32
    %32 = arith.mulf %1, %28 : vector<16x128xf32>
    %cst = arith.constant 0.000000e+00 : f32
    %33 = vector.broadcast %cst : f32 to vector<16x128xf32>
    %34 = arith.addf %33, %32 : vector<16x128xf32>
    %35 = arith.mulf %5, %31 : vector<16x128xf32>
    %36 = arith.addf %34, %35 : vector<16x128xf32>
    %cst_13 = arith.constant 1.000000e+00 : f32
    %37 = vector.broadcast %cst_13 : f32 to vector<16x128xf32>
    %38 = arith.addf %37, %36 : vector<16x128xf32>
    %39 = tpu.reciprocal %38 {approx = true} : vector<16x128xf32> -> vector<16x128xf32>
    %40 = arith.mulf %9, %39 : vector<16x128xf32>
    %41 = arith.mulf %3, %28 : vector<16x128xf32>
    %cst_14 = arith.constant 0.000000e+00 : f32
    %42 = vector.broadcast %cst_14 : f32 to vector<16x128xf32>
    %43 = arith.addf %42, %41 : vector<16x128xf32>
    %44 = arith.mulf %7, %31 : vector<16x128xf32>
    %45 = arith.addf %43, %44 : vector<16x128xf32>
    %cst_15 = arith.constant 1.000000e+00 : f32
    %46 = vector.broadcast %cst_15 : f32 to vector<16x128xf32>
    %47 = arith.addf %46, %45 : vector<16x128xf32>
    %48 = tpu.reciprocal %47 {approx = true} : vector<16x128xf32> -> vector<16x128xf32>
    %49 = arith.mulf %11, %48 : vector<16x128xf32>
    %50 = arith.mulf %1, %40 : vector<16x128xf32>
    %cst_16 = arith.constant 0.000000e+00 : f32
    %51 = vector.broadcast %cst_16 : f32 to vector<16x128xf32>
    %52 = arith.addf %51, %50 : vector<16x128xf32>
    %53 = arith.mulf %3, %49 : vector<16x128xf32>
    %54 = arith.addf %52, %53 : vector<16x128xf32>
    %cst_17 = arith.constant 1.000000e+00 : f32
    %55 = vector.broadcast %cst_17 : f32 to vector<16x128xf32>
    %56 = arith.addf %55, %54 : vector<16x128xf32>
    %57 = tpu.reciprocal %56 {approx = true} : vector<16x128xf32> -> vector<16x128xf32>
    %58 = arith.mulf %28, %57 : vector<16x128xf32>
    %59 = arith.mulf %5, %40 : vector<16x128xf32>
    %cst_18 = arith.constant 0.000000e+00 : f32
    %60 = vector.broadcast %cst_18 : f32 to vector<16x128xf32>
    %61 = arith.addf %60, %59 : vector<16x128xf32>
    %62 = arith.mulf %7, %49 : vector<16x128xf32>
    %63 = arith.addf %61, %62 : vector<16x128xf32>
    %cst_19 = arith.constant 1.000000e+00 : f32
    %64 = vector.broadcast %cst_19 : f32 to vector<16x128xf32>
    %65 = arith.addf %64, %63 : vector<16x128xf32>
    %66 = tpu.reciprocal %65 {approx = true} : vector<16x128xf32> -> vector<16x128xf32>
    %67 = arith.mulf %31, %66 : vector<16x128xf32>
    %c1_i32_20 = arith.constant 1 : i32
    %68 = arith.mulf %1, %58 : vector<16x128xf32>
    %cst_21 = arith.constant 0.000000e+00 : f32
    %69 = vector.broadcast %cst_21 : f32 to vector<16x128xf32>
    %70 = arith.addf %69, %68 : vector<16x128xf32>
    %71 = arith.mulf %5, %67 : vector<16x128xf32>
    %72 = arith.addf %70, %71 : vector<16x128xf32>
    %cst_22 = arith.constant 1.000000e+00 : f32
    %73 = vector.broadcast %cst_22 : f32 to vector<16x128xf32>
    %74 = arith.addf %73, %72 : vector<16x128xf32>
    %75 = tpu.reciprocal %74 {approx = true} : vector<16x128xf32> -> vector<16x128xf32>
    %76 = arith.mulf %9, %75 : vector<16x128xf32>
    %77 = arith.mulf %3, %58 : vector<16x128xf32>
    %cst_23 = arith.constant 0.000000e+00 : f32
    %78 = vector.broadcast %cst_23 : f32 to vector<16x128xf32>
    %79 = arith.addf %78, %77 : vector<16x128xf32>
    %80 = arith.mulf %7, %67 : vector<16x128xf32>
    %81 = arith.addf %79, %80 : vector<16x128xf32>
    %cst_24 = arith.constant 1.000000e+00 : f32
    %82 = vector.broadcast %cst_24 : f32 to vector<16x128xf32>
    %83 = arith.addf %82, %81 : vector<16x128xf32>
    %84 = tpu.reciprocal %83 {approx = true} : vector<16x128xf32> -> vector<16x128xf32>
    %85 = arith.mulf %11, %84 : vector<16x128xf32>
    %86 = arith.mulf %1, %76 : vector<16x128xf32>
    %cst_25 = arith.constant 0.000000e+00 : f32
    %87 = vector.broadcast %cst_25 : f32 to vector<16x128xf32>
    %88 = arith.addf %87, %86 : vector<16x128xf32>
    %89 = arith.mulf %3, %85 : vector<16x128xf32>
    %90 = arith.addf %88, %89 : vector<16x128xf32>
    %cst_26 = arith.constant 1.000000e+00 : f32
    %91 = vector.broadcast %cst_26 : f32 to vector<16x128xf32>
    %92 = arith.addf %91, %90 : vector<16x128xf32>
    %93 = tpu.reciprocal %92 {approx = true} : vector<16x128xf32> -> vector<16x128xf32>
    %94 = arith.mulf %28, %93 : vector<16x128xf32>
    %95 = arith.mulf %5, %76 : vector<16x128xf32>
    %cst_27 = arith.constant 0.000000e+00 : f32
    %96 = vector.broadcast %cst_27 : f32 to vector<16x128xf32>
    %97 = arith.addf %96, %95 : vector<16x128xf32>
    %98 = arith.mulf %7, %85 : vector<16x128xf32>
    %99 = arith.addf %97, %98 : vector<16x128xf32>
    %cst_28 = arith.constant 1.000000e+00 : f32
    %100 = vector.broadcast %cst_28 : f32 to vector<16x128xf32>
    %101 = arith.addf %100, %99 : vector<16x128xf32>
    %102 = tpu.reciprocal %101 {approx = true} : vector<16x128xf32> -> vector<16x128xf32>
    %103 = arith.mulf %31, %102 : vector<16x128xf32>
    %c2_i32 = arith.constant 2 : i32
    %104 = arith.mulf %1, %94 : vector<16x128xf32>
    %cst_29 = arith.constant 0.000000e+00 : f32
    %105 = vector.broadcast %cst_29 : f32 to vector<16x128xf32>
    %106 = arith.addf %105, %104 : vector<16x128xf32>
    %107 = arith.mulf %5, %103 : vector<16x128xf32>
    %108 = arith.addf %106, %107 : vector<16x128xf32>
    %cst_30 = arith.constant 1.000000e+00 : f32
    %109 = vector.broadcast %cst_30 : f32 to vector<16x128xf32>
    %110 = arith.addf %109, %108 : vector<16x128xf32>
    %111 = tpu.reciprocal %110 {approx = true} : vector<16x128xf32> -> vector<16x128xf32>
    %112 = arith.mulf %9, %111 : vector<16x128xf32>
    %113 = arith.mulf %3, %94 : vector<16x128xf32>
    %cst_31 = arith.constant 0.000000e+00 : f32
    %114 = vector.broadcast %cst_31 : f32 to vector<16x128xf32>
    %115 = arith.addf %114, %113 : vector<16x128xf32>
    %116 = arith.mulf %7, %103 : vector<16x128xf32>
    %117 = arith.addf %115, %116 : vector<16x128xf32>
    %cst_32 = arith.constant 1.000000e+00 : f32
    %118 = vector.broadcast %cst_32 : f32 to vector<16x128xf32>
    %119 = arith.addf %118, %117 : vector<16x128xf32>
    %120 = tpu.reciprocal %119 {approx = true} : vector<16x128xf32> -> vector<16x128xf32>
    %121 = arith.mulf %11, %120 : vector<16x128xf32>
    %122 = arith.mulf %1, %112 : vector<16x128xf32>
    %cst_33 = arith.constant 0.000000e+00 : f32
    %123 = vector.broadcast %cst_33 : f32 to vector<16x128xf32>
    %124 = arith.addf %123, %122 : vector<16x128xf32>
    %125 = arith.mulf %3, %121 : vector<16x128xf32>
    %126 = arith.addf %124, %125 : vector<16x128xf32>
    %cst_34 = arith.constant 1.000000e+00 : f32
    %127 = vector.broadcast %cst_34 : f32 to vector<16x128xf32>
    %128 = arith.addf %127, %126 : vector<16x128xf32>
    %129 = tpu.reciprocal %128 {approx = true} : vector<16x128xf32> -> vector<16x128xf32>
    %130 = arith.mulf %28, %129 : vector<16x128xf32>
    %131 = arith.mulf %5, %112 : vector<16x128xf32>
    %cst_35 = arith.constant 0.000000e+00 : f32
    %132 = vector.broadcast %cst_35 : f32 to vector<16x128xf32>
    %133 = arith.addf %132, %131 : vector<16x128xf32>
    %134 = arith.mulf %7, %121 : vector<16x128xf32>
    %135 = arith.addf %133, %134 : vector<16x128xf32>
    %cst_36 = arith.constant 1.000000e+00 : f32
    %136 = vector.broadcast %cst_36 : f32 to vector<16x128xf32>
    %137 = arith.addf %136, %135 : vector<16x128xf32>
    %138 = tpu.reciprocal %137 {approx = true} : vector<16x128xf32> -> vector<16x128xf32>
    %139 = arith.mulf %31, %138 : vector<16x128xf32>
    %c3_i32 = arith.constant 3 : i32
    %140 = arith.mulf %1, %130 : vector<16x128xf32>
    %cst_37 = arith.constant 0.000000e+00 : f32
    %141 = vector.broadcast %cst_37 : f32 to vector<16x128xf32>
    %142 = arith.addf %141, %140 : vector<16x128xf32>
    %143 = arith.mulf %5, %139 : vector<16x128xf32>
    %144 = arith.addf %142, %143 : vector<16x128xf32>
    %cst_38 = arith.constant 1.000000e+00 : f32
    %145 = vector.broadcast %cst_38 : f32 to vector<16x128xf32>
    %146 = arith.addf %145, %144 : vector<16x128xf32>
    %147 = tpu.reciprocal %146 {approx = true} : vector<16x128xf32> -> vector<16x128xf32>
    %148 = arith.mulf %9, %147 : vector<16x128xf32>
    %149 = arith.mulf %3, %130 : vector<16x128xf32>
    %cst_39 = arith.constant 0.000000e+00 : f32
    %150 = vector.broadcast %cst_39 : f32 to vector<16x128xf32>
    %151 = arith.addf %150, %149 : vector<16x128xf32>
    %152 = arith.mulf %7, %139 : vector<16x128xf32>
    %153 = arith.addf %151, %152 : vector<16x128xf32>
    %cst_40 = arith.constant 1.000000e+00 : f32
    %154 = vector.broadcast %cst_40 : f32 to vector<16x128xf32>
    %155 = arith.addf %154, %153 : vector<16x128xf32>
    %156 = tpu.reciprocal %155 {approx = true} : vector<16x128xf32> -> vector<16x128xf32>
    %157 = arith.mulf %11, %156 : vector<16x128xf32>
    %158 = arith.mulf %1, %148 : vector<16x128xf32>
    %cst_41 = arith.constant 0.000000e+00 : f32
    %159 = vector.broadcast %cst_41 : f32 to vector<16x128xf32>
    %160 = arith.addf %159, %158 : vector<16x128xf32>
    %161 = arith.mulf %3, %157 : vector<16x128xf32>
    %162 = arith.addf %160, %161 : vector<16x128xf32>
    %cst_42 = arith.constant 1.000000e+00 : f32
    %163 = vector.broadcast %cst_42 : f32 to vector<16x128xf32>
    %164 = arith.addf %163, %162 : vector<16x128xf32>
    %165 = tpu.reciprocal %164 {approx = true} : vector<16x128xf32> -> vector<16x128xf32>
    %166 = arith.mulf %28, %165 : vector<16x128xf32>
    %167 = arith.mulf %5, %148 : vector<16x128xf32>
    %cst_43 = arith.constant 0.000000e+00 : f32
    %168 = vector.broadcast %cst_43 : f32 to vector<16x128xf32>
    %169 = arith.addf %168, %167 : vector<16x128xf32>
    %170 = arith.mulf %7, %157 : vector<16x128xf32>
    %171 = arith.addf %169, %170 : vector<16x128xf32>
    %cst_44 = arith.constant 1.000000e+00 : f32
    %172 = vector.broadcast %cst_44 : f32 to vector<16x128xf32>
    %173 = arith.addf %172, %171 : vector<16x128xf32>
    %174 = tpu.reciprocal %173 {approx = true} : vector<16x128xf32> -> vector<16x128xf32>
    %175 = arith.mulf %31, %174 : vector<16x128xf32>
    %c4_i32 = arith.constant 4 : i32
    %176 = arith.mulf %1, %166 : vector<16x128xf32>
    %cst_45 = arith.constant 0.000000e+00 : f32
    %177 = vector.broadcast %cst_45 : f32 to vector<16x128xf32>
    %178 = arith.addf %177, %176 : vector<16x128xf32>
    %179 = arith.mulf %5, %175 : vector<16x128xf32>
    %180 = arith.addf %178, %179 : vector<16x128xf32>
    %cst_46 = arith.constant 1.000000e+00 : f32
    %181 = vector.broadcast %cst_46 : f32 to vector<16x128xf32>
    %182 = arith.addf %181, %180 : vector<16x128xf32>
    %183 = tpu.reciprocal %182 {approx = true} : vector<16x128xf32> -> vector<16x128xf32>
    %184 = arith.mulf %9, %183 : vector<16x128xf32>
    %185 = arith.mulf %3, %166 : vector<16x128xf32>
    %cst_47 = arith.constant 0.000000e+00 : f32
    %186 = vector.broadcast %cst_47 : f32 to vector<16x128xf32>
    %187 = arith.addf %186, %185 : vector<16x128xf32>
    %188 = arith.mulf %7, %175 : vector<16x128xf32>
    %189 = arith.addf %187, %188 : vector<16x128xf32>
    %cst_48 = arith.constant 1.000000e+00 : f32
    %190 = vector.broadcast %cst_48 : f32 to vector<16x128xf32>
    %191 = arith.addf %190, %189 : vector<16x128xf32>
    %192 = tpu.reciprocal %191 {approx = true} : vector<16x128xf32> -> vector<16x128xf32>
    %193 = arith.mulf %11, %192 : vector<16x128xf32>
    %194 = arith.mulf %1, %184 : vector<16x128xf32>
    %cst_49 = arith.constant 0.000000e+00 : f32
    %195 = vector.broadcast %cst_49 : f32 to vector<16x128xf32>
    %196 = arith.addf %195, %194 : vector<16x128xf32>
    %197 = arith.mulf %3, %193 : vector<16x128xf32>
    %198 = arith.addf %196, %197 : vector<16x128xf32>
    %cst_50 = arith.constant 1.000000e+00 : f32
    %199 = vector.broadcast %cst_50 : f32 to vector<16x128xf32>
    %200 = arith.addf %199, %198 : vector<16x128xf32>
    %201 = tpu.reciprocal %200 {approx = true} : vector<16x128xf32> -> vector<16x128xf32>
    %202 = arith.mulf %28, %201 : vector<16x128xf32>
    %203 = arith.mulf %5, %184 : vector<16x128xf32>
    %cst_51 = arith.constant 0.000000e+00 : f32
    %204 = vector.broadcast %cst_51 : f32 to vector<16x128xf32>
    %205 = arith.addf %204, %203 : vector<16x128xf32>
    %206 = arith.mulf %7, %193 : vector<16x128xf32>
    %207 = arith.addf %205, %206 : vector<16x128xf32>
    %cst_52 = arith.constant 1.000000e+00 : f32
    %208 = vector.broadcast %cst_52 : f32 to vector<16x128xf32>
    %209 = arith.addf %208, %207 : vector<16x128xf32>
    %210 = tpu.reciprocal %209 {approx = true} : vector<16x128xf32> -> vector<16x128xf32>
    %211 = arith.mulf %31, %210 : vector<16x128xf32>
    %c5_i32 = arith.constant 5 : i32
    %212 = arith.mulf %1, %202 : vector<16x128xf32>
    %cst_53 = arith.constant 0.000000e+00 : f32
    %213 = vector.broadcast %cst_53 : f32 to vector<16x128xf32>
    %214 = arith.addf %213, %212 : vector<16x128xf32>
    %215 = arith.mulf %5, %211 : vector<16x128xf32>
    %216 = arith.addf %214, %215 : vector<16x128xf32>
    %cst_54 = arith.constant 1.000000e+00 : f32
    %217 = vector.broadcast %cst_54 : f32 to vector<16x128xf32>
    %218 = arith.addf %217, %216 : vector<16x128xf32>
    %219 = tpu.reciprocal %218 {approx = true} : vector<16x128xf32> -> vector<16x128xf32>
    %220 = arith.mulf %9, %219 : vector<16x128xf32>
    %221 = arith.mulf %3, %202 : vector<16x128xf32>
    %cst_55 = arith.constant 0.000000e+00 : f32
    %222 = vector.broadcast %cst_55 : f32 to vector<16x128xf32>
    %223 = arith.addf %222, %221 : vector<16x128xf32>
    %224 = arith.mulf %7, %211 : vector<16x128xf32>
    %225 = arith.addf %223, %224 : vector<16x128xf32>
    %cst_56 = arith.constant 1.000000e+00 : f32
    %226 = vector.broadcast %cst_56 : f32 to vector<16x128xf32>
    %227 = arith.addf %226, %225 : vector<16x128xf32>
    %228 = tpu.reciprocal %227 {approx = true} : vector<16x128xf32> -> vector<16x128xf32>
    %229 = arith.mulf %11, %228 : vector<16x128xf32>
    %230 = arith.mulf %1, %220 : vector<16x128xf32>
    %cst_57 = arith.constant 0.000000e+00 : f32
    %231 = vector.broadcast %cst_57 : f32 to vector<16x128xf32>
    %232 = arith.addf %231, %230 : vector<16x128xf32>
    %233 = arith.mulf %3, %229 : vector<16x128xf32>
    %234 = arith.addf %232, %233 : vector<16x128xf32>
    %cst_58 = arith.constant 1.000000e+00 : f32
    %235 = vector.broadcast %cst_58 : f32 to vector<16x128xf32>
    %236 = arith.addf %235, %234 : vector<16x128xf32>
    %237 = tpu.reciprocal %236 {approx = true} : vector<16x128xf32> -> vector<16x128xf32>
    %238 = arith.mulf %28, %237 : vector<16x128xf32>
    %239 = arith.mulf %5, %220 : vector<16x128xf32>
    %cst_59 = arith.constant 0.000000e+00 : f32
    %240 = vector.broadcast %cst_59 : f32 to vector<16x128xf32>
    %241 = arith.addf %240, %239 : vector<16x128xf32>
    %242 = arith.mulf %7, %229 : vector<16x128xf32>
    %243 = arith.addf %241, %242 : vector<16x128xf32>
    %cst_60 = arith.constant 1.000000e+00 : f32
    %244 = vector.broadcast %cst_60 : f32 to vector<16x128xf32>
    %245 = arith.addf %244, %243 : vector<16x128xf32>
    %246 = tpu.reciprocal %245 {approx = true} : vector<16x128xf32> -> vector<16x128xf32>
    %247 = arith.mulf %31, %246 : vector<16x128xf32>
    %c6_i32 = arith.constant 6 : i32
    %248 = arith.mulf %1, %238 : vector<16x128xf32>
    %cst_61 = arith.constant 0.000000e+00 : f32
    %249 = vector.broadcast %cst_61 : f32 to vector<16x128xf32>
    %250 = arith.addf %249, %248 : vector<16x128xf32>
    %251 = arith.mulf %5, %247 : vector<16x128xf32>
    %252 = arith.addf %250, %251 : vector<16x128xf32>
    %cst_62 = arith.constant 1.000000e+00 : f32
    %253 = vector.broadcast %cst_62 : f32 to vector<16x128xf32>
    %254 = arith.addf %253, %252 : vector<16x128xf32>
    %255 = tpu.reciprocal %254 {approx = true} : vector<16x128xf32> -> vector<16x128xf32>
    %256 = arith.mulf %9, %255 : vector<16x128xf32>
    %257 = arith.mulf %3, %238 : vector<16x128xf32>
    %cst_63 = arith.constant 0.000000e+00 : f32
    %258 = vector.broadcast %cst_63 : f32 to vector<16x128xf32>
    %259 = arith.addf %258, %257 : vector<16x128xf32>
    %260 = arith.mulf %7, %247 : vector<16x128xf32>
    %261 = arith.addf %259, %260 : vector<16x128xf32>
    %cst_64 = arith.constant 1.000000e+00 : f32
    %262 = vector.broadcast %cst_64 : f32 to vector<16x128xf32>
    %263 = arith.addf %262, %261 : vector<16x128xf32>
    %264 = tpu.reciprocal %263 {approx = true} : vector<16x128xf32> -> vector<16x128xf32>
    %265 = arith.mulf %11, %264 : vector<16x128xf32>
    %266 = arith.mulf %1, %256 : vector<16x128xf32>
    %cst_65 = arith.constant 0.000000e+00 : f32
    %267 = vector.broadcast %cst_65 : f32 to vector<16x128xf32>
    %268 = arith.addf %267, %266 : vector<16x128xf32>
    %269 = arith.mulf %3, %265 : vector<16x128xf32>
    %270 = arith.addf %268, %269 : vector<16x128xf32>
    %cst_66 = arith.constant 1.000000e+00 : f32
    %271 = vector.broadcast %cst_66 : f32 to vector<16x128xf32>
    %272 = arith.addf %271, %270 : vector<16x128xf32>
    %273 = tpu.reciprocal %272 {approx = true} : vector<16x128xf32> -> vector<16x128xf32>
    %274 = arith.mulf %28, %273 : vector<16x128xf32>
    %275 = arith.mulf %5, %256 : vector<16x128xf32>
    %cst_67 = arith.constant 0.000000e+00 : f32
    %276 = vector.broadcast %cst_67 : f32 to vector<16x128xf32>
    %277 = arith.addf %276, %275 : vector<16x128xf32>
    %278 = arith.mulf %7, %265 : vector<16x128xf32>
    %279 = arith.addf %277, %278 : vector<16x128xf32>
    %cst_68 = arith.constant 1.000000e+00 : f32
    %280 = vector.broadcast %cst_68 : f32 to vector<16x128xf32>
    %281 = arith.addf %280, %279 : vector<16x128xf32>
    %282 = tpu.reciprocal %281 {approx = true} : vector<16x128xf32> -> vector<16x128xf32>
    %283 = arith.mulf %31, %282 : vector<16x128xf32>
    %c7_i32 = arith.constant 7 : i32
    %284 = arith.mulf %1, %274 : vector<16x128xf32>
    %cst_69 = arith.constant 0.000000e+00 : f32
    %285 = vector.broadcast %cst_69 : f32 to vector<16x128xf32>
    %286 = arith.addf %285, %284 : vector<16x128xf32>
    %287 = arith.mulf %5, %283 : vector<16x128xf32>
    %288 = arith.addf %286, %287 : vector<16x128xf32>
    %cst_70 = arith.constant 1.000000e+00 : f32
    %289 = vector.broadcast %cst_70 : f32 to vector<16x128xf32>
    %290 = arith.addf %289, %288 : vector<16x128xf32>
    %291 = tpu.reciprocal %290 {approx = true} : vector<16x128xf32> -> vector<16x128xf32>
    %292 = arith.mulf %9, %291 : vector<16x128xf32>
    %293 = arith.mulf %3, %274 : vector<16x128xf32>
    %cst_71 = arith.constant 0.000000e+00 : f32
    %294 = vector.broadcast %cst_71 : f32 to vector<16x128xf32>
    %295 = arith.addf %294, %293 : vector<16x128xf32>
    %296 = arith.mulf %7, %283 : vector<16x128xf32>
    %297 = arith.addf %295, %296 : vector<16x128xf32>
    %cst_72 = arith.constant 1.000000e+00 : f32
    %298 = vector.broadcast %cst_72 : f32 to vector<16x128xf32>
    %299 = arith.addf %298, %297 : vector<16x128xf32>
    %300 = tpu.reciprocal %299 {approx = true} : vector<16x128xf32> -> vector<16x128xf32>
    %301 = arith.mulf %11, %300 : vector<16x128xf32>
    %302 = arith.mulf %1, %292 : vector<16x128xf32>
    %cst_73 = arith.constant 0.000000e+00 : f32
    %303 = vector.broadcast %cst_73 : f32 to vector<16x128xf32>
    %304 = arith.addf %303, %302 : vector<16x128xf32>
    %305 = arith.mulf %3, %301 : vector<16x128xf32>
    %306 = arith.addf %304, %305 : vector<16x128xf32>
    %cst_74 = arith.constant 1.000000e+00 : f32
    %307 = vector.broadcast %cst_74 : f32 to vector<16x128xf32>
    %308 = arith.addf %307, %306 : vector<16x128xf32>
    %309 = tpu.reciprocal %308 {approx = true} : vector<16x128xf32> -> vector<16x128xf32>
    %310 = arith.mulf %28, %309 : vector<16x128xf32>
    %311 = arith.mulf %5, %292 : vector<16x128xf32>
    %cst_75 = arith.constant 0.000000e+00 : f32
    %312 = vector.broadcast %cst_75 : f32 to vector<16x128xf32>
    %313 = arith.addf %312, %311 : vector<16x128xf32>
    %314 = arith.mulf %7, %301 : vector<16x128xf32>
    %315 = arith.addf %313, %314 : vector<16x128xf32>
    %cst_76 = arith.constant 1.000000e+00 : f32
    %316 = vector.broadcast %cst_76 : f32 to vector<16x128xf32>
    %317 = arith.addf %316, %315 : vector<16x128xf32>
    %318 = tpu.reciprocal %317 {approx = true} : vector<16x128xf32> -> vector<16x128xf32>
    %319 = arith.mulf %31, %318 : vector<16x128xf32>
    %c8_i32 = arith.constant 8 : i32
    %320 = arith.mulf %1, %310 : vector<16x128xf32>
    %cst_77 = arith.constant 0.000000e+00 : f32
    %321 = vector.broadcast %cst_77 : f32 to vector<16x128xf32>
    %322 = arith.addf %321, %320 : vector<16x128xf32>
    %323 = arith.mulf %5, %319 : vector<16x128xf32>
    %324 = arith.addf %322, %323 : vector<16x128xf32>
    %cst_78 = arith.constant 1.000000e+00 : f32
    %325 = vector.broadcast %cst_78 : f32 to vector<16x128xf32>
    %326 = arith.addf %325, %324 : vector<16x128xf32>
    %327 = tpu.reciprocal %326 {approx = true} : vector<16x128xf32> -> vector<16x128xf32>
    %328 = arith.mulf %9, %327 : vector<16x128xf32>
    %329 = arith.mulf %3, %310 : vector<16x128xf32>
    %cst_79 = arith.constant 0.000000e+00 : f32
    %330 = vector.broadcast %cst_79 : f32 to vector<16x128xf32>
    %331 = arith.addf %330, %329 : vector<16x128xf32>
    %332 = arith.mulf %7, %319 : vector<16x128xf32>
    %333 = arith.addf %331, %332 : vector<16x128xf32>
    %cst_80 = arith.constant 1.000000e+00 : f32
    %334 = vector.broadcast %cst_80 : f32 to vector<16x128xf32>
    %335 = arith.addf %334, %333 : vector<16x128xf32>
    %336 = tpu.reciprocal %335 {approx = true} : vector<16x128xf32> -> vector<16x128xf32>
    %337 = arith.mulf %11, %336 : vector<16x128xf32>
    %338 = arith.mulf %1, %328 : vector<16x128xf32>
    %cst_81 = arith.constant 0.000000e+00 : f32
    %339 = vector.broadcast %cst_81 : f32 to vector<16x128xf32>
    %340 = arith.addf %339, %338 : vector<16x128xf32>
    %341 = arith.mulf %3, %337 : vector<16x128xf32>
    %342 = arith.addf %340, %341 : vector<16x128xf32>
    %cst_82 = arith.constant 1.000000e+00 : f32
    %343 = vector.broadcast %cst_82 : f32 to vector<16x128xf32>
    %344 = arith.addf %343, %342 : vector<16x128xf32>
    %345 = tpu.reciprocal %344 {approx = true} : vector<16x128xf32> -> vector<16x128xf32>
    %346 = arith.mulf %28, %345 : vector<16x128xf32>
    %347 = arith.mulf %5, %328 : vector<16x128xf32>
    %cst_83 = arith.constant 0.000000e+00 : f32
    %348 = vector.broadcast %cst_83 : f32 to vector<16x128xf32>
    %349 = arith.addf %348, %347 : vector<16x128xf32>
    %350 = arith.mulf %7, %337 : vector<16x128xf32>
    %351 = arith.addf %349, %350 : vector<16x128xf32>
    %cst_84 = arith.constant 1.000000e+00 : f32
    %352 = vector.broadcast %cst_84 : f32 to vector<16x128xf32>
    %353 = arith.addf %352, %351 : vector<16x128xf32>
    %354 = tpu.reciprocal %353 {approx = true} : vector<16x128xf32> -> vector<16x128xf32>
    %355 = arith.mulf %31, %354 : vector<16x128xf32>
    %c9_i32 = arith.constant 9 : i32
    %356 = arith.mulf %1, %346 : vector<16x128xf32>
    %cst_85 = arith.constant 0.000000e+00 : f32
    %357 = vector.broadcast %cst_85 : f32 to vector<16x128xf32>
    %358 = arith.addf %357, %356 : vector<16x128xf32>
    %359 = arith.mulf %5, %355 : vector<16x128xf32>
    %360 = arith.addf %358, %359 : vector<16x128xf32>
    %cst_86 = arith.constant 1.000000e+00 : f32
    %361 = vector.broadcast %cst_86 : f32 to vector<16x128xf32>
    %362 = arith.addf %361, %360 : vector<16x128xf32>
    %363 = tpu.reciprocal %362 {approx = true} : vector<16x128xf32> -> vector<16x128xf32>
    %364 = arith.mulf %9, %363 : vector<16x128xf32>
    %365 = arith.mulf %3, %346 : vector<16x128xf32>
    %cst_87 = arith.constant 0.000000e+00 : f32
    %366 = vector.broadcast %cst_87 : f32 to vector<16x128xf32>
    %367 = arith.addf %366, %365 : vector<16x128xf32>
    %368 = arith.mulf %7, %355 : vector<16x128xf32>
    %369 = arith.addf %367, %368 : vector<16x128xf32>
    %cst_88 = arith.constant 1.000000e+00 : f32
    %370 = vector.broadcast %cst_88 : f32 to vector<16x128xf32>
    %371 = arith.addf %370, %369 : vector<16x128xf32>
    %372 = tpu.reciprocal %371 {approx = true} : vector<16x128xf32> -> vector<16x128xf32>
    %373 = arith.mulf %11, %372 : vector<16x128xf32>
    %374 = arith.mulf %1, %364 : vector<16x128xf32>
    %cst_89 = arith.constant 0.000000e+00 : f32
    %375 = vector.broadcast %cst_89 : f32 to vector<16x128xf32>
    %376 = arith.addf %375, %374 : vector<16x128xf32>
    %377 = arith.mulf %3, %373 : vector<16x128xf32>
    %378 = arith.addf %376, %377 : vector<16x128xf32>
    %cst_90 = arith.constant 1.000000e+00 : f32
    %379 = vector.broadcast %cst_90 : f32 to vector<16x128xf32>
    %380 = arith.addf %379, %378 : vector<16x128xf32>
    %381 = tpu.reciprocal %380 {approx = true} : vector<16x128xf32> -> vector<16x128xf32>
    %382 = arith.mulf %28, %381 : vector<16x128xf32>
    %383 = arith.mulf %5, %364 : vector<16x128xf32>
    %cst_91 = arith.constant 0.000000e+00 : f32
    %384 = vector.broadcast %cst_91 : f32 to vector<16x128xf32>
    %385 = arith.addf %384, %383 : vector<16x128xf32>
    %386 = arith.mulf %7, %373 : vector<16x128xf32>
    %387 = arith.addf %385, %386 : vector<16x128xf32>
    %cst_92 = arith.constant 1.000000e+00 : f32
    %388 = vector.broadcast %cst_92 : f32 to vector<16x128xf32>
    %389 = arith.addf %388, %387 : vector<16x128xf32>
    %390 = tpu.reciprocal %389 {approx = true} : vector<16x128xf32> -> vector<16x128xf32>
    %391 = arith.mulf %31, %390 : vector<16x128xf32>
    %c10_i32 = arith.constant 10 : i32
    %392 = arith.mulf %1, %382 : vector<16x128xf32>
    %cst_93 = arith.constant 0.000000e+00 : f32
    %393 = vector.broadcast %cst_93 : f32 to vector<16x128xf32>
    %394 = arith.addf %393, %392 : vector<16x128xf32>
    %395 = arith.mulf %5, %391 : vector<16x128xf32>
    %396 = arith.addf %394, %395 : vector<16x128xf32>
    %cst_94 = arith.constant 1.000000e+00 : f32
    %397 = vector.broadcast %cst_94 : f32 to vector<16x128xf32>
    %398 = arith.addf %397, %396 : vector<16x128xf32>
    %399 = tpu.reciprocal %398 {approx = true} : vector<16x128xf32> -> vector<16x128xf32>
    %400 = arith.mulf %9, %399 : vector<16x128xf32>
    %401 = arith.mulf %3, %382 : vector<16x128xf32>
    %cst_95 = arith.constant 0.000000e+00 : f32
    %402 = vector.broadcast %cst_95 : f32 to vector<16x128xf32>
    %403 = arith.addf %402, %401 : vector<16x128xf32>
    %404 = arith.mulf %7, %391 : vector<16x128xf32>
    %405 = arith.addf %403, %404 : vector<16x128xf32>
    %cst_96 = arith.constant 1.000000e+00 : f32
    %406 = vector.broadcast %cst_96 : f32 to vector<16x128xf32>
    %407 = arith.addf %406, %405 : vector<16x128xf32>
    %408 = tpu.reciprocal %407 {approx = true} : vector<16x128xf32> -> vector<16x128xf32>
    %409 = arith.mulf %11, %408 : vector<16x128xf32>
    %410 = arith.mulf %1, %400 : vector<16x128xf32>
    %cst_97 = arith.constant 0.000000e+00 : f32
    %411 = vector.broadcast %cst_97 : f32 to vector<16x128xf32>
    %412 = arith.addf %411, %410 : vector<16x128xf32>
    %413 = arith.mulf %3, %409 : vector<16x128xf32>
    %414 = arith.addf %412, %413 : vector<16x128xf32>
    %cst_98 = arith.constant 1.000000e+00 : f32
    %415 = vector.broadcast %cst_98 : f32 to vector<16x128xf32>
    %416 = arith.addf %415, %414 : vector<16x128xf32>
    %417 = tpu.reciprocal %416 {approx = true} : vector<16x128xf32> -> vector<16x128xf32>
    %418 = arith.mulf %28, %417 : vector<16x128xf32>
    %419 = arith.mulf %5, %400 : vector<16x128xf32>
    %cst_99 = arith.constant 0.000000e+00 : f32
    %420 = vector.broadcast %cst_99 : f32 to vector<16x128xf32>
    %421 = arith.addf %420, %419 : vector<16x128xf32>
    %422 = arith.mulf %7, %409 : vector<16x128xf32>
    %423 = arith.addf %421, %422 : vector<16x128xf32>
    %cst_100 = arith.constant 1.000000e+00 : f32
    %424 = vector.broadcast %cst_100 : f32 to vector<16x128xf32>
    %425 = arith.addf %424, %423 : vector<16x128xf32>
    %426 = tpu.reciprocal %425 {approx = true} : vector<16x128xf32> -> vector<16x128xf32>
    %427 = arith.mulf %31, %426 : vector<16x128xf32>
    %c11_i32 = arith.constant 11 : i32
    %428 = arith.mulf %1, %418 : vector<16x128xf32>
    %cst_101 = arith.constant 0.000000e+00 : f32
    %429 = vector.broadcast %cst_101 : f32 to vector<16x128xf32>
    %430 = arith.addf %429, %428 : vector<16x128xf32>
    %431 = arith.mulf %5, %427 : vector<16x128xf32>
    %432 = arith.addf %430, %431 : vector<16x128xf32>
    %cst_102 = arith.constant 1.000000e+00 : f32
    %433 = vector.broadcast %cst_102 : f32 to vector<16x128xf32>
    %434 = arith.addf %433, %432 : vector<16x128xf32>
    %435 = tpu.reciprocal %434 {approx = true} : vector<16x128xf32> -> vector<16x128xf32>
    %436 = arith.mulf %9, %435 : vector<16x128xf32>
    %437 = arith.mulf %3, %418 : vector<16x128xf32>
    %cst_103 = arith.constant 0.000000e+00 : f32
    %438 = vector.broadcast %cst_103 : f32 to vector<16x128xf32>
    %439 = arith.addf %438, %437 : vector<16x128xf32>
    %440 = arith.mulf %7, %427 : vector<16x128xf32>
    %441 = arith.addf %439, %440 : vector<16x128xf32>
    %cst_104 = arith.constant 1.000000e+00 : f32
    %442 = vector.broadcast %cst_104 : f32 to vector<16x128xf32>
    %443 = arith.addf %442, %441 : vector<16x128xf32>
    %444 = tpu.reciprocal %443 {approx = true} : vector<16x128xf32> -> vector<16x128xf32>
    %445 = arith.mulf %11, %444 : vector<16x128xf32>
    %446 = arith.mulf %1, %436 : vector<16x128xf32>
    %cst_105 = arith.constant 0.000000e+00 : f32
    %447 = vector.broadcast %cst_105 : f32 to vector<16x128xf32>
    %448 = arith.addf %447, %446 : vector<16x128xf32>
    %449 = arith.mulf %3, %445 : vector<16x128xf32>
    %450 = arith.addf %448, %449 : vector<16x128xf32>
    %cst_106 = arith.constant 1.000000e+00 : f32
    %451 = vector.broadcast %cst_106 : f32 to vector<16x128xf32>
    %452 = arith.addf %451, %450 : vector<16x128xf32>
    %453 = tpu.reciprocal %452 {approx = true} : vector<16x128xf32> -> vector<16x128xf32>
    %454 = arith.mulf %28, %453 : vector<16x128xf32>
    %455 = arith.mulf %5, %436 : vector<16x128xf32>
    %cst_107 = arith.constant 0.000000e+00 : f32
    %456 = vector.broadcast %cst_107 : f32 to vector<16x128xf32>
    %457 = arith.addf %456, %455 : vector<16x128xf32>
    %458 = arith.mulf %7, %445 : vector<16x128xf32>
    %459 = arith.addf %457, %458 : vector<16x128xf32>
    %cst_108 = arith.constant 1.000000e+00 : f32
    %460 = vector.broadcast %cst_108 : f32 to vector<16x128xf32>
    %461 = arith.addf %460, %459 : vector<16x128xf32>
    %462 = tpu.reciprocal %461 {approx = true} : vector<16x128xf32> -> vector<16x128xf32>
    %463 = arith.mulf %31, %462 : vector<16x128xf32>
    %c12_i32 = arith.constant 12 : i32
    %464 = arith.mulf %1, %454 : vector<16x128xf32>
    %cst_109 = arith.constant 0.000000e+00 : f32
    %465 = vector.broadcast %cst_109 : f32 to vector<16x128xf32>
    %466 = arith.addf %465, %464 : vector<16x128xf32>
    %467 = arith.mulf %5, %463 : vector<16x128xf32>
    %468 = arith.addf %466, %467 : vector<16x128xf32>
    %cst_110 = arith.constant 1.000000e+00 : f32
    %469 = vector.broadcast %cst_110 : f32 to vector<16x128xf32>
    %470 = arith.addf %469, %468 : vector<16x128xf32>
    %471 = tpu.reciprocal %470 {approx = true} : vector<16x128xf32> -> vector<16x128xf32>
    %472 = arith.mulf %9, %471 : vector<16x128xf32>
    %473 = arith.mulf %3, %454 : vector<16x128xf32>
    %cst_111 = arith.constant 0.000000e+00 : f32
    %474 = vector.broadcast %cst_111 : f32 to vector<16x128xf32>
    %475 = arith.addf %474, %473 : vector<16x128xf32>
    %476 = arith.mulf %7, %463 : vector<16x128xf32>
    %477 = arith.addf %475, %476 : vector<16x128xf32>
    %cst_112 = arith.constant 1.000000e+00 : f32
    %478 = vector.broadcast %cst_112 : f32 to vector<16x128xf32>
    %479 = arith.addf %478, %477 : vector<16x128xf32>
    %480 = tpu.reciprocal %479 {approx = true} : vector<16x128xf32> -> vector<16x128xf32>
    %481 = arith.mulf %11, %480 : vector<16x128xf32>
    %482 = arith.mulf %1, %472 : vector<16x128xf32>
    %cst_113 = arith.constant 0.000000e+00 : f32
    %483 = vector.broadcast %cst_113 : f32 to vector<16x128xf32>
    %484 = arith.addf %483, %482 : vector<16x128xf32>
    %485 = arith.mulf %3, %481 : vector<16x128xf32>
    %486 = arith.addf %484, %485 : vector<16x128xf32>
    %cst_114 = arith.constant 1.000000e+00 : f32
    %487 = vector.broadcast %cst_114 : f32 to vector<16x128xf32>
    %488 = arith.addf %487, %486 : vector<16x128xf32>
    %489 = tpu.reciprocal %488 {approx = true} : vector<16x128xf32> -> vector<16x128xf32>
    %490 = arith.mulf %28, %489 : vector<16x128xf32>
    %491 = arith.mulf %5, %472 : vector<16x128xf32>
    %cst_115 = arith.constant 0.000000e+00 : f32
    %492 = vector.broadcast %cst_115 : f32 to vector<16x128xf32>
    %493 = arith.addf %492, %491 : vector<16x128xf32>
    %494 = arith.mulf %7, %481 : vector<16x128xf32>
    %495 = arith.addf %493, %494 : vector<16x128xf32>
    %cst_116 = arith.constant 1.000000e+00 : f32
    %496 = vector.broadcast %cst_116 : f32 to vector<16x128xf32>
    %497 = arith.addf %496, %495 : vector<16x128xf32>
    %498 = tpu.reciprocal %497 {approx = true} : vector<16x128xf32> -> vector<16x128xf32>
    %499 = arith.mulf %31, %498 : vector<16x128xf32>
    %c13_i32 = arith.constant 13 : i32
    %500 = arith.mulf %1, %490 : vector<16x128xf32>
    %cst_117 = arith.constant 0.000000e+00 : f32
    %501 = vector.broadcast %cst_117 : f32 to vector<16x128xf32>
    %502 = arith.addf %501, %500 : vector<16x128xf32>
    %503 = arith.mulf %5, %499 : vector<16x128xf32>
    %504 = arith.addf %502, %503 : vector<16x128xf32>
    %cst_118 = arith.constant 1.000000e+00 : f32
    %505 = vector.broadcast %cst_118 : f32 to vector<16x128xf32>
    %506 = arith.addf %505, %504 : vector<16x128xf32>
    %507 = tpu.reciprocal %506 {approx = true} : vector<16x128xf32> -> vector<16x128xf32>
    %508 = arith.mulf %9, %507 : vector<16x128xf32>
    %509 = arith.mulf %3, %490 : vector<16x128xf32>
    %cst_119 = arith.constant 0.000000e+00 : f32
    %510 = vector.broadcast %cst_119 : f32 to vector<16x128xf32>
    %511 = arith.addf %510, %509 : vector<16x128xf32>
    %512 = arith.mulf %7, %499 : vector<16x128xf32>
    %513 = arith.addf %511, %512 : vector<16x128xf32>
    %cst_120 = arith.constant 1.000000e+00 : f32
    %514 = vector.broadcast %cst_120 : f32 to vector<16x128xf32>
    %515 = arith.addf %514, %513 : vector<16x128xf32>
    %516 = tpu.reciprocal %515 {approx = true} : vector<16x128xf32> -> vector<16x128xf32>
    %517 = arith.mulf %11, %516 : vector<16x128xf32>
    %518 = arith.mulf %1, %508 : vector<16x128xf32>
    %cst_121 = arith.constant 0.000000e+00 : f32
    %519 = vector.broadcast %cst_121 : f32 to vector<16x128xf32>
    %520 = arith.addf %519, %518 : vector<16x128xf32>
    %521 = arith.mulf %3, %517 : vector<16x128xf32>
    %522 = arith.addf %520, %521 : vector<16x128xf32>
    %cst_122 = arith.constant 1.000000e+00 : f32
    %523 = vector.broadcast %cst_122 : f32 to vector<16x128xf32>
    %524 = arith.addf %523, %522 : vector<16x128xf32>
    %525 = tpu.reciprocal %524 {approx = true} : vector<16x128xf32> -> vector<16x128xf32>
    %526 = arith.mulf %28, %525 : vector<16x128xf32>
    %527 = arith.mulf %5, %508 : vector<16x128xf32>
    %cst_123 = arith.constant 0.000000e+00 : f32
    %528 = vector.broadcast %cst_123 : f32 to vector<16x128xf32>
    %529 = arith.addf %528, %527 : vector<16x128xf32>
    %530 = arith.mulf %7, %517 : vector<16x128xf32>
    %531 = arith.addf %529, %530 : vector<16x128xf32>
    %cst_124 = arith.constant 1.000000e+00 : f32
    %532 = vector.broadcast %cst_124 : f32 to vector<16x128xf32>
    %533 = arith.addf %532, %531 : vector<16x128xf32>
    %534 = tpu.reciprocal %533 {approx = true} : vector<16x128xf32> -> vector<16x128xf32>
    %535 = arith.mulf %31, %534 : vector<16x128xf32>
    %c14_i32 = arith.constant 14 : i32
    %536 = arith.mulf %1, %526 : vector<16x128xf32>
    %cst_125 = arith.constant 0.000000e+00 : f32
    %537 = vector.broadcast %cst_125 : f32 to vector<16x128xf32>
    %538 = arith.addf %537, %536 : vector<16x128xf32>
    %539 = arith.mulf %5, %535 : vector<16x128xf32>
    %540 = arith.addf %538, %539 : vector<16x128xf32>
    %cst_126 = arith.constant 1.000000e+00 : f32
    %541 = vector.broadcast %cst_126 : f32 to vector<16x128xf32>
    %542 = arith.addf %541, %540 : vector<16x128xf32>
    %543 = tpu.reciprocal %542 {approx = true} : vector<16x128xf32> -> vector<16x128xf32>
    %544 = arith.mulf %9, %543 : vector<16x128xf32>
    %545 = arith.mulf %3, %526 : vector<16x128xf32>
    %cst_127 = arith.constant 0.000000e+00 : f32
    %546 = vector.broadcast %cst_127 : f32 to vector<16x128xf32>
    %547 = arith.addf %546, %545 : vector<16x128xf32>
    %548 = arith.mulf %7, %535 : vector<16x128xf32>
    %549 = arith.addf %547, %548 : vector<16x128xf32>
    %cst_128 = arith.constant 1.000000e+00 : f32
    %550 = vector.broadcast %cst_128 : f32 to vector<16x128xf32>
    %551 = arith.addf %550, %549 : vector<16x128xf32>
    %552 = tpu.reciprocal %551 {approx = true} : vector<16x128xf32> -> vector<16x128xf32>
    %553 = arith.mulf %11, %552 : vector<16x128xf32>
    %554 = arith.mulf %1, %544 : vector<16x128xf32>
    %cst_129 = arith.constant 0.000000e+00 : f32
    %555 = vector.broadcast %cst_129 : f32 to vector<16x128xf32>
    %556 = arith.addf %555, %554 : vector<16x128xf32>
    %557 = arith.mulf %3, %553 : vector<16x128xf32>
    %558 = arith.addf %556, %557 : vector<16x128xf32>
    %cst_130 = arith.constant 1.000000e+00 : f32
    %559 = vector.broadcast %cst_130 : f32 to vector<16x128xf32>
    %560 = arith.addf %559, %558 : vector<16x128xf32>
    %561 = tpu.reciprocal %560 {approx = true} : vector<16x128xf32> -> vector<16x128xf32>
    %562 = arith.mulf %28, %561 : vector<16x128xf32>
    %563 = arith.mulf %5, %544 : vector<16x128xf32>
    %cst_131 = arith.constant 0.000000e+00 : f32
    %564 = vector.broadcast %cst_131 : f32 to vector<16x128xf32>
    %565 = arith.addf %564, %563 : vector<16x128xf32>
    %566 = arith.mulf %7, %553 : vector<16x128xf32>
    %567 = arith.addf %565, %566 : vector<16x128xf32>
    %cst_132 = arith.constant 1.000000e+00 : f32
    %568 = vector.broadcast %cst_132 : f32 to vector<16x128xf32>
    %569 = arith.addf %568, %567 : vector<16x128xf32>
    %570 = tpu.reciprocal %569 {approx = true} : vector<16x128xf32> -> vector<16x128xf32>
    %571 = arith.mulf %31, %570 : vector<16x128xf32>
    %c15_i32 = arith.constant 15 : i32
    %572 = arith.mulf %1, %562 : vector<16x128xf32>
    %cst_133 = arith.constant 0.000000e+00 : f32
    %573 = vector.broadcast %cst_133 : f32 to vector<16x128xf32>
    %574 = arith.addf %573, %572 : vector<16x128xf32>
    %575 = arith.mulf %5, %571 : vector<16x128xf32>
    %576 = arith.addf %574, %575 : vector<16x128xf32>
    %cst_134 = arith.constant 1.000000e+00 : f32
    %577 = vector.broadcast %cst_134 : f32 to vector<16x128xf32>
    %578 = arith.addf %577, %576 : vector<16x128xf32>
    %579 = tpu.reciprocal %578 {approx = true} : vector<16x128xf32> -> vector<16x128xf32>
    %580 = arith.mulf %9, %579 : vector<16x128xf32>
    %581 = arith.mulf %3, %562 : vector<16x128xf32>
    %cst_135 = arith.constant 0.000000e+00 : f32
    %582 = vector.broadcast %cst_135 : f32 to vector<16x128xf32>
    %583 = arith.addf %582, %581 : vector<16x128xf32>
    %584 = arith.mulf %7, %571 : vector<16x128xf32>
    %585 = arith.addf %583, %584 : vector<16x128xf32>
    %cst_136 = arith.constant 1.000000e+00 : f32
    %586 = vector.broadcast %cst_136 : f32 to vector<16x128xf32>
    %587 = arith.addf %586, %585 : vector<16x128xf32>
    %588 = tpu.reciprocal %587 {approx = true} : vector<16x128xf32> -> vector<16x128xf32>
    %589 = arith.mulf %11, %588 : vector<16x128xf32>
    %590 = arith.mulf %1, %580 : vector<16x128xf32>
    %cst_137 = arith.constant 0.000000e+00 : f32
    %591 = vector.broadcast %cst_137 : f32 to vector<16x128xf32>
    %592 = arith.addf %591, %590 : vector<16x128xf32>
    %593 = arith.mulf %3, %589 : vector<16x128xf32>
    %594 = arith.addf %592, %593 : vector<16x128xf32>
    %cst_138 = arith.constant 1.000000e+00 : f32
    %595 = vector.broadcast %cst_138 : f32 to vector<16x128xf32>
    %596 = arith.addf %595, %594 : vector<16x128xf32>
    %597 = tpu.reciprocal %596 {approx = true} : vector<16x128xf32> -> vector<16x128xf32>
    %598 = arith.mulf %28, %597 : vector<16x128xf32>
    %599 = arith.mulf %5, %580 : vector<16x128xf32>
    %cst_139 = arith.constant 0.000000e+00 : f32
    %600 = vector.broadcast %cst_139 : f32 to vector<16x128xf32>
    %601 = arith.addf %600, %599 : vector<16x128xf32>
    %602 = arith.mulf %7, %589 : vector<16x128xf32>
    %603 = arith.addf %601, %602 : vector<16x128xf32>
    %cst_140 = arith.constant 1.000000e+00 : f32
    %604 = vector.broadcast %cst_140 : f32 to vector<16x128xf32>
    %605 = arith.addf %604, %603 : vector<16x128xf32>
    %606 = tpu.reciprocal %605 {approx = true} : vector<16x128xf32> -> vector<16x128xf32>
    %607 = arith.mulf %31, %606 : vector<16x128xf32>
    %c16_i32_141 = arith.constant 16 : i32
    %608 = arith.mulf %1, %598 : vector<16x128xf32>
    %cst_142 = arith.constant 0.000000e+00 : f32
    %609 = vector.broadcast %cst_142 : f32 to vector<16x128xf32>
    %610 = arith.addf %609, %608 : vector<16x128xf32>
    %611 = arith.mulf %5, %607 : vector<16x128xf32>
    %612 = arith.addf %610, %611 : vector<16x128xf32>
    %cst_143 = arith.constant 1.000000e+00 : f32
    %613 = vector.broadcast %cst_143 : f32 to vector<16x128xf32>
    %614 = arith.addf %613, %612 : vector<16x128xf32>
    %615 = tpu.reciprocal %614 {approx = true} : vector<16x128xf32> -> vector<16x128xf32>
    %616 = arith.mulf %9, %615 : vector<16x128xf32>
    %617 = arith.mulf %3, %598 : vector<16x128xf32>
    %cst_144 = arith.constant 0.000000e+00 : f32
    %618 = vector.broadcast %cst_144 : f32 to vector<16x128xf32>
    %619 = arith.addf %618, %617 : vector<16x128xf32>
    %620 = arith.mulf %7, %607 : vector<16x128xf32>
    %621 = arith.addf %619, %620 : vector<16x128xf32>
    %cst_145 = arith.constant 1.000000e+00 : f32
    %622 = vector.broadcast %cst_145 : f32 to vector<16x128xf32>
    %623 = arith.addf %622, %621 : vector<16x128xf32>
    %624 = tpu.reciprocal %623 {approx = true} : vector<16x128xf32> -> vector<16x128xf32>
    %625 = arith.mulf %11, %624 : vector<16x128xf32>
    %626 = arith.mulf %1, %616 : vector<16x128xf32>
    %cst_146 = arith.constant 0.000000e+00 : f32
    %627 = vector.broadcast %cst_146 : f32 to vector<16x128xf32>
    %628 = arith.addf %627, %626 : vector<16x128xf32>
    %629 = arith.mulf %3, %625 : vector<16x128xf32>
    %630 = arith.addf %628, %629 : vector<16x128xf32>
    %cst_147 = arith.constant 1.000000e+00 : f32
    %631 = vector.broadcast %cst_147 : f32 to vector<16x128xf32>
    %632 = arith.addf %631, %630 : vector<16x128xf32>
    %633 = tpu.reciprocal %632 {approx = true} : vector<16x128xf32> -> vector<16x128xf32>
    %634 = arith.mulf %28, %633 : vector<16x128xf32>
    %635 = arith.mulf %5, %616 : vector<16x128xf32>
    %cst_148 = arith.constant 0.000000e+00 : f32
    %636 = vector.broadcast %cst_148 : f32 to vector<16x128xf32>
    %637 = arith.addf %636, %635 : vector<16x128xf32>
    %638 = arith.mulf %7, %625 : vector<16x128xf32>
    %639 = arith.addf %637, %638 : vector<16x128xf32>
    %cst_149 = arith.constant 1.000000e+00 : f32
    %640 = vector.broadcast %cst_149 : f32 to vector<16x128xf32>
    %641 = arith.addf %640, %639 : vector<16x128xf32>
    %642 = tpu.reciprocal %641 {approx = true} : vector<16x128xf32> -> vector<16x128xf32>
    %643 = arith.mulf %31, %642 : vector<16x128xf32>
    %c17_i32 = arith.constant 17 : i32
    %644 = arith.mulf %1, %634 : vector<16x128xf32>
    %cst_150 = arith.constant 0.000000e+00 : f32
    %645 = vector.broadcast %cst_150 : f32 to vector<16x128xf32>
    %646 = arith.addf %645, %644 : vector<16x128xf32>
    %647 = arith.mulf %5, %643 : vector<16x128xf32>
    %648 = arith.addf %646, %647 : vector<16x128xf32>
    %cst_151 = arith.constant 1.000000e+00 : f32
    %649 = vector.broadcast %cst_151 : f32 to vector<16x128xf32>
    %650 = arith.addf %649, %648 : vector<16x128xf32>
    %651 = tpu.reciprocal %650 {approx = true} : vector<16x128xf32> -> vector<16x128xf32>
    %652 = arith.mulf %9, %651 : vector<16x128xf32>
    %653 = arith.mulf %3, %634 : vector<16x128xf32>
    %cst_152 = arith.constant 0.000000e+00 : f32
    %654 = vector.broadcast %cst_152 : f32 to vector<16x128xf32>
    %655 = arith.addf %654, %653 : vector<16x128xf32>
    %656 = arith.mulf %7, %643 : vector<16x128xf32>
    %657 = arith.addf %655, %656 : vector<16x128xf32>
    %cst_153 = arith.constant 1.000000e+00 : f32
    %658 = vector.broadcast %cst_153 : f32 to vector<16x128xf32>
    %659 = arith.addf %658, %657 : vector<16x128xf32>
    %660 = tpu.reciprocal %659 {approx = true} : vector<16x128xf32> -> vector<16x128xf32>
    %661 = arith.mulf %11, %660 : vector<16x128xf32>
    %662 = arith.mulf %1, %652 : vector<16x128xf32>
    %cst_154 = arith.constant 0.000000e+00 : f32
    %663 = vector.broadcast %cst_154 : f32 to vector<16x128xf32>
    %664 = arith.addf %663, %662 : vector<16x128xf32>
    %665 = arith.mulf %3, %661 : vector<16x128xf32>
    %666 = arith.addf %664, %665 : vector<16x128xf32>
    %cst_155 = arith.constant 1.000000e+00 : f32
    %667 = vector.broadcast %cst_155 : f32 to vector<16x128xf32>
    %668 = arith.addf %667, %666 : vector<16x128xf32>
    %669 = tpu.reciprocal %668 {approx = true} : vector<16x128xf32> -> vector<16x128xf32>
    %670 = arith.mulf %28, %669 : vector<16x128xf32>
    %671 = arith.mulf %5, %652 : vector<16x128xf32>
    %cst_156 = arith.constant 0.000000e+00 : f32
    %672 = vector.broadcast %cst_156 : f32 to vector<16x128xf32>
    %673 = arith.addf %672, %671 : vector<16x128xf32>
    %674 = arith.mulf %7, %661 : vector<16x128xf32>
    %675 = arith.addf %673, %674 : vector<16x128xf32>
    %cst_157 = arith.constant 1.000000e+00 : f32
    %676 = vector.broadcast %cst_157 : f32 to vector<16x128xf32>
    %677 = arith.addf %676, %675 : vector<16x128xf32>
    %678 = tpu.reciprocal %677 {approx = true} : vector<16x128xf32> -> vector<16x128xf32>
    %679 = arith.mulf %31, %678 : vector<16x128xf32>
    %c18_i32 = arith.constant 18 : i32
    %680 = arith.mulf %1, %670 : vector<16x128xf32>
    %cst_158 = arith.constant 0.000000e+00 : f32
    %681 = vector.broadcast %cst_158 : f32 to vector<16x128xf32>
    %682 = arith.addf %681, %680 : vector<16x128xf32>
    %683 = arith.mulf %5, %679 : vector<16x128xf32>
    %684 = arith.addf %682, %683 : vector<16x128xf32>
    %cst_159 = arith.constant 1.000000e+00 : f32
    %685 = vector.broadcast %cst_159 : f32 to vector<16x128xf32>
    %686 = arith.addf %685, %684 : vector<16x128xf32>
    %687 = tpu.reciprocal %686 {approx = true} : vector<16x128xf32> -> vector<16x128xf32>
    %688 = arith.mulf %9, %687 : vector<16x128xf32>
    %689 = arith.mulf %3, %670 : vector<16x128xf32>
    %cst_160 = arith.constant 0.000000e+00 : f32
    %690 = vector.broadcast %cst_160 : f32 to vector<16x128xf32>
    %691 = arith.addf %690, %689 : vector<16x128xf32>
    %692 = arith.mulf %7, %679 : vector<16x128xf32>
    %693 = arith.addf %691, %692 : vector<16x128xf32>
    %cst_161 = arith.constant 1.000000e+00 : f32
    %694 = vector.broadcast %cst_161 : f32 to vector<16x128xf32>
    %695 = arith.addf %694, %693 : vector<16x128xf32>
    %696 = tpu.reciprocal %695 {approx = true} : vector<16x128xf32> -> vector<16x128xf32>
    %697 = arith.mulf %11, %696 : vector<16x128xf32>
    %698 = arith.mulf %1, %688 : vector<16x128xf32>
    %cst_162 = arith.constant 0.000000e+00 : f32
    %699 = vector.broadcast %cst_162 : f32 to vector<16x128xf32>
    %700 = arith.addf %699, %698 : vector<16x128xf32>
    %701 = arith.mulf %3, %697 : vector<16x128xf32>
    %702 = arith.addf %700, %701 : vector<16x128xf32>
    %cst_163 = arith.constant 1.000000e+00 : f32
    %703 = vector.broadcast %cst_163 : f32 to vector<16x128xf32>
    %704 = arith.addf %703, %702 : vector<16x128xf32>
    %705 = tpu.reciprocal %704 {approx = true} : vector<16x128xf32> -> vector<16x128xf32>
    %706 = arith.mulf %28, %705 : vector<16x128xf32>
    %707 = arith.mulf %5, %688 : vector<16x128xf32>
    %cst_164 = arith.constant 0.000000e+00 : f32
    %708 = vector.broadcast %cst_164 : f32 to vector<16x128xf32>
    %709 = arith.addf %708, %707 : vector<16x128xf32>
    %710 = arith.mulf %7, %697 : vector<16x128xf32>
    %711 = arith.addf %709, %710 : vector<16x128xf32>
    %cst_165 = arith.constant 1.000000e+00 : f32
    %712 = vector.broadcast %cst_165 : f32 to vector<16x128xf32>
    %713 = arith.addf %712, %711 : vector<16x128xf32>
    %714 = tpu.reciprocal %713 {approx = true} : vector<16x128xf32> -> vector<16x128xf32>
    %715 = arith.mulf %31, %714 : vector<16x128xf32>
    %c19_i32 = arith.constant 19 : i32
    %716 = arith.mulf %1, %706 : vector<16x128xf32>
    %cst_166 = arith.constant 0.000000e+00 : f32
    %717 = vector.broadcast %cst_166 : f32 to vector<16x128xf32>
    %718 = arith.addf %717, %716 : vector<16x128xf32>
    %719 = arith.mulf %5, %715 : vector<16x128xf32>
    %720 = arith.addf %718, %719 : vector<16x128xf32>
    %cst_167 = arith.constant 1.000000e+00 : f32
    %721 = vector.broadcast %cst_167 : f32 to vector<16x128xf32>
    %722 = arith.addf %721, %720 : vector<16x128xf32>
    %723 = tpu.reciprocal %722 {approx = true} : vector<16x128xf32> -> vector<16x128xf32>
    %724 = arith.mulf %9, %723 : vector<16x128xf32>
    %725 = arith.mulf %3, %706 : vector<16x128xf32>
    %cst_168 = arith.constant 0.000000e+00 : f32
    %726 = vector.broadcast %cst_168 : f32 to vector<16x128xf32>
    %727 = arith.addf %726, %725 : vector<16x128xf32>
    %728 = arith.mulf %7, %715 : vector<16x128xf32>
    %729 = arith.addf %727, %728 : vector<16x128xf32>
    %cst_169 = arith.constant 1.000000e+00 : f32
    %730 = vector.broadcast %cst_169 : f32 to vector<16x128xf32>
    %731 = arith.addf %730, %729 : vector<16x128xf32>
    %732 = tpu.reciprocal %731 {approx = true} : vector<16x128xf32> -> vector<16x128xf32>
    %733 = arith.mulf %11, %732 : vector<16x128xf32>
    %734 = arith.mulf %1, %724 : vector<16x128xf32>
    %cst_170 = arith.constant 0.000000e+00 : f32
    %735 = vector.broadcast %cst_170 : f32 to vector<16x128xf32>
    %736 = arith.addf %735, %734 : vector<16x128xf32>
    %737 = arith.mulf %3, %733 : vector<16x128xf32>
    %738 = arith.addf %736, %737 : vector<16x128xf32>
    %cst_171 = arith.constant 1.000000e+00 : f32
    %739 = vector.broadcast %cst_171 : f32 to vector<16x128xf32>
    %740 = arith.addf %739, %738 : vector<16x128xf32>
    %741 = tpu.reciprocal %740 {approx = true} : vector<16x128xf32> -> vector<16x128xf32>
    %742 = arith.mulf %28, %741 : vector<16x128xf32>
    %743 = arith.mulf %5, %724 : vector<16x128xf32>
    %cst_172 = arith.constant 0.000000e+00 : f32
    %744 = vector.broadcast %cst_172 : f32 to vector<16x128xf32>
    %745 = arith.addf %744, %743 : vector<16x128xf32>
    %746 = arith.mulf %7, %733 : vector<16x128xf32>
    %747 = arith.addf %745, %746 : vector<16x128xf32>
    %cst_173 = arith.constant 1.000000e+00 : f32
    %748 = vector.broadcast %cst_173 : f32 to vector<16x128xf32>
    %749 = arith.addf %748, %747 : vector<16x128xf32>
    %750 = tpu.reciprocal %749 {approx = true} : vector<16x128xf32> -> vector<16x128xf32>
    %751 = arith.mulf %31, %750 : vector<16x128xf32>
    %c20_i32 = arith.constant 20 : i32
    %752 = arith.mulf %1, %742 : vector<16x128xf32>
    %cst_174 = arith.constant 0.000000e+00 : f32
    %753 = vector.broadcast %cst_174 : f32 to vector<16x128xf32>
    %754 = arith.addf %753, %752 : vector<16x128xf32>
    %755 = arith.mulf %5, %751 : vector<16x128xf32>
    %756 = arith.addf %754, %755 : vector<16x128xf32>
    %cst_175 = arith.constant 1.000000e+00 : f32
    %757 = vector.broadcast %cst_175 : f32 to vector<16x128xf32>
    %758 = arith.addf %757, %756 : vector<16x128xf32>
    %759 = tpu.reciprocal %758 {approx = true} : vector<16x128xf32> -> vector<16x128xf32>
    %760 = arith.mulf %9, %759 : vector<16x128xf32>
    %761 = arith.mulf %3, %742 : vector<16x128xf32>
    %cst_176 = arith.constant 0.000000e+00 : f32
    %762 = vector.broadcast %cst_176 : f32 to vector<16x128xf32>
    %763 = arith.addf %762, %761 : vector<16x128xf32>
    %764 = arith.mulf %7, %751 : vector<16x128xf32>
    %765 = arith.addf %763, %764 : vector<16x128xf32>
    %cst_177 = arith.constant 1.000000e+00 : f32
    %766 = vector.broadcast %cst_177 : f32 to vector<16x128xf32>
    %767 = arith.addf %766, %765 : vector<16x128xf32>
    %768 = tpu.reciprocal %767 {approx = true} : vector<16x128xf32> -> vector<16x128xf32>
    %769 = arith.mulf %11, %768 : vector<16x128xf32>
    %770 = arith.mulf %1, %760 : vector<16x128xf32>
    %cst_178 = arith.constant 0.000000e+00 : f32
    %771 = vector.broadcast %cst_178 : f32 to vector<16x128xf32>
    %772 = arith.addf %771, %770 : vector<16x128xf32>
    %773 = arith.mulf %3, %769 : vector<16x128xf32>
    %774 = arith.addf %772, %773 : vector<16x128xf32>
    %cst_179 = arith.constant 1.000000e+00 : f32
    %775 = vector.broadcast %cst_179 : f32 to vector<16x128xf32>
    %776 = arith.addf %775, %774 : vector<16x128xf32>
    %777 = tpu.reciprocal %776 {approx = true} : vector<16x128xf32> -> vector<16x128xf32>
    %778 = arith.mulf %28, %777 : vector<16x128xf32>
    %779 = arith.mulf %5, %760 : vector<16x128xf32>
    %cst_180 = arith.constant 0.000000e+00 : f32
    %780 = vector.broadcast %cst_180 : f32 to vector<16x128xf32>
    %781 = arith.addf %780, %779 : vector<16x128xf32>
    %782 = arith.mulf %7, %769 : vector<16x128xf32>
    %783 = arith.addf %781, %782 : vector<16x128xf32>
    %cst_181 = arith.constant 1.000000e+00 : f32
    %784 = vector.broadcast %cst_181 : f32 to vector<16x128xf32>
    %785 = arith.addf %784, %783 : vector<16x128xf32>
    %786 = tpu.reciprocal %785 {approx = true} : vector<16x128xf32> -> vector<16x128xf32>
    %787 = arith.mulf %31, %786 : vector<16x128xf32>
    %c21_i32 = arith.constant 21 : i32
    %788 = arith.mulf %1, %778 : vector<16x128xf32>
    %cst_182 = arith.constant 0.000000e+00 : f32
    %789 = vector.broadcast %cst_182 : f32 to vector<16x128xf32>
    %790 = arith.addf %789, %788 : vector<16x128xf32>
    %791 = arith.mulf %5, %787 : vector<16x128xf32>
    %792 = arith.addf %790, %791 : vector<16x128xf32>
    %cst_183 = arith.constant 1.000000e+00 : f32
    %793 = vector.broadcast %cst_183 : f32 to vector<16x128xf32>
    %794 = arith.addf %793, %792 : vector<16x128xf32>
    %795 = tpu.reciprocal %794 {approx = true} : vector<16x128xf32> -> vector<16x128xf32>
    %796 = arith.mulf %9, %795 : vector<16x128xf32>
    %797 = arith.mulf %3, %778 : vector<16x128xf32>
    %cst_184 = arith.constant 0.000000e+00 : f32
    %798 = vector.broadcast %cst_184 : f32 to vector<16x128xf32>
    %799 = arith.addf %798, %797 : vector<16x128xf32>
    %800 = arith.mulf %7, %787 : vector<16x128xf32>
    %801 = arith.addf %799, %800 : vector<16x128xf32>
    %cst_185 = arith.constant 1.000000e+00 : f32
    %802 = vector.broadcast %cst_185 : f32 to vector<16x128xf32>
    %803 = arith.addf %802, %801 : vector<16x128xf32>
    %804 = tpu.reciprocal %803 {approx = true} : vector<16x128xf32> -> vector<16x128xf32>
    %805 = arith.mulf %11, %804 : vector<16x128xf32>
    %806 = arith.mulf %1, %796 : vector<16x128xf32>
    %cst_186 = arith.constant 0.000000e+00 : f32
    %807 = vector.broadcast %cst_186 : f32 to vector<16x128xf32>
    %808 = arith.addf %807, %806 : vector<16x128xf32>
    %809 = arith.mulf %3, %805 : vector<16x128xf32>
    %810 = arith.addf %808, %809 : vector<16x128xf32>
    %cst_187 = arith.constant 1.000000e+00 : f32
    %811 = vector.broadcast %cst_187 : f32 to vector<16x128xf32>
    %812 = arith.addf %811, %810 : vector<16x128xf32>
    %813 = tpu.reciprocal %812 {approx = true} : vector<16x128xf32> -> vector<16x128xf32>
    %814 = arith.mulf %28, %813 : vector<16x128xf32>
    %815 = arith.mulf %5, %796 : vector<16x128xf32>
    %cst_188 = arith.constant 0.000000e+00 : f32
    %816 = vector.broadcast %cst_188 : f32 to vector<16x128xf32>
    %817 = arith.addf %816, %815 : vector<16x128xf32>
    %818 = arith.mulf %7, %805 : vector<16x128xf32>
    %819 = arith.addf %817, %818 : vector<16x128xf32>
    %cst_189 = arith.constant 1.000000e+00 : f32
    %820 = vector.broadcast %cst_189 : f32 to vector<16x128xf32>
    %821 = arith.addf %820, %819 : vector<16x128xf32>
    %822 = tpu.reciprocal %821 {approx = true} : vector<16x128xf32> -> vector<16x128xf32>
    %823 = arith.mulf %31, %822 : vector<16x128xf32>
    %c22_i32 = arith.constant 22 : i32
    %824 = arith.mulf %1, %814 : vector<16x128xf32>
    %cst_190 = arith.constant 0.000000e+00 : f32
    %825 = vector.broadcast %cst_190 : f32 to vector<16x128xf32>
    %826 = arith.addf %825, %824 : vector<16x128xf32>
    %827 = arith.mulf %5, %823 : vector<16x128xf32>
    %828 = arith.addf %826, %827 : vector<16x128xf32>
    %cst_191 = arith.constant 1.000000e+00 : f32
    %829 = vector.broadcast %cst_191 : f32 to vector<16x128xf32>
    %830 = arith.addf %829, %828 : vector<16x128xf32>
    %831 = tpu.reciprocal %830 {approx = true} : vector<16x128xf32> -> vector<16x128xf32>
    %832 = arith.mulf %9, %831 : vector<16x128xf32>
    %833 = arith.mulf %3, %814 : vector<16x128xf32>
    %cst_192 = arith.constant 0.000000e+00 : f32
    %834 = vector.broadcast %cst_192 : f32 to vector<16x128xf32>
    %835 = arith.addf %834, %833 : vector<16x128xf32>
    %836 = arith.mulf %7, %823 : vector<16x128xf32>
    %837 = arith.addf %835, %836 : vector<16x128xf32>
    %cst_193 = arith.constant 1.000000e+00 : f32
    %838 = vector.broadcast %cst_193 : f32 to vector<16x128xf32>
    %839 = arith.addf %838, %837 : vector<16x128xf32>
    %840 = tpu.reciprocal %839 {approx = true} : vector<16x128xf32> -> vector<16x128xf32>
    %841 = arith.mulf %11, %840 : vector<16x128xf32>
    %842 = arith.mulf %1, %832 : vector<16x128xf32>
    %cst_194 = arith.constant 0.000000e+00 : f32
    %843 = vector.broadcast %cst_194 : f32 to vector<16x128xf32>
    %844 = arith.addf %843, %842 : vector<16x128xf32>
    %845 = arith.mulf %3, %841 : vector<16x128xf32>
    %846 = arith.addf %844, %845 : vector<16x128xf32>
    %cst_195 = arith.constant 1.000000e+00 : f32
    %847 = vector.broadcast %cst_195 : f32 to vector<16x128xf32>
    %848 = arith.addf %847, %846 : vector<16x128xf32>
    %849 = tpu.reciprocal %848 {approx = true} : vector<16x128xf32> -> vector<16x128xf32>
    %850 = arith.mulf %28, %849 : vector<16x128xf32>
    %851 = arith.mulf %5, %832 : vector<16x128xf32>
    %cst_196 = arith.constant 0.000000e+00 : f32
    %852 = vector.broadcast %cst_196 : f32 to vector<16x128xf32>
    %853 = arith.addf %852, %851 : vector<16x128xf32>
    %854 = arith.mulf %7, %841 : vector<16x128xf32>
    %855 = arith.addf %853, %854 : vector<16x128xf32>
    %cst_197 = arith.constant 1.000000e+00 : f32
    %856 = vector.broadcast %cst_197 : f32 to vector<16x128xf32>
    %857 = arith.addf %856, %855 : vector<16x128xf32>
    %858 = tpu.reciprocal %857 {approx = true} : vector<16x128xf32> -> vector<16x128xf32>
    %859 = arith.mulf %31, %858 : vector<16x128xf32>
    %c23_i32 = arith.constant 23 : i32
    %860 = arith.mulf %1, %850 : vector<16x128xf32>
    %cst_198 = arith.constant 0.000000e+00 : f32
    %861 = vector.broadcast %cst_198 : f32 to vector<16x128xf32>
    %862 = arith.addf %861, %860 : vector<16x128xf32>
    %863 = arith.mulf %5, %859 : vector<16x128xf32>
    %864 = arith.addf %862, %863 : vector<16x128xf32>
    %cst_199 = arith.constant 1.000000e+00 : f32
    %865 = vector.broadcast %cst_199 : f32 to vector<16x128xf32>
    %866 = arith.addf %865, %864 : vector<16x128xf32>
    %867 = tpu.reciprocal %866 {approx = true} : vector<16x128xf32> -> vector<16x128xf32>
    %868 = arith.mulf %9, %867 : vector<16x128xf32>
    %869 = arith.mulf %3, %850 : vector<16x128xf32>
    %cst_200 = arith.constant 0.000000e+00 : f32
    %870 = vector.broadcast %cst_200 : f32 to vector<16x128xf32>
    %871 = arith.addf %870, %869 : vector<16x128xf32>
    %872 = arith.mulf %7, %859 : vector<16x128xf32>
    %873 = arith.addf %871, %872 : vector<16x128xf32>
    %cst_201 = arith.constant 1.000000e+00 : f32
    %874 = vector.broadcast %cst_201 : f32 to vector<16x128xf32>
    %875 = arith.addf %874, %873 : vector<16x128xf32>
    %876 = tpu.reciprocal %875 {approx = true} : vector<16x128xf32> -> vector<16x128xf32>
    %877 = arith.mulf %11, %876 : vector<16x128xf32>
    %878 = arith.mulf %1, %868 : vector<16x128xf32>
    %cst_202 = arith.constant 0.000000e+00 : f32
    %879 = vector.broadcast %cst_202 : f32 to vector<16x128xf32>
    %880 = arith.addf %879, %878 : vector<16x128xf32>
    %881 = arith.mulf %3, %877 : vector<16x128xf32>
    %882 = arith.addf %880, %881 : vector<16x128xf32>
    %cst_203 = arith.constant 1.000000e+00 : f32
    %883 = vector.broadcast %cst_203 : f32 to vector<16x128xf32>
    %884 = arith.addf %883, %882 : vector<16x128xf32>
    %885 = tpu.reciprocal %884 {approx = true} : vector<16x128xf32> -> vector<16x128xf32>
    %886 = arith.mulf %28, %885 : vector<16x128xf32>
    %887 = arith.mulf %5, %868 : vector<16x128xf32>
    %cst_204 = arith.constant 0.000000e+00 : f32
    %888 = vector.broadcast %cst_204 : f32 to vector<16x128xf32>
    %889 = arith.addf %888, %887 : vector<16x128xf32>
    %890 = arith.mulf %7, %877 : vector<16x128xf32>
    %891 = arith.addf %889, %890 : vector<16x128xf32>
    %cst_205 = arith.constant 1.000000e+00 : f32
    %892 = vector.broadcast %cst_205 : f32 to vector<16x128xf32>
    %893 = arith.addf %892, %891 : vector<16x128xf32>
    %894 = tpu.reciprocal %893 {approx = true} : vector<16x128xf32> -> vector<16x128xf32>
    %895 = arith.mulf %31, %894 : vector<16x128xf32>
    %c24_i32 = arith.constant 24 : i32
    %896 = arith.mulf %1, %886 : vector<16x128xf32>
    %cst_206 = arith.constant 0.000000e+00 : f32
    %897 = vector.broadcast %cst_206 : f32 to vector<16x128xf32>
    %898 = arith.addf %897, %896 : vector<16x128xf32>
    %899 = arith.mulf %5, %895 : vector<16x128xf32>
    %900 = arith.addf %898, %899 : vector<16x128xf32>
    %cst_207 = arith.constant 1.000000e+00 : f32
    %901 = vector.broadcast %cst_207 : f32 to vector<16x128xf32>
    %902 = arith.addf %901, %900 : vector<16x128xf32>
    %903 = tpu.reciprocal %902 {approx = true} : vector<16x128xf32> -> vector<16x128xf32>
    %904 = arith.mulf %9, %903 : vector<16x128xf32>
    %905 = arith.mulf %3, %886 : vector<16x128xf32>
    %cst_208 = arith.constant 0.000000e+00 : f32
    %906 = vector.broadcast %cst_208 : f32 to vector<16x128xf32>
    %907 = arith.addf %906, %905 : vector<16x128xf32>
    %908 = arith.mulf %7, %895 : vector<16x128xf32>
    %909 = arith.addf %907, %908 : vector<16x128xf32>
    %cst_209 = arith.constant 1.000000e+00 : f32
    %910 = vector.broadcast %cst_209 : f32 to vector<16x128xf32>
    %911 = arith.addf %910, %909 : vector<16x128xf32>
    %912 = tpu.reciprocal %911 {approx = true} : vector<16x128xf32> -> vector<16x128xf32>
    %913 = arith.mulf %11, %912 : vector<16x128xf32>
    %914 = arith.mulf %1, %904 : vector<16x128xf32>
    %cst_210 = arith.constant 0.000000e+00 : f32
    %915 = vector.broadcast %cst_210 : f32 to vector<16x128xf32>
    %916 = arith.addf %915, %914 : vector<16x128xf32>
    %917 = arith.mulf %3, %913 : vector<16x128xf32>
    %918 = arith.addf %916, %917 : vector<16x128xf32>
    %cst_211 = arith.constant 1.000000e+00 : f32
    %919 = vector.broadcast %cst_211 : f32 to vector<16x128xf32>
    %920 = arith.addf %919, %918 : vector<16x128xf32>
    %921 = tpu.reciprocal %920 {approx = true} : vector<16x128xf32> -> vector<16x128xf32>
    %922 = arith.mulf %28, %921 : vector<16x128xf32>
    %923 = arith.mulf %5, %904 : vector<16x128xf32>
    %cst_212 = arith.constant 0.000000e+00 : f32
    %924 = vector.broadcast %cst_212 : f32 to vector<16x128xf32>
    %925 = arith.addf %924, %923 : vector<16x128xf32>
    %926 = arith.mulf %7, %913 : vector<16x128xf32>
    %927 = arith.addf %925, %926 : vector<16x128xf32>
    %cst_213 = arith.constant 1.000000e+00 : f32
    %928 = vector.broadcast %cst_213 : f32 to vector<16x128xf32>
    %929 = arith.addf %928, %927 : vector<16x128xf32>
    %930 = tpu.reciprocal %929 {approx = true} : vector<16x128xf32> -> vector<16x128xf32>
    %931 = arith.mulf %31, %930 : vector<16x128xf32>
    %c25_i32 = arith.constant 25 : i32
    %932 = arith.mulf %1, %922 : vector<16x128xf32>
    %cst_214 = arith.constant 0.000000e+00 : f32
    %933 = vector.broadcast %cst_214 : f32 to vector<16x128xf32>
    %934 = arith.addf %933, %932 : vector<16x128xf32>
    %935 = arith.mulf %5, %931 : vector<16x128xf32>
    %936 = arith.addf %934, %935 : vector<16x128xf32>
    %cst_215 = arith.constant 1.000000e+00 : f32
    %937 = vector.broadcast %cst_215 : f32 to vector<16x128xf32>
    %938 = arith.addf %937, %936 : vector<16x128xf32>
    %939 = tpu.reciprocal %938 {approx = true} : vector<16x128xf32> -> vector<16x128xf32>
    %940 = arith.mulf %9, %939 : vector<16x128xf32>
    %941 = arith.mulf %3, %922 : vector<16x128xf32>
    %cst_216 = arith.constant 0.000000e+00 : f32
    %942 = vector.broadcast %cst_216 : f32 to vector<16x128xf32>
    %943 = arith.addf %942, %941 : vector<16x128xf32>
    %944 = arith.mulf %7, %931 : vector<16x128xf32>
    %945 = arith.addf %943, %944 : vector<16x128xf32>
    %cst_217 = arith.constant 1.000000e+00 : f32
    %946 = vector.broadcast %cst_217 : f32 to vector<16x128xf32>
    %947 = arith.addf %946, %945 : vector<16x128xf32>
    %948 = tpu.reciprocal %947 {approx = true} : vector<16x128xf32> -> vector<16x128xf32>
    %949 = arith.mulf %11, %948 : vector<16x128xf32>
    %950 = arith.mulf %1, %940 : vector<16x128xf32>
    %cst_218 = arith.constant 0.000000e+00 : f32
    %951 = vector.broadcast %cst_218 : f32 to vector<16x128xf32>
    %952 = arith.addf %951, %950 : vector<16x128xf32>
    %953 = arith.mulf %3, %949 : vector<16x128xf32>
    %954 = arith.addf %952, %953 : vector<16x128xf32>
    %cst_219 = arith.constant 1.000000e+00 : f32
    %955 = vector.broadcast %cst_219 : f32 to vector<16x128xf32>
    %956 = arith.addf %955, %954 : vector<16x128xf32>
    %957 = tpu.reciprocal %956 {approx = true} : vector<16x128xf32> -> vector<16x128xf32>
    %958 = arith.mulf %28, %957 : vector<16x128xf32>
    %959 = arith.mulf %5, %940 : vector<16x128xf32>
    %cst_220 = arith.constant 0.000000e+00 : f32
    %960 = vector.broadcast %cst_220 : f32 to vector<16x128xf32>
    %961 = arith.addf %960, %959 : vector<16x128xf32>
    %962 = arith.mulf %7, %949 : vector<16x128xf32>
    %963 = arith.addf %961, %962 : vector<16x128xf32>
    %cst_221 = arith.constant 1.000000e+00 : f32
    %964 = vector.broadcast %cst_221 : f32 to vector<16x128xf32>
    %965 = arith.addf %964, %963 : vector<16x128xf32>
    %966 = tpu.reciprocal %965 {approx = true} : vector<16x128xf32> -> vector<16x128xf32>
    %967 = arith.mulf %31, %966 : vector<16x128xf32>
    %c26_i32 = arith.constant 26 : i32
    %968 = arith.mulf %1, %958 : vector<16x128xf32>
    %cst_222 = arith.constant 0.000000e+00 : f32
    %969 = vector.broadcast %cst_222 : f32 to vector<16x128xf32>
    %970 = arith.addf %969, %968 : vector<16x128xf32>
    %971 = arith.mulf %5, %967 : vector<16x128xf32>
    %972 = arith.addf %970, %971 : vector<16x128xf32>
    %cst_223 = arith.constant 1.000000e+00 : f32
    %973 = vector.broadcast %cst_223 : f32 to vector<16x128xf32>
    %974 = arith.addf %973, %972 : vector<16x128xf32>
    %975 = tpu.reciprocal %974 {approx = true} : vector<16x128xf32> -> vector<16x128xf32>
    %976 = arith.mulf %9, %975 : vector<16x128xf32>
    %977 = arith.mulf %3, %958 : vector<16x128xf32>
    %cst_224 = arith.constant 0.000000e+00 : f32
    %978 = vector.broadcast %cst_224 : f32 to vector<16x128xf32>
    %979 = arith.addf %978, %977 : vector<16x128xf32>
    %980 = arith.mulf %7, %967 : vector<16x128xf32>
    %981 = arith.addf %979, %980 : vector<16x128xf32>
    %cst_225 = arith.constant 1.000000e+00 : f32
    %982 = vector.broadcast %cst_225 : f32 to vector<16x128xf32>
    %983 = arith.addf %982, %981 : vector<16x128xf32>
    %984 = tpu.reciprocal %983 {approx = true} : vector<16x128xf32> -> vector<16x128xf32>
    %985 = arith.mulf %11, %984 : vector<16x128xf32>
    %986 = arith.mulf %1, %976 : vector<16x128xf32>
    %cst_226 = arith.constant 0.000000e+00 : f32
    %987 = vector.broadcast %cst_226 : f32 to vector<16x128xf32>
    %988 = arith.addf %987, %986 : vector<16x128xf32>
    %989 = arith.mulf %3, %985 : vector<16x128xf32>
    %990 = arith.addf %988, %989 : vector<16x128xf32>
    %cst_227 = arith.constant 1.000000e+00 : f32
    %991 = vector.broadcast %cst_227 : f32 to vector<16x128xf32>
    %992 = arith.addf %991, %990 : vector<16x128xf32>
    %993 = tpu.reciprocal %992 {approx = true} : vector<16x128xf32> -> vector<16x128xf32>
    %994 = arith.mulf %28, %993 : vector<16x128xf32>
    %995 = arith.mulf %5, %976 : vector<16x128xf32>
    %cst_228 = arith.constant 0.000000e+00 : f32
    %996 = vector.broadcast %cst_228 : f32 to vector<16x128xf32>
    %997 = arith.addf %996, %995 : vector<16x128xf32>
    %998 = arith.mulf %7, %985 : vector<16x128xf32>
    %999 = arith.addf %997, %998 : vector<16x128xf32>
    %cst_229 = arith.constant 1.000000e+00 : f32
    %1000 = vector.broadcast %cst_229 : f32 to vector<16x128xf32>
    %1001 = arith.addf %1000, %999 : vector<16x128xf32>
    %1002 = tpu.reciprocal %1001 {approx = true} : vector<16x128xf32> -> vector<16x128xf32>
    %1003 = arith.mulf %31, %1002 : vector<16x128xf32>
    %c27_i32 = arith.constant 27 : i32
    %1004 = arith.mulf %1, %994 : vector<16x128xf32>
    %cst_230 = arith.constant 0.000000e+00 : f32
    %1005 = vector.broadcast %cst_230 : f32 to vector<16x128xf32>
    %1006 = arith.addf %1005, %1004 : vector<16x128xf32>
    %1007 = arith.mulf %5, %1003 : vector<16x128xf32>
    %1008 = arith.addf %1006, %1007 : vector<16x128xf32>
    %cst_231 = arith.constant 1.000000e+00 : f32
    %1009 = vector.broadcast %cst_231 : f32 to vector<16x128xf32>
    %1010 = arith.addf %1009, %1008 : vector<16x128xf32>
    %1011 = tpu.reciprocal %1010 {approx = true} : vector<16x128xf32> -> vector<16x128xf32>
    %1012 = arith.mulf %9, %1011 : vector<16x128xf32>
    %1013 = arith.mulf %3, %994 : vector<16x128xf32>
    %cst_232 = arith.constant 0.000000e+00 : f32
    %1014 = vector.broadcast %cst_232 : f32 to vector<16x128xf32>
    %1015 = arith.addf %1014, %1013 : vector<16x128xf32>
    %1016 = arith.mulf %7, %1003 : vector<16x128xf32>
    %1017 = arith.addf %1015, %1016 : vector<16x128xf32>
    %cst_233 = arith.constant 1.000000e+00 : f32
    %1018 = vector.broadcast %cst_233 : f32 to vector<16x128xf32>
    %1019 = arith.addf %1018, %1017 : vector<16x128xf32>
    %1020 = tpu.reciprocal %1019 {approx = true} : vector<16x128xf32> -> vector<16x128xf32>
    %1021 = arith.mulf %11, %1020 : vector<16x128xf32>
    %1022 = arith.mulf %1, %1012 : vector<16x128xf32>
    %cst_234 = arith.constant 0.000000e+00 : f32
    %1023 = vector.broadcast %cst_234 : f32 to vector<16x128xf32>
    %1024 = arith.addf %1023, %1022 : vector<16x128xf32>
    %1025 = arith.mulf %3, %1021 : vector<16x128xf32>
    %1026 = arith.addf %1024, %1025 : vector<16x128xf32>
    %cst_235 = arith.constant 1.000000e+00 : f32
    %1027 = vector.broadcast %cst_235 : f32 to vector<16x128xf32>
    %1028 = arith.addf %1027, %1026 : vector<16x128xf32>
    %1029 = tpu.reciprocal %1028 {approx = true} : vector<16x128xf32> -> vector<16x128xf32>
    %1030 = arith.mulf %28, %1029 : vector<16x128xf32>
    %1031 = arith.mulf %5, %1012 : vector<16x128xf32>
    %cst_236 = arith.constant 0.000000e+00 : f32
    %1032 = vector.broadcast %cst_236 : f32 to vector<16x128xf32>
    %1033 = arith.addf %1032, %1031 : vector<16x128xf32>
    %1034 = arith.mulf %7, %1021 : vector<16x128xf32>
    %1035 = arith.addf %1033, %1034 : vector<16x128xf32>
    %cst_237 = arith.constant 1.000000e+00 : f32
    %1036 = vector.broadcast %cst_237 : f32 to vector<16x128xf32>
    %1037 = arith.addf %1036, %1035 : vector<16x128xf32>
    %1038 = tpu.reciprocal %1037 {approx = true} : vector<16x128xf32> -> vector<16x128xf32>
    %1039 = arith.mulf %31, %1038 : vector<16x128xf32>
    %c28_i32 = arith.constant 28 : i32
    %1040 = arith.mulf %1, %1030 : vector<16x128xf32>
    %cst_238 = arith.constant 0.000000e+00 : f32
    %1041 = vector.broadcast %cst_238 : f32 to vector<16x128xf32>
    %1042 = arith.addf %1041, %1040 : vector<16x128xf32>
    %1043 = arith.mulf %5, %1039 : vector<16x128xf32>
    %1044 = arith.addf %1042, %1043 : vector<16x128xf32>
    %cst_239 = arith.constant 1.000000e+00 : f32
    %1045 = vector.broadcast %cst_239 : f32 to vector<16x128xf32>
    %1046 = arith.addf %1045, %1044 : vector<16x128xf32>
    %1047 = tpu.reciprocal %1046 {approx = true} : vector<16x128xf32> -> vector<16x128xf32>
    %1048 = arith.mulf %9, %1047 : vector<16x128xf32>
    %1049 = arith.mulf %3, %1030 : vector<16x128xf32>
    %cst_240 = arith.constant 0.000000e+00 : f32
    %1050 = vector.broadcast %cst_240 : f32 to vector<16x128xf32>
    %1051 = arith.addf %1050, %1049 : vector<16x128xf32>
    %1052 = arith.mulf %7, %1039 : vector<16x128xf32>
    %1053 = arith.addf %1051, %1052 : vector<16x128xf32>
    %cst_241 = arith.constant 1.000000e+00 : f32
    %1054 = vector.broadcast %cst_241 : f32 to vector<16x128xf32>
    %1055 = arith.addf %1054, %1053 : vector<16x128xf32>
    %1056 = tpu.reciprocal %1055 {approx = true} : vector<16x128xf32> -> vector<16x128xf32>
    %1057 = arith.mulf %11, %1056 : vector<16x128xf32>
    %1058 = arith.mulf %1, %1048 : vector<16x128xf32>
    %cst_242 = arith.constant 0.000000e+00 : f32
    %1059 = vector.broadcast %cst_242 : f32 to vector<16x128xf32>
    %1060 = arith.addf %1059, %1058 : vector<16x128xf32>
    %1061 = arith.mulf %3, %1057 : vector<16x128xf32>
    %1062 = arith.addf %1060, %1061 : vector<16x128xf32>
    %cst_243 = arith.constant 1.000000e+00 : f32
    %1063 = vector.broadcast %cst_243 : f32 to vector<16x128xf32>
    %1064 = arith.addf %1063, %1062 : vector<16x128xf32>
    %1065 = tpu.reciprocal %1064 {approx = true} : vector<16x128xf32> -> vector<16x128xf32>
    %1066 = arith.mulf %28, %1065 : vector<16x128xf32>
    %1067 = arith.mulf %5, %1048 : vector<16x128xf32>
    %cst_244 = arith.constant 0.000000e+00 : f32
    %1068 = vector.broadcast %cst_244 : f32 to vector<16x128xf32>
    %1069 = arith.addf %1068, %1067 : vector<16x128xf32>
    %1070 = arith.mulf %7, %1057 : vector<16x128xf32>
    %1071 = arith.addf %1069, %1070 : vector<16x128xf32>
    %cst_245 = arith.constant 1.000000e+00 : f32
    %1072 = vector.broadcast %cst_245 : f32 to vector<16x128xf32>
    %1073 = arith.addf %1072, %1071 : vector<16x128xf32>
    %1074 = tpu.reciprocal %1073 {approx = true} : vector<16x128xf32> -> vector<16x128xf32>
    %1075 = arith.mulf %31, %1074 : vector<16x128xf32>
    %c29_i32 = arith.constant 29 : i32
    %1076 = arith.mulf %1, %1066 : vector<16x128xf32>
    %cst_246 = arith.constant 0.000000e+00 : f32
    %1077 = vector.broadcast %cst_246 : f32 to vector<16x128xf32>
    %1078 = arith.addf %1077, %1076 : vector<16x128xf32>
    %1079 = arith.mulf %5, %1075 : vector<16x128xf32>
    %1080 = arith.addf %1078, %1079 : vector<16x128xf32>
    %cst_247 = arith.constant 1.000000e+00 : f32
    %1081 = vector.broadcast %cst_247 : f32 to vector<16x128xf32>
    %1082 = arith.addf %1081, %1080 : vector<16x128xf32>
    %1083 = tpu.reciprocal %1082 {approx = true} : vector<16x128xf32> -> vector<16x128xf32>
    %1084 = arith.mulf %9, %1083 : vector<16x128xf32>
    %1085 = arith.mulf %3, %1066 : vector<16x128xf32>
    %cst_248 = arith.constant 0.000000e+00 : f32
    %1086 = vector.broadcast %cst_248 : f32 to vector<16x128xf32>
    %1087 = arith.addf %1086, %1085 : vector<16x128xf32>
    %1088 = arith.mulf %7, %1075 : vector<16x128xf32>
    %1089 = arith.addf %1087, %1088 : vector<16x128xf32>
    %cst_249 = arith.constant 1.000000e+00 : f32
    %1090 = vector.broadcast %cst_249 : f32 to vector<16x128xf32>
    %1091 = arith.addf %1090, %1089 : vector<16x128xf32>
    %1092 = tpu.reciprocal %1091 {approx = true} : vector<16x128xf32> -> vector<16x128xf32>
    %1093 = arith.mulf %11, %1092 : vector<16x128xf32>
    %1094 = arith.mulf %1, %1084 : vector<16x128xf32>
    %cst_250 = arith.constant 0.000000e+00 : f32
    %1095 = vector.broadcast %cst_250 : f32 to vector<16x128xf32>
    %1096 = arith.addf %1095, %1094 : vector<16x128xf32>
    %1097 = arith.mulf %3, %1093 : vector<16x128xf32>
    %1098 = arith.addf %1096, %1097 : vector<16x128xf32>
    %cst_251 = arith.constant 1.000000e+00 : f32
    %1099 = vector.broadcast %cst_251 : f32 to vector<16x128xf32>
    %1100 = arith.addf %1099, %1098 : vector<16x128xf32>
    %1101 = tpu.reciprocal %1100 {approx = true} : vector<16x128xf32> -> vector<16x128xf32>
    %1102 = arith.mulf %28, %1101 : vector<16x128xf32>
    %1103 = arith.mulf %5, %1084 : vector<16x128xf32>
    %cst_252 = arith.constant 0.000000e+00 : f32
    %1104 = vector.broadcast %cst_252 : f32 to vector<16x128xf32>
    %1105 = arith.addf %1104, %1103 : vector<16x128xf32>
    %1106 = arith.mulf %7, %1093 : vector<16x128xf32>
    %1107 = arith.addf %1105, %1106 : vector<16x128xf32>
    %cst_253 = arith.constant 1.000000e+00 : f32
    %1108 = vector.broadcast %cst_253 : f32 to vector<16x128xf32>
    %1109 = arith.addf %1108, %1107 : vector<16x128xf32>
    %1110 = tpu.reciprocal %1109 {approx = true} : vector<16x128xf32> -> vector<16x128xf32>
    %1111 = arith.mulf %31, %1110 : vector<16x128xf32>
    %c30_i32 = arith.constant 30 : i32
    %1112 = arith.mulf %1, %1102 : vector<16x128xf32>
    %cst_254 = arith.constant 0.000000e+00 : f32
    %1113 = vector.broadcast %cst_254 : f32 to vector<16x128xf32>
    %1114 = arith.addf %1113, %1112 : vector<16x128xf32>
    %1115 = arith.mulf %5, %1111 : vector<16x128xf32>
    %1116 = arith.addf %1114, %1115 : vector<16x128xf32>
    %cst_255 = arith.constant 1.000000e+00 : f32
    %1117 = vector.broadcast %cst_255 : f32 to vector<16x128xf32>
    %1118 = arith.addf %1117, %1116 : vector<16x128xf32>
    %1119 = tpu.reciprocal %1118 {approx = true} : vector<16x128xf32> -> vector<16x128xf32>
    %1120 = arith.mulf %9, %1119 : vector<16x128xf32>
    %1121 = arith.mulf %3, %1102 : vector<16x128xf32>
    %cst_256 = arith.constant 0.000000e+00 : f32
    %1122 = vector.broadcast %cst_256 : f32 to vector<16x128xf32>
    %1123 = arith.addf %1122, %1121 : vector<16x128xf32>
    %1124 = arith.mulf %7, %1111 : vector<16x128xf32>
    %1125 = arith.addf %1123, %1124 : vector<16x128xf32>
    %cst_257 = arith.constant 1.000000e+00 : f32
    %1126 = vector.broadcast %cst_257 : f32 to vector<16x128xf32>
    %1127 = arith.addf %1126, %1125 : vector<16x128xf32>
    %1128 = tpu.reciprocal %1127 {approx = true} : vector<16x128xf32> -> vector<16x128xf32>
    %1129 = arith.mulf %11, %1128 : vector<16x128xf32>
    %1130 = arith.mulf %1, %1120 : vector<16x128xf32>
    %cst_258 = arith.constant 0.000000e+00 : f32
    %1131 = vector.broadcast %cst_258 : f32 to vector<16x128xf32>
    %1132 = arith.addf %1131, %1130 : vector<16x128xf32>
    %1133 = arith.mulf %3, %1129 : vector<16x128xf32>
    %1134 = arith.addf %1132, %1133 : vector<16x128xf32>
    %cst_259 = arith.constant 1.000000e+00 : f32
    %1135 = vector.broadcast %cst_259 : f32 to vector<16x128xf32>
    %1136 = arith.addf %1135, %1134 : vector<16x128xf32>
    %1137 = tpu.reciprocal %1136 {approx = true} : vector<16x128xf32> -> vector<16x128xf32>
    %1138 = arith.mulf %28, %1137 : vector<16x128xf32>
    %1139 = arith.mulf %5, %1120 : vector<16x128xf32>
    %cst_260 = arith.constant 0.000000e+00 : f32
    %1140 = vector.broadcast %cst_260 : f32 to vector<16x128xf32>
    %1141 = arith.addf %1140, %1139 : vector<16x128xf32>
    %1142 = arith.mulf %7, %1129 : vector<16x128xf32>
    %1143 = arith.addf %1141, %1142 : vector<16x128xf32>
    %cst_261 = arith.constant 1.000000e+00 : f32
    %1144 = vector.broadcast %cst_261 : f32 to vector<16x128xf32>
    %1145 = arith.addf %1144, %1143 : vector<16x128xf32>
    %1146 = tpu.reciprocal %1145 {approx = true} : vector<16x128xf32> -> vector<16x128xf32>
    %1147 = arith.mulf %31, %1146 : vector<16x128xf32>
    %c31_i32 = arith.constant 31 : i32
    %1148 = arith.mulf %1, %1138 : vector<16x128xf32>
    %cst_262 = arith.constant 0.000000e+00 : f32
    %1149 = vector.broadcast %cst_262 : f32 to vector<16x128xf32>
    %1150 = arith.addf %1149, %1148 : vector<16x128xf32>
    %1151 = arith.mulf %5, %1147 : vector<16x128xf32>
    %1152 = arith.addf %1150, %1151 : vector<16x128xf32>
    %cst_263 = arith.constant 1.000000e+00 : f32
    %1153 = vector.broadcast %cst_263 : f32 to vector<16x128xf32>
    %1154 = arith.addf %1153, %1152 : vector<16x128xf32>
    %1155 = tpu.reciprocal %1154 {approx = true} : vector<16x128xf32> -> vector<16x128xf32>
    %1156 = arith.mulf %9, %1155 : vector<16x128xf32>
    %1157 = arith.mulf %3, %1138 : vector<16x128xf32>
    %cst_264 = arith.constant 0.000000e+00 : f32
    %1158 = vector.broadcast %cst_264 : f32 to vector<16x128xf32>
    %1159 = arith.addf %1158, %1157 : vector<16x128xf32>
    %1160 = arith.mulf %7, %1147 : vector<16x128xf32>
    %1161 = arith.addf %1159, %1160 : vector<16x128xf32>
    %cst_265 = arith.constant 1.000000e+00 : f32
    %1162 = vector.broadcast %cst_265 : f32 to vector<16x128xf32>
    %1163 = arith.addf %1162, %1161 : vector<16x128xf32>
    %1164 = tpu.reciprocal %1163 {approx = true} : vector<16x128xf32> -> vector<16x128xf32>
    %1165 = arith.mulf %11, %1164 : vector<16x128xf32>
    %1166 = arith.mulf %1, %1156 : vector<16x128xf32>
    %cst_266 = arith.constant 0.000000e+00 : f32
    %1167 = vector.broadcast %cst_266 : f32 to vector<16x128xf32>
    %1168 = arith.addf %1167, %1166 : vector<16x128xf32>
    %1169 = arith.mulf %3, %1165 : vector<16x128xf32>
    %1170 = arith.addf %1168, %1169 : vector<16x128xf32>
    %cst_267 = arith.constant 1.000000e+00 : f32
    %1171 = vector.broadcast %cst_267 : f32 to vector<16x128xf32>
    %1172 = arith.addf %1171, %1170 : vector<16x128xf32>
    %1173 = tpu.reciprocal %1172 {approx = true} : vector<16x128xf32> -> vector<16x128xf32>
    %1174 = arith.mulf %28, %1173 : vector<16x128xf32>
    %1175 = arith.mulf %5, %1156 : vector<16x128xf32>
    %cst_268 = arith.constant 0.000000e+00 : f32
    %1176 = vector.broadcast %cst_268 : f32 to vector<16x128xf32>
    %1177 = arith.addf %1176, %1175 : vector<16x128xf32>
    %1178 = arith.mulf %7, %1165 : vector<16x128xf32>
    %1179 = arith.addf %1177, %1178 : vector<16x128xf32>
    %cst_269 = arith.constant 1.000000e+00 : f32
    %1180 = vector.broadcast %cst_269 : f32 to vector<16x128xf32>
    %1181 = arith.addf %1180, %1179 : vector<16x128xf32>
    %1182 = tpu.reciprocal %1181 {approx = true} : vector<16x128xf32> -> vector<16x128xf32>
    %1183 = arith.mulf %31, %1182 : vector<16x128xf32>
    %c32_i32 = arith.constant 32 : i32
    %1184 = arith.mulf %1, %1174 : vector<16x128xf32>
    %cst_270 = arith.constant 0.000000e+00 : f32
    %1185 = vector.broadcast %cst_270 : f32 to vector<16x128xf32>
    %1186 = arith.addf %1185, %1184 : vector<16x128xf32>
    %1187 = arith.mulf %5, %1183 : vector<16x128xf32>
    %1188 = arith.addf %1186, %1187 : vector<16x128xf32>
    %cst_271 = arith.constant 1.000000e+00 : f32
    %1189 = vector.broadcast %cst_271 : f32 to vector<16x128xf32>
    %1190 = arith.addf %1189, %1188 : vector<16x128xf32>
    %1191 = tpu.reciprocal %1190 {approx = true} : vector<16x128xf32> -> vector<16x128xf32>
    %1192 = arith.mulf %9, %1191 : vector<16x128xf32>
    %1193 = arith.mulf %3, %1174 : vector<16x128xf32>
    %cst_272 = arith.constant 0.000000e+00 : f32
    %1194 = vector.broadcast %cst_272 : f32 to vector<16x128xf32>
    %1195 = arith.addf %1194, %1193 : vector<16x128xf32>
    %1196 = arith.mulf %7, %1183 : vector<16x128xf32>
    %1197 = arith.addf %1195, %1196 : vector<16x128xf32>
    %cst_273 = arith.constant 1.000000e+00 : f32
    %1198 = vector.broadcast %cst_273 : f32 to vector<16x128xf32>
    %1199 = arith.addf %1198, %1197 : vector<16x128xf32>
    %1200 = tpu.reciprocal %1199 {approx = true} : vector<16x128xf32> -> vector<16x128xf32>
    %1201 = arith.mulf %11, %1200 : vector<16x128xf32>
    %1202 = arith.mulf %1, %1192 : vector<16x128xf32>
    %cst_274 = arith.constant 0.000000e+00 : f32
    %1203 = vector.broadcast %cst_274 : f32 to vector<16x128xf32>
    %1204 = arith.addf %1203, %1202 : vector<16x128xf32>
    %1205 = arith.mulf %3, %1201 : vector<16x128xf32>
    %1206 = arith.addf %1204, %1205 : vector<16x128xf32>
    %cst_275 = arith.constant 1.000000e+00 : f32
    %1207 = vector.broadcast %cst_275 : f32 to vector<16x128xf32>
    %1208 = arith.addf %1207, %1206 : vector<16x128xf32>
    %1209 = tpu.reciprocal %1208 {approx = true} : vector<16x128xf32> -> vector<16x128xf32>
    %1210 = arith.mulf %28, %1209 : vector<16x128xf32>
    %1211 = arith.mulf %5, %1192 : vector<16x128xf32>
    %cst_276 = arith.constant 0.000000e+00 : f32
    %1212 = vector.broadcast %cst_276 : f32 to vector<16x128xf32>
    %1213 = arith.addf %1212, %1211 : vector<16x128xf32>
    %1214 = arith.mulf %7, %1201 : vector<16x128xf32>
    %1215 = arith.addf %1213, %1214 : vector<16x128xf32>
    %cst_277 = arith.constant 1.000000e+00 : f32
    %1216 = vector.broadcast %cst_277 : f32 to vector<16x128xf32>
    %1217 = arith.addf %1216, %1215 : vector<16x128xf32>
    %1218 = tpu.reciprocal %1217 {approx = true} : vector<16x128xf32> -> vector<16x128xf32>
    %1219 = arith.mulf %31, %1218 : vector<16x128xf32>
    %c33_i32 = arith.constant 33 : i32
    %1220 = arith.mulf %1, %1210 : vector<16x128xf32>
    %cst_278 = arith.constant 0.000000e+00 : f32
    %1221 = vector.broadcast %cst_278 : f32 to vector<16x128xf32>
    %1222 = arith.addf %1221, %1220 : vector<16x128xf32>
    %1223 = arith.mulf %5, %1219 : vector<16x128xf32>
    %1224 = arith.addf %1222, %1223 : vector<16x128xf32>
    %cst_279 = arith.constant 1.000000e+00 : f32
    %1225 = vector.broadcast %cst_279 : f32 to vector<16x128xf32>
    %1226 = arith.addf %1225, %1224 : vector<16x128xf32>
    %1227 = tpu.reciprocal %1226 {approx = true} : vector<16x128xf32> -> vector<16x128xf32>
    %1228 = arith.mulf %9, %1227 : vector<16x128xf32>
    %1229 = arith.mulf %3, %1210 : vector<16x128xf32>
    %cst_280 = arith.constant 0.000000e+00 : f32
    %1230 = vector.broadcast %cst_280 : f32 to vector<16x128xf32>
    %1231 = arith.addf %1230, %1229 : vector<16x128xf32>
    %1232 = arith.mulf %7, %1219 : vector<16x128xf32>
    %1233 = arith.addf %1231, %1232 : vector<16x128xf32>
    %cst_281 = arith.constant 1.000000e+00 : f32
    %1234 = vector.broadcast %cst_281 : f32 to vector<16x128xf32>
    %1235 = arith.addf %1234, %1233 : vector<16x128xf32>
    %1236 = tpu.reciprocal %1235 {approx = true} : vector<16x128xf32> -> vector<16x128xf32>
    %1237 = arith.mulf %11, %1236 : vector<16x128xf32>
    %1238 = arith.mulf %1, %1228 : vector<16x128xf32>
    %cst_282 = arith.constant 0.000000e+00 : f32
    %1239 = vector.broadcast %cst_282 : f32 to vector<16x128xf32>
    %1240 = arith.addf %1239, %1238 : vector<16x128xf32>
    %1241 = arith.mulf %3, %1237 : vector<16x128xf32>
    %1242 = arith.addf %1240, %1241 : vector<16x128xf32>
    %cst_283 = arith.constant 1.000000e+00 : f32
    %1243 = vector.broadcast %cst_283 : f32 to vector<16x128xf32>
    %1244 = arith.addf %1243, %1242 : vector<16x128xf32>
    %1245 = tpu.reciprocal %1244 {approx = true} : vector<16x128xf32> -> vector<16x128xf32>
    %1246 = arith.mulf %28, %1245 : vector<16x128xf32>
    %1247 = arith.mulf %5, %1228 : vector<16x128xf32>
    %cst_284 = arith.constant 0.000000e+00 : f32
    %1248 = vector.broadcast %cst_284 : f32 to vector<16x128xf32>
    %1249 = arith.addf %1248, %1247 : vector<16x128xf32>
    %1250 = arith.mulf %7, %1237 : vector<16x128xf32>
    %1251 = arith.addf %1249, %1250 : vector<16x128xf32>
    %cst_285 = arith.constant 1.000000e+00 : f32
    %1252 = vector.broadcast %cst_285 : f32 to vector<16x128xf32>
    %1253 = arith.addf %1252, %1251 : vector<16x128xf32>
    %1254 = tpu.reciprocal %1253 {approx = true} : vector<16x128xf32> -> vector<16x128xf32>
    %1255 = arith.mulf %31, %1254 : vector<16x128xf32>
    %c34_i32 = arith.constant 34 : i32
    %1256 = arith.mulf %1, %1246 : vector<16x128xf32>
    %cst_286 = arith.constant 0.000000e+00 : f32
    %1257 = vector.broadcast %cst_286 : f32 to vector<16x128xf32>
    %1258 = arith.addf %1257, %1256 : vector<16x128xf32>
    %1259 = arith.mulf %5, %1255 : vector<16x128xf32>
    %1260 = arith.addf %1258, %1259 : vector<16x128xf32>
    %cst_287 = arith.constant 1.000000e+00 : f32
    %1261 = vector.broadcast %cst_287 : f32 to vector<16x128xf32>
    %1262 = arith.addf %1261, %1260 : vector<16x128xf32>
    %1263 = tpu.reciprocal %1262 {approx = true} : vector<16x128xf32> -> vector<16x128xf32>
    %1264 = arith.mulf %9, %1263 : vector<16x128xf32>
    %1265 = arith.mulf %3, %1246 : vector<16x128xf32>
    %cst_288 = arith.constant 0.000000e+00 : f32
    %1266 = vector.broadcast %cst_288 : f32 to vector<16x128xf32>
    %1267 = arith.addf %1266, %1265 : vector<16x128xf32>
    %1268 = arith.mulf %7, %1255 : vector<16x128xf32>
    %1269 = arith.addf %1267, %1268 : vector<16x128xf32>
    %cst_289 = arith.constant 1.000000e+00 : f32
    %1270 = vector.broadcast %cst_289 : f32 to vector<16x128xf32>
    %1271 = arith.addf %1270, %1269 : vector<16x128xf32>
    %1272 = tpu.reciprocal %1271 {approx = true} : vector<16x128xf32> -> vector<16x128xf32>
    %1273 = arith.mulf %11, %1272 : vector<16x128xf32>
    %1274 = arith.mulf %1, %1264 : vector<16x128xf32>
    %cst_290 = arith.constant 0.000000e+00 : f32
    %1275 = vector.broadcast %cst_290 : f32 to vector<16x128xf32>
    %1276 = arith.addf %1275, %1274 : vector<16x128xf32>
    %1277 = arith.mulf %3, %1273 : vector<16x128xf32>
    %1278 = arith.addf %1276, %1277 : vector<16x128xf32>
    %cst_291 = arith.constant 1.000000e+00 : f32
    %1279 = vector.broadcast %cst_291 : f32 to vector<16x128xf32>
    %1280 = arith.addf %1279, %1278 : vector<16x128xf32>
    %1281 = tpu.reciprocal %1280 {approx = true} : vector<16x128xf32> -> vector<16x128xf32>
    %1282 = arith.mulf %28, %1281 : vector<16x128xf32>
    %1283 = arith.mulf %5, %1264 : vector<16x128xf32>
    %cst_292 = arith.constant 0.000000e+00 : f32
    %1284 = vector.broadcast %cst_292 : f32 to vector<16x128xf32>
    %1285 = arith.addf %1284, %1283 : vector<16x128xf32>
    %1286 = arith.mulf %7, %1273 : vector<16x128xf32>
    %1287 = arith.addf %1285, %1286 : vector<16x128xf32>
    %cst_293 = arith.constant 1.000000e+00 : f32
    %1288 = vector.broadcast %cst_293 : f32 to vector<16x128xf32>
    %1289 = arith.addf %1288, %1287 : vector<16x128xf32>
    %1290 = tpu.reciprocal %1289 {approx = true} : vector<16x128xf32> -> vector<16x128xf32>
    %1291 = arith.mulf %31, %1290 : vector<16x128xf32>
    %c35_i32 = arith.constant 35 : i32
    %1292 = arith.mulf %1, %1282 : vector<16x128xf32>
    %cst_294 = arith.constant 0.000000e+00 : f32
    %1293 = vector.broadcast %cst_294 : f32 to vector<16x128xf32>
    %1294 = arith.addf %1293, %1292 : vector<16x128xf32>
    %1295 = arith.mulf %5, %1291 : vector<16x128xf32>
    %1296 = arith.addf %1294, %1295 : vector<16x128xf32>
    %cst_295 = arith.constant 1.000000e+00 : f32
    %1297 = vector.broadcast %cst_295 : f32 to vector<16x128xf32>
    %1298 = arith.addf %1297, %1296 : vector<16x128xf32>
    %1299 = tpu.reciprocal %1298 {approx = true} : vector<16x128xf32> -> vector<16x128xf32>
    %1300 = arith.mulf %9, %1299 : vector<16x128xf32>
    %1301 = arith.mulf %3, %1282 : vector<16x128xf32>
    %cst_296 = arith.constant 0.000000e+00 : f32
    %1302 = vector.broadcast %cst_296 : f32 to vector<16x128xf32>
    %1303 = arith.addf %1302, %1301 : vector<16x128xf32>
    %1304 = arith.mulf %7, %1291 : vector<16x128xf32>
    %1305 = arith.addf %1303, %1304 : vector<16x128xf32>
    %cst_297 = arith.constant 1.000000e+00 : f32
    %1306 = vector.broadcast %cst_297 : f32 to vector<16x128xf32>
    %1307 = arith.addf %1306, %1305 : vector<16x128xf32>
    %1308 = tpu.reciprocal %1307 {approx = true} : vector<16x128xf32> -> vector<16x128xf32>
    %1309 = arith.mulf %11, %1308 : vector<16x128xf32>
    %1310 = arith.mulf %1, %1300 : vector<16x128xf32>
    %cst_298 = arith.constant 0.000000e+00 : f32
    %1311 = vector.broadcast %cst_298 : f32 to vector<16x128xf32>
    %1312 = arith.addf %1311, %1310 : vector<16x128xf32>
    %1313 = arith.mulf %3, %1309 : vector<16x128xf32>
    %1314 = arith.addf %1312, %1313 : vector<16x128xf32>
    %cst_299 = arith.constant 1.000000e+00 : f32
    %1315 = vector.broadcast %cst_299 : f32 to vector<16x128xf32>
    %1316 = arith.addf %1315, %1314 : vector<16x128xf32>
    %1317 = tpu.reciprocal %1316 {approx = true} : vector<16x128xf32> -> vector<16x128xf32>
    %1318 = arith.mulf %28, %1317 : vector<16x128xf32>
    %1319 = arith.mulf %5, %1300 : vector<16x128xf32>
    %cst_300 = arith.constant 0.000000e+00 : f32
    %1320 = vector.broadcast %cst_300 : f32 to vector<16x128xf32>
    %1321 = arith.addf %1320, %1319 : vector<16x128xf32>
    %1322 = arith.mulf %7, %1309 : vector<16x128xf32>
    %1323 = arith.addf %1321, %1322 : vector<16x128xf32>
    %cst_301 = arith.constant 1.000000e+00 : f32
    %1324 = vector.broadcast %cst_301 : f32 to vector<16x128xf32>
    %1325 = arith.addf %1324, %1323 : vector<16x128xf32>
    %1326 = tpu.reciprocal %1325 {approx = true} : vector<16x128xf32> -> vector<16x128xf32>
    %1327 = arith.mulf %31, %1326 : vector<16x128xf32>
    %1328 = arith.mulf %1, %1318 : vector<16x128xf32>
    %cst_302 = arith.constant 0.000000e+00 : f32
    %1329 = vector.broadcast %cst_302 : f32 to vector<16x128xf32>
    %1330 = arith.addf %1329, %1328 : vector<16x128xf32>
    %1331 = arith.mulf %5, %1327 : vector<16x128xf32>
    %1332 = arith.addf %1330, %1331 : vector<16x128xf32>
    %cst_303 = arith.constant 1.000000e+00 : f32
    %1333 = vector.broadcast %cst_303 : f32 to vector<16x128xf32>
    %1334 = arith.addf %1333, %1332 : vector<16x128xf32>
    %1335 = tpu.reciprocal %1334 {approx = true} : vector<16x128xf32> -> vector<16x128xf32>
    %1336 = arith.mulf %1334, %1335 : vector<16x128xf32>
    %cst_304 = arith.constant 2.000000e+00 : f32
    %1337 = vector.broadcast %cst_304 : f32 to vector<16x128xf32>
    %1338 = arith.subf %1337, %1336 : vector<16x128xf32>
    %1339 = arith.mulf %1335, %1338 : vector<16x128xf32>
    %1340 = arith.mulf %9, %1339 : vector<16x128xf32>
    %1341 = arith.mulf %3, %1318 : vector<16x128xf32>
    %cst_305 = arith.constant 0.000000e+00 : f32
    %1342 = vector.broadcast %cst_305 : f32 to vector<16x128xf32>
    %1343 = arith.addf %1342, %1341 : vector<16x128xf32>
    %1344 = arith.mulf %7, %1327 : vector<16x128xf32>
    %1345 = arith.addf %1343, %1344 : vector<16x128xf32>
    %cst_306 = arith.constant 1.000000e+00 : f32
    %1346 = vector.broadcast %cst_306 : f32 to vector<16x128xf32>
    %1347 = arith.addf %1346, %1345 : vector<16x128xf32>
    %1348 = tpu.reciprocal %1347 {approx = true} : vector<16x128xf32> -> vector<16x128xf32>
    %1349 = arith.mulf %1347, %1348 : vector<16x128xf32>
    %cst_307 = arith.constant 2.000000e+00 : f32
    %1350 = vector.broadcast %cst_307 : f32 to vector<16x128xf32>
    %1351 = arith.subf %1350, %1349 : vector<16x128xf32>
    %1352 = arith.mulf %1348, %1351 : vector<16x128xf32>
    %1353 = arith.mulf %11, %1352 : vector<16x128xf32>
    %1354 = arith.mulf %1, %1340 : vector<16x128xf32>
    %cst_308 = arith.constant 0.000000e+00 : f32
    %1355 = vector.broadcast %cst_308 : f32 to vector<16x128xf32>
    %1356 = arith.addf %1355, %1354 : vector<16x128xf32>
    %1357 = arith.mulf %3, %1353 : vector<16x128xf32>
    %1358 = arith.addf %1356, %1357 : vector<16x128xf32>
    %cst_309 = arith.constant 1.000000e+00 : f32
    %1359 = vector.broadcast %cst_309 : f32 to vector<16x128xf32>
    %1360 = arith.addf %1359, %1358 : vector<16x128xf32>
    %1361 = tpu.reciprocal %1360 {approx = true} : vector<16x128xf32> -> vector<16x128xf32>
    %1362 = arith.mulf %1360, %1361 : vector<16x128xf32>
    %cst_310 = arith.constant 2.000000e+00 : f32
    %1363 = vector.broadcast %cst_310 : f32 to vector<16x128xf32>
    %1364 = arith.subf %1363, %1362 : vector<16x128xf32>
    %1365 = arith.mulf %1361, %1364 : vector<16x128xf32>
    %1366 = arith.mulf %28, %1365 : vector<16x128xf32>
    %1367 = arith.mulf %5, %1340 : vector<16x128xf32>
    %cst_311 = arith.constant 0.000000e+00 : f32
    %1368 = vector.broadcast %cst_311 : f32 to vector<16x128xf32>
    %1369 = arith.addf %1368, %1367 : vector<16x128xf32>
    %1370 = arith.mulf %7, %1353 : vector<16x128xf32>
    %1371 = arith.addf %1369, %1370 : vector<16x128xf32>
    %cst_312 = arith.constant 1.000000e+00 : f32
    %1372 = vector.broadcast %cst_312 : f32 to vector<16x128xf32>
    %1373 = arith.addf %1372, %1371 : vector<16x128xf32>
    %1374 = tpu.reciprocal %1373 {approx = true} : vector<16x128xf32> -> vector<16x128xf32>
    %1375 = arith.mulf %1373, %1374 : vector<16x128xf32>
    %cst_313 = arith.constant 2.000000e+00 : f32
    %1376 = vector.broadcast %cst_313 : f32 to vector<16x128xf32>
    %1377 = arith.subf %1376, %1375 : vector<16x128xf32>
    %1378 = arith.mulf %1374, %1377 : vector<16x128xf32>
    %1379 = arith.mulf %31, %1378 : vector<16x128xf32>
    %1380 = arith.mulf %1, %1366 : vector<16x128xf32>
    %cst_314 = arith.constant 0.000000e+00 : f32
    %1381 = vector.broadcast %cst_314 : f32 to vector<16x128xf32>
    %1382 = arith.addf %1381, %1380 : vector<16x128xf32>
    %1383 = arith.mulf %5, %1379 : vector<16x128xf32>
    %1384 = arith.addf %1382, %1383 : vector<16x128xf32>
    %cst_315 = arith.constant 1.000000e+00 : f32
    %1385 = vector.broadcast %cst_315 : f32 to vector<16x128xf32>
    %1386 = arith.addf %1385, %1384 : vector<16x128xf32>
    %1387 = tpu.reciprocal %1386 {approx = true} : vector<16x128xf32> -> vector<16x128xf32>
    %1388 = arith.mulf %1386, %1387 : vector<16x128xf32>
    %cst_316 = arith.constant 2.000000e+00 : f32
    %1389 = vector.broadcast %cst_316 : f32 to vector<16x128xf32>
    %1390 = arith.subf %1389, %1388 : vector<16x128xf32>
    %1391 = arith.mulf %1387, %1390 : vector<16x128xf32>
    %1392 = arith.mulf %9, %1391 : vector<16x128xf32>
    %1393 = arith.mulf %3, %1366 : vector<16x128xf32>
    %cst_317 = arith.constant 0.000000e+00 : f32
    %1394 = vector.broadcast %cst_317 : f32 to vector<16x128xf32>
    %1395 = arith.addf %1394, %1393 : vector<16x128xf32>
    %1396 = arith.mulf %7, %1379 : vector<16x128xf32>
    %1397 = arith.addf %1395, %1396 : vector<16x128xf32>
    %cst_318 = arith.constant 1.000000e+00 : f32
    %1398 = vector.broadcast %cst_318 : f32 to vector<16x128xf32>
    %1399 = arith.addf %1398, %1397 : vector<16x128xf32>
    %1400 = tpu.reciprocal %1399 {approx = true} : vector<16x128xf32> -> vector<16x128xf32>
    %1401 = arith.mulf %1399, %1400 : vector<16x128xf32>
    %cst_319 = arith.constant 2.000000e+00 : f32
    %1402 = vector.broadcast %cst_319 : f32 to vector<16x128xf32>
    %1403 = arith.subf %1402, %1401 : vector<16x128xf32>
    %1404 = arith.mulf %1400, %1403 : vector<16x128xf32>
    %1405 = arith.mulf %11, %1404 : vector<16x128xf32>
    %1406 = arith.mulf %1, %1392 : vector<16x128xf32>
    %cst_320 = arith.constant 0.000000e+00 : f32
    %1407 = vector.broadcast %cst_320 : f32 to vector<16x128xf32>
    %1408 = arith.addf %1407, %1406 : vector<16x128xf32>
    %1409 = arith.mulf %3, %1405 : vector<16x128xf32>
    %1410 = arith.addf %1408, %1409 : vector<16x128xf32>
    %cst_321 = arith.constant 1.000000e+00 : f32
    %1411 = vector.broadcast %cst_321 : f32 to vector<16x128xf32>
    %1412 = arith.addf %1411, %1410 : vector<16x128xf32>
    %1413 = tpu.reciprocal %1412 {approx = true} : vector<16x128xf32> -> vector<16x128xf32>
    %1414 = arith.mulf %1412, %1413 : vector<16x128xf32>
    %cst_322 = arith.constant 2.000000e+00 : f32
    %1415 = vector.broadcast %cst_322 : f32 to vector<16x128xf32>
    %1416 = arith.subf %1415, %1414 : vector<16x128xf32>
    %1417 = arith.mulf %1413, %1416 : vector<16x128xf32>
    %1418 = arith.mulf %28, %1417 : vector<16x128xf32>
    %1419 = arith.mulf %5, %1392 : vector<16x128xf32>
    %cst_323 = arith.constant 0.000000e+00 : f32
    %1420 = vector.broadcast %cst_323 : f32 to vector<16x128xf32>
    %1421 = arith.addf %1420, %1419 : vector<16x128xf32>
    %1422 = arith.mulf %7, %1405 : vector<16x128xf32>
    %1423 = arith.addf %1421, %1422 : vector<16x128xf32>
    %cst_324 = arith.constant 1.000000e+00 : f32
    %1424 = vector.broadcast %cst_324 : f32 to vector<16x128xf32>
    %1425 = arith.addf %1424, %1423 : vector<16x128xf32>
    %1426 = tpu.reciprocal %1425 {approx = true} : vector<16x128xf32> -> vector<16x128xf32>
    %1427 = arith.mulf %1425, %1426 : vector<16x128xf32>
    %cst_325 = arith.constant 2.000000e+00 : f32
    %1428 = vector.broadcast %cst_325 : f32 to vector<16x128xf32>
    %1429 = arith.subf %1428, %1427 : vector<16x128xf32>
    %1430 = arith.mulf %1426, %1429 : vector<16x128xf32>
    %1431 = arith.mulf %31, %1430 : vector<16x128xf32>
    %1432 = arith.mulf %1, %1418 : vector<16x128xf32>
    %cst_326 = arith.constant 0.000000e+00 : f32
    %1433 = vector.broadcast %cst_326 : f32 to vector<16x128xf32>
    %1434 = arith.addf %1433, %1432 : vector<16x128xf32>
    %1435 = arith.mulf %5, %1431 : vector<16x128xf32>
    %1436 = arith.addf %1434, %1435 : vector<16x128xf32>
    %cst_327 = arith.constant 1.000000e+00 : f32
    %1437 = vector.broadcast %cst_327 : f32 to vector<16x128xf32>
    %1438 = arith.addf %1437, %1436 : vector<16x128xf32>
    %1439 = tpu.reciprocal %1438 {approx = true} : vector<16x128xf32> -> vector<16x128xf32>
    %1440 = arith.mulf %1438, %1439 : vector<16x128xf32>
    %cst_328 = arith.constant 2.000000e+00 : f32
    %1441 = vector.broadcast %cst_328 : f32 to vector<16x128xf32>
    %1442 = arith.subf %1441, %1440 : vector<16x128xf32>
    %1443 = arith.mulf %1439, %1442 : vector<16x128xf32>
    %1444 = arith.mulf %9, %1443 : vector<16x128xf32>
    %1445 = arith.mulf %3, %1418 : vector<16x128xf32>
    %cst_329 = arith.constant 0.000000e+00 : f32
    %1446 = vector.broadcast %cst_329 : f32 to vector<16x128xf32>
    %1447 = arith.addf %1446, %1445 : vector<16x128xf32>
    %1448 = arith.mulf %7, %1431 : vector<16x128xf32>
    %1449 = arith.addf %1447, %1448 : vector<16x128xf32>
    %cst_330 = arith.constant 1.000000e+00 : f32
    %1450 = vector.broadcast %cst_330 : f32 to vector<16x128xf32>
    %1451 = arith.addf %1450, %1449 : vector<16x128xf32>
    %1452 = tpu.reciprocal %1451 {approx = true} : vector<16x128xf32> -> vector<16x128xf32>
    %1453 = arith.mulf %1451, %1452 : vector<16x128xf32>
    %cst_331 = arith.constant 2.000000e+00 : f32
    %1454 = vector.broadcast %cst_331 : f32 to vector<16x128xf32>
    %1455 = arith.subf %1454, %1453 : vector<16x128xf32>
    %1456 = arith.mulf %1452, %1455 : vector<16x128xf32>
    %1457 = arith.mulf %11, %1456 : vector<16x128xf32>
    %1458 = arith.mulf %1, %1444 : vector<16x128xf32>
    %cst_332 = arith.constant 0.000000e+00 : f32
    %1459 = vector.broadcast %cst_332 : f32 to vector<16x128xf32>
    %1460 = arith.addf %1459, %1458 : vector<16x128xf32>
    %1461 = arith.mulf %3, %1457 : vector<16x128xf32>
    %1462 = arith.addf %1460, %1461 : vector<16x128xf32>
    %cst_333 = arith.constant 1.000000e+00 : f32
    %1463 = vector.broadcast %cst_333 : f32 to vector<16x128xf32>
    %1464 = arith.addf %1463, %1462 : vector<16x128xf32>
    %1465 = tpu.reciprocal %1464 {approx = true} : vector<16x128xf32> -> vector<16x128xf32>
    %1466 = arith.mulf %1464, %1465 : vector<16x128xf32>
    %cst_334 = arith.constant 2.000000e+00 : f32
    %1467 = vector.broadcast %cst_334 : f32 to vector<16x128xf32>
    %1468 = arith.subf %1467, %1466 : vector<16x128xf32>
    %1469 = arith.mulf %1465, %1468 : vector<16x128xf32>
    %1470 = arith.mulf %28, %1469 : vector<16x128xf32>
    %1471 = arith.mulf %5, %1444 : vector<16x128xf32>
    %cst_335 = arith.constant 0.000000e+00 : f32
    %1472 = vector.broadcast %cst_335 : f32 to vector<16x128xf32>
    %1473 = arith.addf %1472, %1471 : vector<16x128xf32>
    %1474 = arith.mulf %7, %1457 : vector<16x128xf32>
    %1475 = arith.addf %1473, %1474 : vector<16x128xf32>
    %cst_336 = arith.constant 1.000000e+00 : f32
    %1476 = vector.broadcast %cst_336 : f32 to vector<16x128xf32>
    %1477 = arith.addf %1476, %1475 : vector<16x128xf32>
    %1478 = tpu.reciprocal %1477 {approx = true} : vector<16x128xf32> -> vector<16x128xf32>
    %1479 = arith.mulf %1477, %1478 : vector<16x128xf32>
    %cst_337 = arith.constant 2.000000e+00 : f32
    %1480 = vector.broadcast %cst_337 : f32 to vector<16x128xf32>
    %1481 = arith.subf %1480, %1479 : vector<16x128xf32>
    %1482 = arith.mulf %1478, %1481 : vector<16x128xf32>
    %1483 = arith.mulf %31, %1482 : vector<16x128xf32>
    %1484 = arith.mulf %1, %1470 : vector<16x128xf32>
    %cst_338 = arith.constant 0.000000e+00 : f32
    %1485 = vector.broadcast %cst_338 : f32 to vector<16x128xf32>
    %1486 = arith.addf %1485, %1484 : vector<16x128xf32>
    %1487 = arith.mulf %5, %1483 : vector<16x128xf32>
    %1488 = arith.addf %1486, %1487 : vector<16x128xf32>
    %cst_339 = arith.constant 1.000000e+00 : f32
    %1489 = vector.broadcast %cst_339 : f32 to vector<16x128xf32>
    %1490 = arith.addf %1489, %1488 : vector<16x128xf32>
    %1491 = tpu.reciprocal %1490 {approx = true} : vector<16x128xf32> -> vector<16x128xf32>
    %1492 = arith.mulf %1490, %1491 : vector<16x128xf32>
    %cst_340 = arith.constant 2.000000e+00 : f32
    %1493 = vector.broadcast %cst_340 : f32 to vector<16x128xf32>
    %1494 = arith.subf %1493, %1492 : vector<16x128xf32>
    %1495 = arith.mulf %1491, %1494 : vector<16x128xf32>
    %1496 = arith.mulf %9, %1495 : vector<16x128xf32>
    %1497 = arith.mulf %3, %1470 : vector<16x128xf32>
    %cst_341 = arith.constant 0.000000e+00 : f32
    %1498 = vector.broadcast %cst_341 : f32 to vector<16x128xf32>
    %1499 = arith.addf %1498, %1497 : vector<16x128xf32>
    %1500 = arith.mulf %7, %1483 : vector<16x128xf32>
    %1501 = arith.addf %1499, %1500 : vector<16x128xf32>
    %cst_342 = arith.constant 1.000000e+00 : f32
    %1502 = vector.broadcast %cst_342 : f32 to vector<16x128xf32>
    %1503 = arith.addf %1502, %1501 : vector<16x128xf32>
    %1504 = tpu.reciprocal %1503 {approx = true} : vector<16x128xf32> -> vector<16x128xf32>
    %1505 = arith.mulf %1503, %1504 : vector<16x128xf32>
    %cst_343 = arith.constant 2.000000e+00 : f32
    %1506 = vector.broadcast %cst_343 : f32 to vector<16x128xf32>
    %1507 = arith.subf %1506, %1505 : vector<16x128xf32>
    %1508 = arith.mulf %1504, %1507 : vector<16x128xf32>
    %1509 = arith.mulf %11, %1508 : vector<16x128xf32>
    %1510 = arith.mulf %1, %1496 : vector<16x128xf32>
    %cst_344 = arith.constant 0.000000e+00 : f32
    %1511 = vector.broadcast %cst_344 : f32 to vector<16x128xf32>
    %1512 = arith.addf %1511, %1510 : vector<16x128xf32>
    %1513 = arith.mulf %3, %1509 : vector<16x128xf32>
    %1514 = arith.addf %1512, %1513 : vector<16x128xf32>
    %cst_345 = arith.constant 1.000000e+00 : f32
    %1515 = vector.broadcast %cst_345 : f32 to vector<16x128xf32>
    %1516 = arith.addf %1515, %1514 : vector<16x128xf32>
    %1517 = tpu.reciprocal %1516 {approx = true} : vector<16x128xf32> -> vector<16x128xf32>
    %1518 = arith.mulf %1516, %1517 : vector<16x128xf32>
    %cst_346 = arith.constant 2.000000e+00 : f32
    %1519 = vector.broadcast %cst_346 : f32 to vector<16x128xf32>
    %1520 = arith.subf %1519, %1518 : vector<16x128xf32>
    %1521 = arith.mulf %1517, %1520 : vector<16x128xf32>
    %1522 = arith.mulf %28, %1521 : vector<16x128xf32>
    %1523 = arith.mulf %5, %1496 : vector<16x128xf32>
    %cst_347 = arith.constant 0.000000e+00 : f32
    %1524 = vector.broadcast %cst_347 : f32 to vector<16x128xf32>
    %1525 = arith.addf %1524, %1523 : vector<16x128xf32>
    %1526 = arith.mulf %7, %1509 : vector<16x128xf32>
    %1527 = arith.addf %1525, %1526 : vector<16x128xf32>
    %cst_348 = arith.constant 1.000000e+00 : f32
    %1528 = vector.broadcast %cst_348 : f32 to vector<16x128xf32>
    %1529 = arith.addf %1528, %1527 : vector<16x128xf32>
    %1530 = tpu.reciprocal %1529 {approx = true} : vector<16x128xf32> -> vector<16x128xf32>
    %1531 = arith.mulf %1529, %1530 : vector<16x128xf32>
    %cst_349 = arith.constant 2.000000e+00 : f32
    %1532 = vector.broadcast %cst_349 : f32 to vector<16x128xf32>
    %1533 = arith.subf %1532, %1531 : vector<16x128xf32>
    %1534 = arith.mulf %1530, %1533 : vector<16x128xf32>
    %1535 = arith.mulf %31, %1534 : vector<16x128xf32>
    %1536 = arith.mulf %1, %1522 : vector<16x128xf32>
    %cst_350 = arith.constant 0.000000e+00 : f32
    %1537 = vector.broadcast %cst_350 : f32 to vector<16x128xf32>
    %1538 = arith.addf %1537, %1536 : vector<16x128xf32>
    %1539 = arith.mulf %5, %1535 : vector<16x128xf32>
    %1540 = arith.addf %1538, %1539 : vector<16x128xf32>
    %cst_351 = arith.constant 1.000000e+00 : f32
    %1541 = vector.broadcast %cst_351 : f32 to vector<16x128xf32>
    %1542 = arith.addf %1541, %1540 : vector<16x128xf32>
    %1543 = tpu.reciprocal %1542 {approx = true} : vector<16x128xf32> -> vector<16x128xf32>
    %1544 = arith.mulf %1542, %1543 : vector<16x128xf32>
    %cst_352 = arith.constant 2.000000e+00 : f32
    %1545 = vector.broadcast %cst_352 : f32 to vector<16x128xf32>
    %1546 = arith.subf %1545, %1544 : vector<16x128xf32>
    %1547 = arith.mulf %1543, %1546 : vector<16x128xf32>
    %1548 = arith.mulf %9, %1547 : vector<16x128xf32>
    %1549 = arith.mulf %3, %1522 : vector<16x128xf32>
    %cst_353 = arith.constant 0.000000e+00 : f32
    %1550 = vector.broadcast %cst_353 : f32 to vector<16x128xf32>
    %1551 = arith.addf %1550, %1549 : vector<16x128xf32>
    %1552 = arith.mulf %7, %1535 : vector<16x128xf32>
    %1553 = arith.addf %1551, %1552 : vector<16x128xf32>
    %cst_354 = arith.constant 1.000000e+00 : f32
    %1554 = vector.broadcast %cst_354 : f32 to vector<16x128xf32>
    %1555 = arith.addf %1554, %1553 : vector<16x128xf32>
    %1556 = tpu.reciprocal %1555 {approx = true} : vector<16x128xf32> -> vector<16x128xf32>
    %1557 = arith.mulf %1555, %1556 : vector<16x128xf32>
    %cst_355 = arith.constant 2.000000e+00 : f32
    %1558 = vector.broadcast %cst_355 : f32 to vector<16x128xf32>
    %1559 = arith.subf %1558, %1557 : vector<16x128xf32>
    %1560 = arith.mulf %1556, %1559 : vector<16x128xf32>
    %1561 = arith.mulf %11, %1560 : vector<16x128xf32>
    %1562 = arith.mulf %1, %1548 : vector<16x128xf32>
    %cst_356 = arith.constant 0.000000e+00 : f32
    %1563 = vector.broadcast %cst_356 : f32 to vector<16x128xf32>
    %1564 = arith.addf %1563, %1562 : vector<16x128xf32>
    %1565 = arith.mulf %3, %1561 : vector<16x128xf32>
    %1566 = arith.addf %1564, %1565 : vector<16x128xf32>
    %cst_357 = arith.constant 1.000000e+00 : f32
    %1567 = vector.broadcast %cst_357 : f32 to vector<16x128xf32>
    %1568 = arith.addf %1567, %1566 : vector<16x128xf32>
    %1569 = tpu.reciprocal %1568 {approx = true} : vector<16x128xf32> -> vector<16x128xf32>
    %1570 = arith.mulf %1568, %1569 : vector<16x128xf32>
    %cst_358 = arith.constant 2.000000e+00 : f32
    %1571 = vector.broadcast %cst_358 : f32 to vector<16x128xf32>
    %1572 = arith.subf %1571, %1570 : vector<16x128xf32>
    %1573 = arith.mulf %1569, %1572 : vector<16x128xf32>
    %1574 = arith.mulf %28, %1573 : vector<16x128xf32>
    %1575 = arith.mulf %5, %1548 : vector<16x128xf32>
    %cst_359 = arith.constant 0.000000e+00 : f32
    %1576 = vector.broadcast %cst_359 : f32 to vector<16x128xf32>
    %1577 = arith.addf %1576, %1575 : vector<16x128xf32>
    %1578 = arith.mulf %7, %1561 : vector<16x128xf32>
    %1579 = arith.addf %1577, %1578 : vector<16x128xf32>
    %cst_360 = arith.constant 1.000000e+00 : f32
    %1580 = vector.broadcast %cst_360 : f32 to vector<16x128xf32>
    %1581 = arith.addf %1580, %1579 : vector<16x128xf32>
    %1582 = tpu.reciprocal %1581 {approx = true} : vector<16x128xf32> -> vector<16x128xf32>
    %1583 = arith.mulf %1581, %1582 : vector<16x128xf32>
    %cst_361 = arith.constant 2.000000e+00 : f32
    %1584 = vector.broadcast %cst_361 : f32 to vector<16x128xf32>
    %1585 = arith.subf %1584, %1583 : vector<16x128xf32>
    %1586 = arith.mulf %1582, %1585 : vector<16x128xf32>
    %1587 = arith.mulf %31, %1586 : vector<16x128xf32>
    %1588 = arith.mulf %1, %1574 : vector<16x128xf32>
    %cst_362 = arith.constant 0.000000e+00 : f32
    %1589 = vector.broadcast %cst_362 : f32 to vector<16x128xf32>
    %1590 = arith.addf %1589, %1588 : vector<16x128xf32>
    %1591 = arith.mulf %5, %1587 : vector<16x128xf32>
    %1592 = arith.addf %1590, %1591 : vector<16x128xf32>
    %cst_363 = arith.constant 1.000000e+00 : f32
    %1593 = vector.broadcast %cst_363 : f32 to vector<16x128xf32>
    %1594 = arith.addf %1593, %1592 : vector<16x128xf32>
    %1595 = tpu.reciprocal %1594 {approx = true} : vector<16x128xf32> -> vector<16x128xf32>
    %1596 = arith.mulf %1594, %1595 : vector<16x128xf32>
    %cst_364 = arith.constant 2.000000e+00 : f32
    %1597 = vector.broadcast %cst_364 : f32 to vector<16x128xf32>
    %1598 = arith.subf %1597, %1596 : vector<16x128xf32>
    %1599 = arith.mulf %1595, %1598 : vector<16x128xf32>
    %1600 = arith.mulf %9, %1599 : vector<16x128xf32>
    %1601 = arith.mulf %3, %1574 : vector<16x128xf32>
    %cst_365 = arith.constant 0.000000e+00 : f32
    %1602 = vector.broadcast %cst_365 : f32 to vector<16x128xf32>
    %1603 = arith.addf %1602, %1601 : vector<16x128xf32>
    %1604 = arith.mulf %7, %1587 : vector<16x128xf32>
    %1605 = arith.addf %1603, %1604 : vector<16x128xf32>
    %cst_366 = arith.constant 1.000000e+00 : f32
    %1606 = vector.broadcast %cst_366 : f32 to vector<16x128xf32>
    %1607 = arith.addf %1606, %1605 : vector<16x128xf32>
    %1608 = tpu.reciprocal %1607 {approx = true} : vector<16x128xf32> -> vector<16x128xf32>
    %1609 = arith.mulf %1607, %1608 : vector<16x128xf32>
    %cst_367 = arith.constant 2.000000e+00 : f32
    %1610 = vector.broadcast %cst_367 : f32 to vector<16x128xf32>
    %1611 = arith.subf %1610, %1609 : vector<16x128xf32>
    %1612 = arith.mulf %1608, %1611 : vector<16x128xf32>
    %1613 = arith.mulf %11, %1612 : vector<16x128xf32>
    %1614 = arith.mulf %1574, %1600 : vector<16x128xf32>
    %1615 = arith.mulf %1574, %1613 : vector<16x128xf32>
    %1616 = arith.mulf %1587, %1600 : vector<16x128xf32>
    %1617 = arith.mulf %1587, %1613 : vector<16x128xf32>
    %1618 = arith.mulf %13, %1614 : vector<16x128xf32>
    %1619 = arith.addf %21, %1618 : vector<16x128xf32>
    %1620 = arith.mulf %15, %1615 : vector<16x128xf32>
    %1621 = arith.addf %1619, %1620 : vector<16x128xf32>
    %1622 = arith.mulf %17, %1616 : vector<16x128xf32>
    %1623 = arith.addf %1621, %1622 : vector<16x128xf32>
    %1624 = arith.mulf %19, %1617 : vector<16x128xf32>
    %1625 = arith.addf %1623, %1624 : vector<16x128xf32>
    %c0_368 = arith.constant 0 : index
    %1626 = arith.index_cast %25 : i32 to index
    %c0_369 = arith.constant 0 : index
    %1627 = vector.load %arg6[%c0_368, %1626, %c0_369] : memref<1x16x128xf32, #tpu.memory_space<vmem>>, vector<1x16x128xf32>
    %1628 = vector.shape_cast %1627 : vector<1x16x128xf32> to vector<16x128xf32>
    %1629 = vector.shape_cast %1625 : vector<16x128xf32> to vector<1x16x128xf32>
    tpu.vector_store %arg6[%c0_368, %1626, %c0_369], %1629 {strides = array<i32>} : memref<1x16x128xf32, #tpu.memory_space<vmem>>, vector<1x16x128xf32>,
    %c1_i32_370 = arith.constant 1 : i32
    return
  }
  func.func @transform_0(%arg0: i32) -> (i32, i32, i32) {
    %c0_i32 = arith.constant 0 : i32
    %c0_i32_0 = arith.constant 0 : i32
    %c0_i32_1 = arith.constant 0 : i32
    return %c0_i32, %arg0, %c0_i32_0 : i32, i32, i32
  }
  func.func @transform_1(%arg0: i32) -> i32 {
    %c0_i32 = arith.constant 0 : i32
    %c0_i32_0 = arith.constant 0 : i32
    return %c0_i32 : i32
  }
  func.func @transform_2(%arg0: i32) -> i32 {
    %c0_i32 = arith.constant 0 : i32
    %c0_i32_0 = arith.constant 0 : i32
    return %c0_i32 : i32
  }
  func.func @transform_3(%arg0: i32) -> i32 {
    %c0_i32 = arith.constant 0 : i32
    %c0_i32_0 = arith.constant 0 : i32
    return %c0_i32 : i32
  }
  func.func @transform_4(%arg0: i32) -> i32 {
    %c0_i32 = arith.constant 0 : i32
    %c0_i32_0 = arith.constant 0 : i32
    return %c0_i32 : i32
  }
  func.func @transform_5(%arg0: i32) -> (i32, i32, i32) {
    %c0_i32 = arith.constant 0 : i32
    %c0_i32_0 = arith.constant 0 : i32
    %c0_i32_1 = arith.constant 0 : i32
    return %c0_i32, %arg0, %c0_i32_0 : i32, i32, i32
  }
}

</mosaic_0001>

<bundles_post_ra>
// kernel: tpu_custom_call.1
= control target key start
LH: loop header
LB: loop body
LE: loop exit
PB: predicated region body
PF: predicated region fallthrough
CT: control target
= control target key end

     0   :  { %s5194_s0 = inlined_call_operand.hbm [shape: f32[2,32,128], index: 0, kind: input, shape index: {}]   ;;  %s5195_s1 = inlined_call_operand.vmem [shape: f32[4], index: 1, kind: input, shape index: {}]   ;;  %s5196_s2 = inlined_call_operand.vmem [shape: f32[2], index: 2, kind: input, shape index: {}]   ;;  %s5197_s3 = inlined_call_operand.vmem [shape: f32[4], index: 3, kind: input, shape index: {}]   ;;  %s5198_s4 = inlined_call_operand.<no memory space> [shape: f32[1], index: 4, kind: input, shape index: {}]   ;;  %s5199_s5 = inlined_call_operand.hbm [shape: f32[1,32,128], index: 5, kind: output, shape index: {}]  }
   0x1   :  { %10 = sst [smem:[#allocation2]] %s5198_s4 }
   0x2   :  { %11 = vsyncpa [#allocation4], 0 }
   0x3   :  { %13 = vsyncpa [#allocation4 + $0x1], 0 }
   0x4   :  { %14 = vsyncpa [#allocation6], 0 }
   0x5   :  { %15 = vsyncpa [#allocation9], 0 }
   0x6   :  { %16 = vsyncpa [#allocation5], 0 }
   0x7   :  { %18 = vsyncpa [#allocation5 + $0x1], 0  ;;  %s3903_s20 = smov 0   ;;  %s3905_s21 = smov 0  }
   0x8   :  { %s3907_s22 = smov 0   ;;  %s3909_s23 = smov 0  }
   0x9 LB: > { %s3924_s4 = sadd.s32 4294967295, %s3856_s23   ;;  %s2939_s24 = sadd.s32 4294967294, %s3856_s23   ;;  %s3856_s23 = sphi %s3909_s23, %s5223_s23   ;;  %s3852_s22 = sphi %s3907_s22, %s5222_s22   ;;  %s3848_s21 = sphi %s3905_s21, %s5221_s21   ;;  %s3844_s20 = sphi %s3903_s20, %s5220_s20  }
   0xa   : > { %s3928_s25 = sadd.s32 1, %s3856_s23   ;;  %s31_s26 = sadd.s32 1, %s3852_s22 }
   0xb   : > { %s28_s27 = ssub.s32 %s3856_s23, %s3928_s25  ;;  %p38_p0 = scmp.ne.s32.totalorder %s3852_s22, %s3848_s21 }
   0xc   : > { %p29_p1 = scmp.eq.s32.totalorder %s28_s27, 0  ;;  %p39_p2 = scmp.eq.s32.totalorder %s3856_s23, 0 }
   0xd   : > { %p44_p3 = scmp.ne.s32.totalorder %s3848_s21, %s3844_s20  ;;  %p5200_p4 = scmp.eq.s32.totalorder %s3924_s4, 0 }
   0xe   : > { %s3940_s28 = scalar_select %p29_p1, %s3852_s22, %s31_s26  }
   0xf   : > { %p3942_p5 = por %p39_p2, %p38_p0  ;;  %p3948_p6 = por %p5200_p4, %p44_p3 }
  0x10   : > { %p152_p7 = scmp.eq.s32.totalorder %s3924_s4, 1  ;;  %p158_p8 = scmp.eq.s32.totalorder %s2939_s24, 1 }
  0x11   : > { %s5205_s29 = scalar_select %p3942_p5, 1, 0 }
  0x12   : > { %s5206_s30 = scalar_select %p3948_p6, 1, 0 }
  0x13   : > { %p2940_p9 = scmp.ge.s32.totalorder %s3856_s23, 1  ;;  %p165_p10 = scmp.lt.s32.totalorder %s3856_s23, 3 }
  0x14   : > { %p3955_p11 = por %p152_p7, %p38_p0  ;;  %p3959_p12 = por %p158_p8, %p44_p3 }
  0x15   : > { %p3963_p13 = pnand %p2940_p9, %p165_p10  ;;  %s189_s11 = sshll.u32 %s5196_s2, 4  ;;  %s190_s11 = int_to_ptr.vmem [resolvable:$true] %s189_s11 }
  0x16   : > { %s5207_s6 = scalar_select %p3955_p11, 1, 0 }
  0x17   : > { %s5208_s7 = scalar_select %p3959_p12, 1, 0 }
  0x18   : > { %s5209_s8 = scalar_select %p3963_p13, 1, 0 }
  0x19   : > { %p2995_p1 = pneg %p3963_p13  ;;  %s178_s14 = sshll.u32 %s5195_s1, 4  ;;  %s179_s14 = int_to_ptr.vmem [resolvable:$true] %s178_s14 }
  0x1a   : > { %s200_s18 = sshll.u32 %s5197_s3, 4  ;;  %s3739_s19 = scalar_lea.vmem %s190_s11, 16  ;;  %s3984_s18 = int_to_ptr.vmem [resolvable:$true] %s200_s18 }
  0x1b   : > { %p3977_p0 = pnand %p2995_p1, %p5200_p4  ;;  %p3740_p2 = scmp.ne.s32.totalorder %s190_s11, %s3739_s19 }
  0x1c   : > { %p3747_p9 = scmp.lt.s32.totalorder %s190_s11, %s190_s11  ;;  %p3748_p10 = scmp.lt.s32.totalorder %s3739_s19, %s3739_s19 }
  0x1d   : > { %p3741_p3 = pneg %p3977_p0 }
  0x1e   : > { %p3749_p1 = por %p3748_p10, %p3747_p9 }
  0x1f   : > { %p3742_p7 = pnand %p3741_p3, %p3740_p2 }
  0x21   : > { %p3743_p8 = pneg %p3742_p7 }
  0x23   : > { %p3750_p4 = pnand %p3749_p1, %p3743_p8 }
  0x25   : > { %3753 = shalt.err (!%p3750_p4)
}
  0x26   : > { %s3858_s24 = smov [#allocation8]   ;;  %s3754_s26 = scalar_lea.vmem %s179_s14, 16 }
  0x27   : > { %3001 = dma.vmem_to_smem (!%p3977_p0), %s190_s11, 16, %s3858_s24, [#allocation9]  }
  0x28   : > { %p3755_p12 = scmp.ne.s32.totalorder %s179_s14, %s3754_s26  ;;  %p3762_p13 = scmp.lt.s32.totalorder %s179_s14, %s179_s14 }
  0x29   : > { %p3763_p5 = scmp.lt.s32.totalorder %s3754_s26, %s3754_s26 }
  0x2a   : > { %p3757_p11 = pnand %p3755_p12, %p3741_p3 }
  0x2b   : > { %p3764_p2 = por %p3763_p5, %p3762_p13 }
  0x2c   : > { %p3758_p6 = pneg %p3757_p11 }
  0x2e   : > { %p3765_p7 = pnand %p3764_p2, %p3758_p6 }
  0x30   : > { %3768 = shalt.err (!%p3765_p7)
}
  0x31   : > { %s3859_s27 = smov [#allocation7]   ;;  %s3769_s9 = scalar_lea.vmem %s3984_s18, 16 }
  0x32   : > { %2998 = dma.vmem_to_smem (!%p3977_p0), %s179_s14, 16, %s3859_s27, [#allocation6]  }
  0x33   : > { %p3770_p4 = scmp.ne.s32.totalorder %s3984_s18, %s3769_s9  ;;  %p3777_p11 = scmp.lt.s32.totalorder %s3984_s18, %s3984_s18 }
  0x34   : > { %p3778_p9 = scmp.lt.s32.totalorder %s3769_s9, %s3769_s9 }
  0x35   : > { %p3772_p8 = pnand %p3770_p4, %p3741_p3 }
  0x36   : > { %p3779_p5 = por %p3778_p9, %p3777_p11 }
  0x37   : > { %p3773_p12 = pneg %p3772_p8 }
  0x39   : > { %p3780_p6 = pnand %p3779_p5, %p3773_p12 }
  0x3b   : > { %3783 = shalt.err (!%p3780_p6)
}
  0x3c   : > { %s3860_s10 = smov [#allocation10]   ;;  %p2944_p13 = scmp.ge.s32.totalorder %s3856_s23, 2 }
  0x3d   : > { %3004 = dma.vmem_to_smem (!%p3977_p0), %s3984_s18, 16, %s3860_s10, [#allocation9]  }
  0x3e   : > { %210 = sbr.rel (%p2944_p13) target bundleno = 82 (0x52), region = 32 }
  0x43   : > { %s214_s11 = sand.u32 1, %s3852_s22   ;;  %s2970_s12 = sshll.u32 %s3856_s23, 8 }
  0x44   : > { %s2945_s13 = sshll.u32 %s214_s11, 5  ;;  %s224_s16 = scalar_lea.hbm %s5194_s0, %s2970_s12 }
  0x45   : > { %p5211_p0 = scmp.ne.s32.totalorder %s5205_s29, 0  ;;  %s218_s18 = scalar_lea.vmem [#allocation3], %s2945_s13 }
  0x46   : > { %s237_s19 = sshll.u32 %s218_s18, 4  ;;  %s3861_s26 = smov 512   ;;  %s238_s19 = int_to_ptr.vmem [resolvable:$true] %s237_s19 }
  0x47   : > { %s2978_s17 = scalar_select %p5211_p0, [#allocation0], [#allocation14] }
  0x48   : > { %2979 = sst [smem:[#allocation13]] (%p5211_p0), %s3861_s26  ;;  %s3862_s27 = smov 256  }
  0x49   : > { %s229_s24 = sld [smem:[%s2978_s17]]   ;;  %s3863_s9 = smov 2  }
  0x4a   : > { %2980 = sst [smem:[#allocation13 + $0x1]] (%p5211_p0), %s3862_s27  ;;  %s3864_s10 = smov 128  }
  0x4b   : > { %2981 = sst [smem:[#allocation13 + $0x2]] (%p5211_p0), %s3863_s9  ;;  %s3865_s13 = smov 8  }
  0x4c   : > { %2982 = sst [smem:[#allocation13 + $0x3]] (%p5211_p0), %s3864_s10  ;;  %s215_s15 = scalar_lea.sflag [#allocation4], %s214_s11 }
  0x4d   : > { %2983 = sst [smem:[#allocation13 + $0x4]] (%p5211_p0), %s3864_s10  ;;  %s3866_s17 = smov 131072  }
  0x4e   : > { %2984 = sst [smem:[#allocation13 + $0x5]] (%p5211_p0), %s3865_s13 }
  0x4f   : > { %s2948_s12 = sshll.u32 %s229_s24, 26 }
  0x50   : > { %s2949_s14 = sadd.s32 134217728, %s2948_s12 }
  0x51   : > { %2985 = dma.general (%p5211_p0), %s224_s16, 512, %s238_s19, %s215_s15, %s3866_s17, [#allocation13], %s2949_s14, 0  }
  0x52 PF: > { %p5212_p3 = scmp.ne.s32.totalorder %s5209_s8, 0 }
  0x53   : > { %s4035_s18 = sand.u32 (!%p5212_p3), 1, %s3848_s21   ;;  %p5213_p10 = scmp.ne.s32.totalorder (!%p5212_p3), %s5206_s30, 0 }
  0x54   : > { %262 = sbr.rel (%p5212_p3) target bundleno = 2191 (0x88f), region = 40  ;;  %s2951_s26 = sshll.u32 (!%p5212_p3), %s4035_s18, 5 }
  0x55   : > { %s265_s24 = scalar_lea.sflag (!%p5212_p3), [#allocation4], %s4035_s18  ;;  %s4039_s27 = scalar_lea.vmem (!%p5212_p3), [#allocation3], %s2951_s26 }
  0x59   : > { %3827 = dma.done.wait (%p5213_p10), %s265_s24, 512  }
  0x5a   : > { %3829 = vsyncadd (%p5213_p10), %s265_s24, 4294966784  ;;  %p5214_p1 = scmp.eq.s32.totalorder %s3924_s4, 0 }
  0x5c   : > { %3831 = dma.done.wait (%p5214_p1), [#allocation6], 16   ;;  %p5215_p2 = pmov %p5214_p1 }
  0x5d   : > { %p5216_p7 = pmov %p5214_p1 }
  0x5e   : > { %3833 = vsyncadd (%p5215_p2), [#allocation6], 4294967280 }
  0x5f   : > { %3835 = dma.done.wait (%p5216_p7), [#allocation9], 32   ;;  %p5217_p4 = pmov %p5214_p1 }
  0x61   : > { %3837 = vsyncadd (%p5217_p4), [#allocation9], 4294967264 }
  0x62   : > { %285 = sfence }
  0x63   : > { %s310_s29 = sld [smem:[#allocation7]]  ;;  %v4054_v0 = vld [vmem:[%s4039_s27] sm:$0xff]  ;;  %v4057_v1 = vld [vmem:[%s4039_s27 + $0x8] sm:$0xff]  ;;  %v4062_v3 = vld [vmem:[%s4039_s27 + $0x10] sm:$0xff]  ;;  %s2955_s15 = sshll.u32 %s4035_s18, 4 }
  0x64   : > { %s2956_s30 = sld [smem:[#allocation7 + $0x1]]  ;;  %v4065_v4 = vld [vmem:[%s4039_s27 + $0x18] sm:$0xff]  ;;  %s2971_s17 = sshll.u32 %s3924_s4, 8 }
  0x65   : > { %s2957_s8 = sld [smem:[#allocation7 + $0x2]]  ;;  %s307_s26 = scalar_lea.vmem [#allocation11], %s2955_s15 }
  0x66   : > { %s2958_s11 = sld [smem:[#allocation7 + $0x3]]  ;;  %s2834_s24 = sshll.u32 %s307_s26, 4  ;;  %s5151_s24 = int_to_ptr.vmem [resolvable:$true] %s2834_s24 }
  0x67   : > { %s318_s16 = sld [smem:[#allocation8]]  ;;  %s3784_s4 = scalar_lea.vmem %s5151_s24, 256 }
  0x68   : > { %s2959_s19 = sld [smem:[#allocation8 + $0x1]]  ;;  %p3785_p8 = scmp.ne.s32.totalorder %s5151_s24, %s3784_s4 }
  0x69   : > { %v4059_v2 = vstv %s310_s29  ;;  %s5125_s9 = sld [smem:[#allocation10]]  ;;  %p5218_p12 = scmp.ne.s32.totalorder %s5207_s6, 0 }
  0x6a   : > { %v4067_v5 = vstv %s2956_s30  ;;  %v338_v6 = vmul.f32 %v4054_v0, %v4059_v2  ;;  %v339_v7 = vmul.f32 %v4057_v1, %v4059_v2  ;;  %s5127_s10 = sld [smem:[#allocation10 + $0x1]]  ;;  %s5149_s30 = scalar_lea.hbm %s5199_s5, %s2971_s17 }
  0x6b   : > { %v4073_v8 = vstv %s2957_s8  ;;  %v352_v9 = vmul.f32 %v4054_v0, %v4067_v5  ;;  %v353_v10 = vmul.f32 %v4057_v1, %v4067_v5  ;;  %s5129_s12 = sld [smem:[#allocation10 + $0x2]]  ;;  %s2821_s8 = scalar_lea.sflag [#allocation5], %s4035_s18 }
  0x6c   : > { %v4079_v11 = vstv %s2958_s11  ;;  %v342_v12 = vmul.f32 %v4062_v3, %v4073_v8  ;;  %v343_v13 = vmul.f32 %v4065_v4, %v4073_v8  ;;  %s5131_s13 = sld [smem:[#allocation2]]  ;;  %p3786_p11 = pnand %p3785_p8, %p5218_p12 }
  0x6d   : > { %v356_v14 = vmul.f32 %v4062_v3, %v4079_v11  ;;  %v357_v15 = vmul.f32 %v4065_v4, %v4079_v11  ;;  %v4089_v24 = vstv %s318_s16  ;;  %s5133_s14 = sld [smem:[#allocation10 + $0x3]]  ;;  %s3867_s11 = smov [#allocation11]  }
  0x6e   : > { %v344_v16 = vadd.f32 %v342_v12, %v338_v6  ;;  %v345_v17 = vadd.f32 %v343_v13, %v339_v7  ;;  %v4091_v26 = vstv %s2959_s19  ;;  %p3787_p9 = pneg %p3786_p11  ;;  %s3788_s16 = sshll.u32 %s3867_s11, 4  ;;  %s3789_s16 = int_to_ptr.vmem [resolvable:$false] %s3788_s16 }
  0x6f   : > { %v358_v18 = vadd.f32 %v356_v14, %v352_v9  ;;  %v359_v19 = vadd.f32 %v357_v15, %v353_v10  ;;  %s3790_s19 = scalar_lea.vmem %s3789_s16, 512  ;;  %p3791_p5 = scmp.lt.s32.totalorder %s5151_s24, %s3789_s16 }
  0x70   : > { %v346_v20 = vadd.f32 1.0, %v344_v16  ;;  %v347_v21 = vadd.f32 1.0, %v345_v17  ;;  %p3792_p6 = scmp.lt.s32.totalorder %s3790_s19, %s3784_s4 }
  0x71   : > { %v360_v22 = vadd.f32 1.0, %v358_v18  ;;  %v361_v23 = vadd.f32 1.0, %v359_v19 }
  0x72   : > { %3059 = vrcp.f32 %v346_v20  ;;  %p3793_p0 = por %p3792_p6, %p3791_p5 }
  0x73   : > { %3061 = vrcp.f32 %v347_v21 }
  0x74   : > { %3063 = vrcp.f32 %v360_v22  ;;  %p3794_p3 = pnand %p3793_p0, %p3787_p9 }
  0x75   : > { %3065 = vrcp.f32 %v361_v23 }
  0x7f   : > { %v3060_v25 = vpop.eup %3059 }
  0x80   : > { %v3062_v27 = vpop.eup %3061  ;;  %v350_v28 = vmul.f32 %v3060_v25, %v4089_v24 }
  0x81   : > { %v3064_v29 = vpop.eup %3063  ;;  %v351_v30 = vmul.f32 %v3062_v27, %v4089_v24 }
  0x82   : > { %v3066_v31 = vpop.eup %3065  ;;  %v364_v32 = vmul.f32 %v3064_v29, %v4091_v26  ;;  %v366_v33 = vmul.f32 %v350_v28, %v4059_v2  ;;  %v380_v34 = vmul.f32 %v350_v28, %v4073_v8 }
  0x83   : > { %v365_v35 = vmul.f32 %v3066_v31, %v4091_v26  ;;  %v367_v36 = vmul.f32 %v351_v30, %v4059_v2  ;;  %v381_v37 = vmul.f32 %v351_v30, %v4073_v8 }
  0x84   : > { %v370_v38 = vmul.f32 %v364_v32, %v4067_v5  ;;  %v384_v39 = vmul.f32 %v364_v32, %v4079_v11 }
  0x85   : > { %v371_v40 = vmul.f32 %v365_v35, %v4067_v5  ;;  %v385_v41 = vmul.f32 %v365_v35, %v4079_v11 }
  0x86   : > { %v372_v42 = vadd.f32 %v370_v38, %v366_v33  ;;  %v386_v43 = vadd.f32 %v384_v39, %v380_v34 }
  0x87   : > { %v373_v44 = vadd.f32 %v371_v40, %v367_v36  ;;  %v387_v45 = vadd.f32 %v385_v41, %v381_v37 }
  0x88   : > { %v374_v46 = vadd.f32 1.0, %v372_v42  ;;  %v388_v47 = vadd.f32 1.0, %v386_v43 }
  0x89   : > { %v375_v48 = vadd.f32 1.0, %v373_v44  ;;  %v389_v49 = vadd.f32 1.0, %v387_v45 }
  0x8a   : > { %3067 = vrcp.f32 %v374_v46 }
  0x8b   : > { %3069 = vrcp.f32 %v375_v48 }
  0x8c   : > { %3071 = vrcp.f32 %v388_v47 }
  0x8d   : > { %3073 = vrcp.f32 %v389_v49 }
  0x97   : > { %v3068_v50 = vpop.eup %3067 }
  0x98   : > { %v3070_v51 = vpop.eup %3069  ;;  %v378_v52 = vmul.f32 %v3068_v50, %v4054_v0 }
  0x99   : > { %v3072_v53 = vpop.eup %3071  ;;  %v379_v54 = vmul.f32 %v3070_v51, %v4057_v1 }
  0x9a   : > { %v3074_v55 = vpop.eup %3073  ;;  %v392_v56 = vmul.f32 %v3072_v53, %v4062_v3  ;;  %v394_v57 = vmul.f32 %v378_v52, %v4059_v2  ;;  %v408_v58 = vmul.f32 %v378_v52, %v4067_v5 }
  0x9b   : > { %v393_v59 = vmul.f32 %v3074_v55, %v4065_v4  ;;  %v395_v60 = vmul.f32 %v379_v54, %v4059_v2  ;;  %v409_v61 = vmul.f32 %v379_v54, %v4067_v5 }
  0x9c   : > { %v398_v62 = vmul.f32 %v392_v56, %v4073_v8  ;;  %v412_v63 = vmul.f32 %v392_v56, %v4079_v11 }
  0x9d   : > { %v399_v6 = vmul.f32 %v393_v59, %v4073_v8  ;;  %v413_v7 = vmul.f32 %v393_v59, %v4079_v11 }
  0x9e   : > { %v400_v9 = vadd.f32 %v398_v62, %v394_v57  ;;  %v414_v10 = vadd.f32 %v412_v63, %v408_v58 }
  0x9f   : > { %v401_v12 = vadd.f32 %v399_v6, %v395_v60  ;;  %v415_v13 = vadd.f32 %v413_v7, %v409_v61 }
  0xa0   : > { %v402_v14 = vadd.f32 1.0, %v400_v9  ;;  %v416_v15 = vadd.f32 1.0, %v414_v10 }
  0xa1   : > { %v403_v16 = vadd.f32 1.0, %v401_v12  ;;  %v417_v17 = vadd.f32 1.0, %v415_v13 }
  0xa2   : > { %3075 = vrcp.f32 %v402_v14 }
  0xa3   : > { %3077 = vrcp.f32 %v403_v16 }
  0xa4   : > { %3079 = vrcp.f32 %v416_v15 }
  0xa5   : > { %3081 = vrcp.f32 %v417_v17 }
  0xaf   : > { %v3076_v18 = vpop.eup %3075 }
  0xb0   : > { %v3078_v19 = vpop.eup %3077  ;;  %v406_v20 = vmul.f32 %v3076_v18, %v4089_v24 }
  0xb1   : > { %v3080_v21 = vpop.eup %3079  ;;  %v407_v22 = vmul.f32 %v3078_v19, %v4089_v24 }
  0xb2   : > { %v3082_v23 = vpop.eup %3081  ;;  %v420_v25 = vmul.f32 %v3080_v21, %v4091_v26  ;;  %v422_v27 = vmul.f32 %v406_v20, %v4059_v2  ;;  %v436_v28 = vmul.f32 %v406_v20, %v4073_v8 }
  0xb3   : > { %v421_v29 = vmul.f32 %v3082_v23, %v4091_v26  ;;  %v423_v30 = vmul.f32 %v407_v22, %v4059_v2  ;;  %v437_v31 = vmul.f32 %v407_v22, %v4073_v8 }
  0xb4   : > { %v426_v32 = vmul.f32 %v420_v25, %v4067_v5  ;;  %v440_v33 = vmul.f32 %v420_v25, %v4079_v11 }
  0xb5   : > { %v427_v34 = vmul.f32 %v421_v29, %v4067_v5  ;;  %v441_v35 = vmul.f32 %v421_v29, %v4079_v11 }
  0xb6   : > { %v428_v36 = vadd.f32 %v426_v32, %v422_v27  ;;  %v442_v37 = vadd.f32 %v440_v33, %v436_v28 }
  0xb7   : > { %v429_v38 = vadd.f32 %v427_v34, %v423_v30  ;;  %v443_v39 = vadd.f32 %v441_v35, %v437_v31 }
  0xb8   : > { %v430_v40 = vadd.f32 1.0, %v428_v36  ;;  %v444_v41 = vadd.f32 1.0, %v442_v37 }
  0xb9   : > { %v431_v42 = vadd.f32 1.0, %v429_v38  ;;  %v445_v43 = vadd.f32 1.0, %v443_v39 }
  0xba   : > { %3083 = vrcp.f32 %v430_v40 }
  0xbb   : > { %3085 = vrcp.f32 %v431_v42 }
  0xbc   : > { %3087 = vrcp.f32 %v444_v41 }
  0xbd   : > { %3089 = vrcp.f32 %v445_v43 }
  0xc7   : > { %v3084_v44 = vpop.eup %3083 }
  0xc8   : > { %v3086_v45 = vpop.eup %3085  ;;  %v434_v46 = vmul.f32 %v3084_v44, %v4054_v0 }
  0xc9   : > { %v3088_v47 = vpop.eup %3087  ;;  %v435_v48 = vmul.f32 %v3086_v45, %v4057_v1 }
  0xca   : > { %v3090_v49 = vpop.eup %3089  ;;  %v448_v50 = vmul.f32 %v3088_v47, %v4062_v3  ;;  %v450_v51 = vmul.f32 %v434_v46, %v4059_v2  ;;  %v464_v52 = vmul.f32 %v434_v46, %v4067_v5 }
  0xcb   : > { %v449_v53 = vmul.f32 %v3090_v49, %v4065_v4  ;;  %v451_v54 = vmul.f32 %v435_v48, %v4059_v2  ;;  %v465_v55 = vmul.f32 %v435_v48, %v4067_v5 }
  0xcc   : > { %v454_v56 = vmul.f32 %v448_v50, %v4073_v8  ;;  %v468_v57 = vmul.f32 %v448_v50, %v4079_v11 }
  0xcd   : > { %v455_v58 = vmul.f32 %v449_v53, %v4073_v8  ;;  %v469_v59 = vmul.f32 %v449_v53, %v4079_v11 }
  0xce   : > { %v456_v60 = vadd.f32 %v454_v56, %v450_v51  ;;  %v470_v61 = vadd.f32 %v468_v57, %v464_v52 }
  0xcf   : > { %v457_v62 = vadd.f32 %v455_v58, %v451_v54  ;;  %v471_v63 = vadd.f32 %v469_v59, %v465_v55 }
  0xd0   : > { %v458_v6 = vadd.f32 1.0, %v456_v60  ;;  %v472_v7 = vadd.f32 1.0, %v470_v61 }
  0xd1   : > { %v459_v9 = vadd.f32 1.0, %v457_v62  ;;  %v473_v10 = vadd.f32 1.0, %v471_v63 }
  0xd2   : > { %3091 = vrcp.f32 %v458_v6 }
  0xd3   : > { %3093 = vrcp.f32 %v459_v9 }
  0xd4   : > { %3095 = vrcp.f32 %v472_v7 }
  0xd5   : > { %3097 = vrcp.f32 %v473_v10 }
  0xdf   : > { %v3092_v12 = vpop.eup %3091 }
  0xe0   : > { %v3094_v13 = vpop.eup %3093  ;;  %v462_v14 = vmul.f32 %v3092_v12, %v4089_v24 }
  0xe1   : > { %v3096_v15 = vpop.eup %3095  ;;  %v463_v16 = vmul.f32 %v3094_v13, %v4089_v24 }
  0xe2   : > { %v3098_v17 = vpop.eup %3097  ;;  %v476_v18 = vmul.f32 %v3096_v15, %v4091_v26  ;;  %v478_v19 = vmul.f32 %v462_v14, %v4059_v2  ;;  %v492_v20 = vmul.f32 %v462_v14, %v4073_v8 }
  0xe3   : > { %v477_v21 = vmul.f32 %v3098_v17, %v4091_v26  ;;  %v479_v22 = vmul.f32 %v463_v16, %v4059_v2  ;;  %v493_v23 = vmul.f32 %v463_v16, %v4073_v8 }
  0xe4   : > { %v482_v25 = vmul.f32 %v476_v18, %v4067_v5  ;;  %v496_v27 = vmul.f32 %v476_v18, %v4079_v11 }
  0xe5   : > { %v483_v28 = vmul.f32 %v477_v21, %v4067_v5  ;;  %v497_v29 = vmul.f32 %v477_v21, %v4079_v11 }
  0xe6   : > { %v484_v30 = vadd.f32 %v482_v25, %v478_v19  ;;  %v498_v31 = vadd.f32 %v496_v27, %v492_v20 }
  0xe7   : > { %v485_v32 = vadd.f32 %v483_v28, %v479_v22  ;;  %v499_v33 = vadd.f32 %v497_v29, %v493_v23 }
  0xe8   : > { %v486_v34 = vadd.f32 1.0, %v484_v30  ;;  %v500_v35 = vadd.f32 1.0, %v498_v31 }
  0xe9   : > { %v487_v36 = vadd.f32 1.0, %v485_v32  ;;  %v501_v37 = vadd.f32 1.0, %v499_v33 }
  0xea   : > { %3099 = vrcp.f32 %v486_v34 }
  0xeb   : > { %3101 = vrcp.f32 %v487_v36 }
  0xec   : > { %3103 = vrcp.f32 %v500_v35 }
  0xed   : > { %3105 = vrcp.f32 %v501_v37 }
  0xf7   : > { %v3100_v38 = vpop.eup %3099 }
  0xf8   : > { %v3102_v39 = vpop.eup %3101  ;;  %v490_v40 = vmul.f32 %v3100_v38, %v4054_v0 }
  0xf9   : > { %v3104_v41 = vpop.eup %3103  ;;  %v491_v42 = vmul.f32 %v3102_v39, %v4057_v1 }
  0xfa   : > { %v3106_v43 = vpop.eup %3105  ;;  %v504_v44 = vmul.f32 %v3104_v41, %v4062_v3  ;;  %v506_v45 = vmul.f32 %v490_v40, %v4059_v2  ;;  %v520_v46 = vmul.f32 %v490_v40, %v4067_v5 }
  0xfb   : > { %v505_v47 = vmul.f32 %v3106_v43, %v4065_v4  ;;  %v507_v48 = vmul.f32 %v491_v42, %v4059_v2  ;;  %v521_v49 = vmul.f32 %v491_v42, %v4067_v5 }
  0xfc   : > { %v510_v50 = vmul.f32 %v504_v44, %v4073_v8  ;;  %v524_v51 = vmul.f32 %v504_v44, %v4079_v11 }
  0xfd   : > { %v511_v52 = vmul.f32 %v505_v47, %v4073_v8  ;;  %v525_v53 = vmul.f32 %v505_v47, %v4079_v11 }
  0xfe   : > { %v512_v54 = vadd.f32 %v510_v50, %v506_v45  ;;  %v526_v55 = vadd.f32 %v524_v51, %v520_v46 }
  0xff   : > { %v513_v56 = vadd.f32 %v511_v52, %v507_v48  ;;  %v527_v57 = vadd.f32 %v525_v53, %v521_v49 }
 0x100   : > { %v514_v58 = vadd.f32 1.0, %v512_v54  ;;  %v528_v59 = vadd.f32 1.0, %v526_v55 }
 0x101   : > { %v515_v60 = vadd.f32 1.0, %v513_v56  ;;  %v529_v61 = vadd.f32 1.0, %v527_v57 }
 0x102   : > { %3107 = vrcp.f32 %v514_v58 }
 0x103   : > { %3109 = vrcp.f32 %v515_v60 }
 0x104   : > { %3111 = vrcp.f32 %v528_v59 }
 0x105   : > { %3113 = vrcp.f32 %v529_v61 }
 0x10f   : > { %v3108_v62 = vpop.eup %3107 }
 0x110   : > { %v3110_v63 = vpop.eup %3109  ;;  %v518_v6 = vmul.f32 %v3108_v62, %v4089_v24 }
 0x111   : > { %v3112_v7 = vpop.eup %3111  ;;  %v519_v9 = vmul.f32 %v3110_v63, %v4089_v24 }
 0x112   : > { %v3114_v10 = vpop.eup %3113  ;;  %v532_v12 = vmul.f32 %v3112_v7, %v4091_v26  ;;  %v534_v13 = vmul.f32 %v518_v6, %v4059_v2  ;;  %v548_v14 = vmul.f32 %v518_v6, %v4073_v8 }
 0x113   : > { %v533_v15 = vmul.f32 %v3114_v10, %v4091_v26  ;;  %v535_v16 = vmul.f32 %v519_v9, %v4059_v2  ;;  %v549_v17 = vmul.f32 %v519_v9, %v4073_v8 }
 0x114   : > { %v538_v18 = vmul.f32 %v532_v12, %v4067_v5  ;;  %v552_v19 = vmul.f32 %v532_v12, %v4079_v11 }
 0x115   : > { %v539_v20 = vmul.f32 %v533_v15, %v4067_v5  ;;  %v553_v21 = vmul.f32 %v533_v15, %v4079_v11 }
 0x116   : > { %v540_v22 = vadd.f32 %v538_v18, %v534_v13  ;;  %v554_v23 = vadd.f32 %v552_v19, %v548_v14 }
 0x117   : > { %v541_v25 = vadd.f32 %v539_v20, %v535_v16  ;;  %v555_v27 = vadd.f32 %v553_v21, %v549_v17 }
 0x118   : > { %v542_v28 = vadd.f32 1.0, %v540_v22  ;;  %v556_v29 = vadd.f32 1.0, %v554_v23 }
 0x119   : > { %v543_v30 = vadd.f32 1.0, %v541_v25  ;;  %v557_v31 = vadd.f32 1.0, %v555_v27 }
 0x11a   : > { %3115 = vrcp.f32 %v542_v28 }
 0x11b   : > { %3117 = vrcp.f32 %v543_v30 }
 0x11c   : > { %3119 = vrcp.f32 %v556_v29 }
 0x11d   : > { %3121 = vrcp.f32 %v557_v31 }
 0x127   : > { %v3116_v32 = vpop.eup %3115 }
 0x128   : > { %v3118_v33 = vpop.eup %3117  ;;  %v546_v34 = vmul.f32 %v3116_v32, %v4054_v0 }
 0x129   : > { %v3120_v35 = vpop.eup %3119  ;;  %v547_v36 = vmul.f32 %v3118_v33, %v4057_v1 }
 0x12a   : > { %v3122_v37 = vpop.eup %3121  ;;  %v560_v38 = vmul.f32 %v3120_v35, %v4062_v3  ;;  %v562_v39 = vmul.f32 %v546_v34, %v4059_v2  ;;  %v576_v40 = vmul.f32 %v546_v34, %v4067_v5 }
 0x12b   : > { %v561_v41 = vmul.f32 %v3122_v37, %v4065_v4  ;;  %v563_v42 = vmul.f32 %v547_v36, %v4059_v2  ;;  %v577_v43 = vmul.f32 %v547_v36, %v4067_v5 }
 0x12c   : > { %v566_v44 = vmul.f32 %v560_v38, %v4073_v8  ;;  %v580_v45 = vmul.f32 %v560_v38, %v4079_v11 }
 0x12d   : > { %v567_v46 = vmul.f32 %v561_v41, %v4073_v8  ;;  %v581_v47 = vmul.f32 %v561_v41, %v4079_v11 }
 0x12e   : > { %v568_v48 = vadd.f32 %v566_v44, %v562_v39  ;;  %v582_v49 = vadd.f32 %v580_v45, %v576_v40 }
 0x12f   : > { %v569_v50 = vadd.f32 %v567_v46, %v563_v42  ;;  %v583_v51 = vadd.f32 %v581_v47, %v577_v43 }
 0x130   : > { %v570_v52 = vadd.f32 1.0, %v568_v48  ;;  %v584_v53 = vadd.f32 1.0, %v582_v49 }
 0x131   : > { %v571_v54 = vadd.f32 1.0, %v569_v50  ;;  %v585_v55 = vadd.f32 1.0, %v583_v51 }
 0x132   : > { %3123 = vrcp.f32 %v570_v52 }
 0x133   : > { %3125 = vrcp.f32 %v571_v54 }
 0x134   : > { %3127 = vrcp.f32 %v584_v53 }
 0x135   : > { %3129 = vrcp.f32 %v585_v55 }
 0x13f   : > { %v3124_v56 = vpop.eup %3123 }
 0x140   : > { %v3126_v57 = vpop.eup %3125  ;;  %v574_v58 = vmul.f32 %v3124_v56, %v4089_v24 }
 0x141   : > { %v3128_v59 = vpop.eup %3127  ;;  %v575_v60 = vmul.f32 %v3126_v57, %v4089_v24 }
 0x142   : > { %v3130_v61 = vpop.eup %3129  ;;  %v588_v62 = vmul.f32 %v3128_v59, %v4091_v26  ;;  %v590_v63 = vmul.f32 %v574_v58, %v4059_v2  ;;  %v604_v6 = vmul.f32 %v574_v58, %v4073_v8 }
 0x143   : > { %v589_v7 = vmul.f32 %v3130_v61, %v4091_v26  ;;  %v591_v9 = vmul.f32 %v575_v60, %v4059_v2  ;;  %v605_v10 = vmul.f32 %v575_v60, %v4073_v8 }
 0x144   : > { %v594_v12 = vmul.f32 %v588_v62, %v4067_v5  ;;  %v608_v13 = vmul.f32 %v588_v62, %v4079_v11 }
 0x145   : > { %v595_v14 = vmul.f32 %v589_v7, %v4067_v5  ;;  %v609_v15 = vmul.f32 %v589_v7, %v4079_v11 }
 0x146   : > { %v596_v16 = vadd.f32 %v594_v12, %v590_v63  ;;  %v610_v17 = vadd.f32 %v608_v13, %v604_v6 }
 0x147   : > { %v597_v18 = vadd.f32 %v595_v14, %v591_v9  ;;  %v611_v19 = vadd.f32 %v609_v15, %v605_v10 }
 0x148   : > { %v598_v20 = vadd.f32 1.0, %v596_v16  ;;  %v612_v21 = vadd.f32 1.0, %v610_v17 }
 0x149   : > { %v599_v22 = vadd.f32 1.0, %v597_v18  ;;  %v613_v23 = vadd.f32 1.0, %v611_v19 }
 0x14a   : > { %3131 = vrcp.f32 %v598_v20 }
 0x14b   : > { %3133 = vrcp.f32 %v599_v22 }
 0x14c   : > { %3135 = vrcp.f32 %v612_v21 }
 0x14d   : > { %3137 = vrcp.f32 %v613_v23 }
 0x157   : > { %v3132_v25 = vpop.eup %3131 }
 0x158   : > { %v3134_v27 = vpop.eup %3133  ;;  %v602_v28 = vmul.f32 %v3132_v25, %v4054_v0 }
 0x159   : > { %v3136_v29 = vpop.eup %3135  ;;  %v603_v30 = vmul.f32 %v3134_v27, %v4057_v1 }
 0x15a   : > { %v3138_v31 = vpop.eup %3137  ;;  %v616_v32 = vmul.f32 %v3136_v29, %v4062_v3  ;;  %v618_v33 = vmul.f32 %v602_v28, %v4059_v2  ;;  %v632_v34 = vmul.f32 %v602_v28, %v4067_v5 }
 0x15b   : > { %v617_v35 = vmul.f32 %v3138_v31, %v4065_v4  ;;  %v619_v36 = vmul.f32 %v603_v30, %v4059_v2  ;;  %v633_v37 = vmul.f32 %v603_v30, %v4067_v5 }
 0x15c   : > { %v622_v38 = vmul.f32 %v616_v32, %v4073_v8  ;;  %v636_v39 = vmul.f32 %v616_v32, %v4079_v11 }
 0x15d   : > { %v623_v40 = vmul.f32 %v617_v35, %v4073_v8  ;;  %v637_v41 = vmul.f32 %v617_v35, %v4079_v11 }
 0x15e   : > { %v624_v42 = vadd.f32 %v622_v38, %v618_v33  ;;  %v638_v43 = vadd.f32 %v636_v39, %v632_v34 }
 0x15f   : > { %v625_v44 = vadd.f32 %v623_v40, %v619_v36  ;;  %v639_v45 = vadd.f32 %v637_v41, %v633_v37 }
 0x160   : > { %v626_v46 = vadd.f32 1.0, %v624_v42  ;;  %v640_v47 = vadd.f32 1.0, %v638_v43 }
 0x161   : > { %v627_v48 = vadd.f32 1.0, %v625_v44  ;;  %v641_v49 = vadd.f32 1.0, %v639_v45 }
 0x162   : > { %3139 = vrcp.f32 %v626_v46 }
 0x163   : > { %3141 = vrcp.f32 %v627_v48 }
 0x164   : > { %3143 = vrcp.f32 %v640_v47 }
 0x165   : > { %3145 = vrcp.f32 %v641_v49 }
 0x16f   : > { %v3140_v50 = vpop.eup %3139 }
 0x170   : > { %v3142_v51 = vpop.eup %3141  ;;  %v630_v52 = vmul.f32 %v3140_v50, %v4089_v24 }
 0x171   : > { %v3144_v53 = vpop.eup %3143  ;;  %v631_v54 = vmul.f32 %v3142_v51, %v4089_v24 }
 0x172   : > { %v3146_v55 = vpop.eup %3145  ;;  %v644_v56 = vmul.f32 %v3144_v53, %v4091_v26  ;;  %v646_v57 = vmul.f32 %v630_v52, %v4059_v2  ;;  %v660_v58 = vmul.f32 %v630_v52, %v4073_v8 }
 0x173   : > { %v645_v59 = vmul.f32 %v3146_v55, %v4091_v26  ;;  %v647_v60 = vmul.f32 %v631_v54, %v4059_v2  ;;  %v661_v61 = vmul.f32 %v631_v54, %v4073_v8 }
 0x174   : > { %v650_v62 = vmul.f32 %v644_v56, %v4067_v5  ;;  %v664_v63 = vmul.f32 %v644_v56, %v4079_v11 }
 0x175   : > { %v651_v6 = vmul.f32 %v645_v59, %v4067_v5  ;;  %v665_v7 = vmul.f32 %v645_v59, %v4079_v11 }
 0x176   : > { %v652_v9 = vadd.f32 %v650_v62, %v646_v57  ;;  %v666_v10 = vadd.f32 %v664_v63, %v660_v58 }
 0x177   : > { %v653_v12 = vadd.f32 %v651_v6, %v647_v60  ;;  %v667_v13 = vadd.f32 %v665_v7, %v661_v61 }
 0x178   : > { %v654_v14 = vadd.f32 1.0, %v652_v9  ;;  %v668_v15 = vadd.f32 1.0, %v666_v10 }
 0x179   : > { %v655_v16 = vadd.f32 1.0, %v653_v12  ;;  %v669_v17 = vadd.f32 1.0, %v667_v13 }
 0x17a   : > { %3147 = vrcp.f32 %v654_v14 }
 0x17b   : > { %3149 = vrcp.f32 %v655_v16 }
 0x17c   : > { %3151 = vrcp.f32 %v668_v15 }
 0x17d   : > { %3153 = vrcp.f32 %v669_v17 }
 0x187   : > { %v3148_v18 = vpop.eup %3147 }
 0x188   : > { %v3150_v19 = vpop.eup %3149  ;;  %v658_v20 = vmul.f32 %v3148_v18, %v4054_v0 }
 0x189   : > { %v3152_v21 = vpop.eup %3151  ;;  %v659_v22 = vmul.f32 %v3150_v19, %v4057_v1 }
 0x18a   : > { %v3154_v23 = vpop.eup %3153  ;;  %v672_v25 = vmul.f32 %v3152_v21, %v4062_v3  ;;  %v674_v27 = vmul.f32 %v658_v20, %v4059_v2  ;;  %v688_v28 = vmul.f32 %v658_v20, %v4067_v5 }
 0x18b   : > { %v673_v29 = vmul.f32 %v3154_v23, %v4065_v4  ;;  %v675_v30 = vmul.f32 %v659_v22, %v4059_v2  ;;  %v689_v31 = vmul.f32 %v659_v22, %v4067_v5 }
 0x18c   : > { %v678_v32 = vmul.f32 %v672_v25, %v4073_v8  ;;  %v692_v33 = vmul.f32 %v672_v25, %v4079_v11 }
 0x18d   : > { %v679_v34 = vmul.f32 %v673_v29, %v4073_v8  ;;  %v693_v35 = vmul.f32 %v673_v29, %v4079_v11 }
 0x18e   : > { %v680_v36 = vadd.f32 %v678_v32, %v674_v27  ;;  %v694_v37 = vadd.f32 %v692_v33, %v688_v28 }
 0x18f   : > { %v681_v38 = vadd.f32 %v679_v34, %v675_v30  ;;  %v695_v39 = vadd.f32 %v693_v35, %v689_v31 }
 0x190   : > { %v682_v40 = vadd.f32 1.0, %v680_v36  ;;  %v696_v41 = vadd.f32 1.0, %v694_v37 }
 0x191   : > { %v683_v42 = vadd.f32 1.0, %v681_v38  ;;  %v697_v43 = vadd.f32 1.0, %v695_v39 }
 0x192   : > { %3155 = vrcp.f32 %v682_v40 }
 0x193   : > { %3157 = vrcp.f32 %v683_v42 }
 0x194   : > { %3159 = vrcp.f32 %v696_v41 }
 0x195   : > { %3161 = vrcp.f32 %v697_v43 }
 0x19f   : > { %v3156_v44 = vpop.eup %3155 }
 0x1a0   : > { %v3158_v45 = vpop.eup %3157  ;;  %v686_v46 = vmul.f32 %v3156_v44, %v4089_v24 }
 0x1a1   : > { %v3160_v47 = vpop.eup %3159  ;;  %v687_v48 = vmul.f32 %v3158_v45, %v4089_v24 }
 0x1a2   : > { %v3162_v49 = vpop.eup %3161  ;;  %v700_v50 = vmul.f32 %v3160_v47, %v4091_v26  ;;  %v702_v51 = vmul.f32 %v686_v46, %v4059_v2  ;;  %v716_v52 = vmul.f32 %v686_v46, %v4073_v8 }
 0x1a3   : > { %v701_v53 = vmul.f32 %v3162_v49, %v4091_v26  ;;  %v703_v54 = vmul.f32 %v687_v48, %v4059_v2  ;;  %v717_v55 = vmul.f32 %v687_v48, %v4073_v8 }
 0x1a4   : > { %v706_v56 = vmul.f32 %v700_v50, %v4067_v5  ;;  %v720_v57 = vmul.f32 %v700_v50, %v4079_v11 }
 0x1a5   : > { %v707_v58 = vmul.f32 %v701_v53, %v4067_v5  ;;  %v721_v59 = vmul.f32 %v701_v53, %v4079_v11 }
 0x1a6   : > { %v708_v60 = vadd.f32 %v706_v56, %v702_v51  ;;  %v722_v61 = vadd.f32 %v720_v57, %v716_v52 }
 0x1a7   : > { %v709_v62 = vadd.f32 %v707_v58, %v703_v54  ;;  %v723_v63 = vadd.f32 %v721_v59, %v717_v55 }
 0x1a8   : > { %v710_v6 = vadd.f32 1.0, %v708_v60  ;;  %v724_v7 = vadd.f32 1.0, %v722_v61 }
 0x1a9   : > { %v711_v9 = vadd.f32 1.0, %v709_v62  ;;  %v725_v10 = vadd.f32 1.0, %v723_v63 }
 0x1aa   : > { %3163 = vrcp.f32 %v710_v6 }
 0x1ab   : > { %3165 = vrcp.f32 %v711_v9 }
 0x1ac   : > { %3167 = vrcp.f32 %v724_v7 }
 0x1ad   : > { %3169 = vrcp.f32 %v725_v10 }
 0x1b7   : > { %v3164_v12 = vpop.eup %3163 }
 0x1b8   : > { %v3166_v13 = vpop.eup %3165  ;;  %v714_v14 = vmul.f32 %v3164_v12, %v4054_v0 }
 0x1b9   : > { %v3168_v15 = vpop.eup %3167  ;;  %v715_v16 = vmul.f32 %v3166_v13, %v4057_v1 }
 0x1ba   : > { %v3170_v17 = vpop.eup %3169  ;;  %v728_v18 = vmul.f32 %v3168_v15, %v4062_v3  ;;  %v730_v19 = vmul.f32 %v714_v14, %v4059_v2  ;;  %v744_v20 = vmul.f32 %v714_v14, %v4067_v5 }
 0x1bb   : > { %v729_v21 = vmul.f32 %v3170_v17, %v4065_v4  ;;  %v731_v22 = vmul.f32 %v715_v16, %v4059_v2  ;;  %v745_v23 = vmul.f32 %v715_v16, %v4067_v5 }
 0x1bc   : > { %v734_v25 = vmul.f32 %v728_v18, %v4073_v8  ;;  %v748_v27 = vmul.f32 %v728_v18, %v4079_v11 }
 0x1bd   : > { %v735_v28 = vmul.f32 %v729_v21, %v4073_v8  ;;  %v749_v29 = vmul.f32 %v729_v21, %v4079_v11 }
 0x1be   : > { %v736_v30 = vadd.f32 %v734_v25, %v730_v19  ;;  %v750_v31 = vadd.f32 %v748_v27, %v744_v20 }
 0x1bf   : > { %v737_v32 = vadd.f32 %v735_v28, %v731_v22  ;;  %v751_v33 = vadd.f32 %v749_v29, %v745_v23 }
 0x1c0   : > { %v738_v34 = vadd.f32 1.0, %v736_v30  ;;  %v752_v35 = vadd.f32 1.0, %v750_v31 }
 0x1c1   : > { %v739_v36 = vadd.f32 1.0, %v737_v32  ;;  %v753_v37 = vadd.f32 1.0, %v751_v33 }
 0x1c2   : > { %3171 = vrcp.f32 %v738_v34 }
 0x1c3   : > { %3173 = vrcp.f32 %v739_v36 }
 0x1c4   : > { %3175 = vrcp.f32 %v752_v35 }
 0x1c5   : > { %3177 = vrcp.f32 %v753_v37 }
 0x1cf   : > { %v3172_v38 = vpop.eup %3171 }
 0x1d0   : > { %v3174_v39 = vpop.eup %3173  ;;  %v742_v40 = vmul.f32 %v3172_v38, %v4089_v24 }
 0x1d1   : > { %v3176_v41 = vpop.eup %3175  ;;  %v743_v42 = vmul.f32 %v3174_v39, %v4089_v24 }
 0x1d2   : > { %v3178_v43 = vpop.eup %3177  ;;  %v756_v44 = vmul.f32 %v3176_v41, %v4091_v26  ;;  %v758_v45 = vmul.f32 %v742_v40, %v4059_v2  ;;  %v772_v46 = vmul.f32 %v742_v40, %v4073_v8 }
 0x1d3   : > { %v757_v47 = vmul.f32 %v3178_v43, %v4091_v26  ;;  %v759_v48 = vmul.f32 %v743_v42, %v4059_v2  ;;  %v773_v49 = vmul.f32 %v743_v42, %v4073_v8 }
 0x1d4   : > { %v762_v50 = vmul.f32 %v756_v44, %v4067_v5  ;;  %v776_v51 = vmul.f32 %v756_v44, %v4079_v11 }
 0x1d5   : > { %v763_v52 = vmul.f32 %v757_v47, %v4067_v5  ;;  %v777_v53 = vmul.f32 %v757_v47, %v4079_v11 }
 0x1d6   : > { %v764_v54 = vadd.f32 %v762_v50, %v758_v45  ;;  %v778_v55 = vadd.f32 %v776_v51, %v772_v46 }
 0x1d7   : > { %v765_v56 = vadd.f32 %v763_v52, %v759_v48  ;;  %v779_v57 = vadd.f32 %v777_v53, %v773_v49 }
 0x1d8   : > { %v766_v58 = vadd.f32 1.0, %v764_v54  ;;  %v780_v59 = vadd.f32 1.0, %v778_v55 }
 0x1d9   : > { %v767_v60 = vadd.f32 1.0, %v765_v56  ;;  %v781_v61 = vadd.f32 1.0, %v779_v57 }
 0x1da   : > { %3179 = vrcp.f32 %v766_v58 }
 0x1db   : > { %3181 = vrcp.f32 %v767_v60 }
 0x1dc   : > { %3183 = vrcp.f32 %v780_v59 }
 0x1dd   : > { %3185 = vrcp.f32 %v781_v61 }
 0x1e7   : > { %v3180_v62 = vpop.eup %3179 }
 0x1e8   : > { %v3182_v63 = vpop.eup %3181  ;;  %v770_v6 = vmul.f32 %v3180_v62, %v4054_v0 }
 0x1e9   : > { %v3184_v7 = vpop.eup %3183  ;;  %v771_v9 = vmul.f32 %v3182_v63, %v4057_v1 }
 0x1ea   : > { %v3186_v10 = vpop.eup %3185  ;;  %v784_v12 = vmul.f32 %v3184_v7, %v4062_v3  ;;  %v786_v13 = vmul.f32 %v770_v6, %v4059_v2  ;;  %v800_v14 = vmul.f32 %v770_v6, %v4067_v5  ;;  %v4303_v6 = vld [vmem:[%s4039_s27 + $0x18] sm:$0xff] }
 0x1eb   : > { %v785_v15 = vmul.f32 %v3186_v10, %v4065_v4  ;;  %v787_v16 = vmul.f32 %v771_v9, %v4059_v2  ;;  %v801_v17 = vmul.f32 %v771_v9, %v4067_v5 }
 0x1ec   : > { %v790_v18 = vmul.f32 %v784_v12, %v4073_v8  ;;  %v804_v19 = vmul.f32 %v784_v12, %v4079_v11 }
 0x1ed   : > { %v791_v20 = vmul.f32 %v785_v15, %v4073_v8  ;;  %v805_v21 = vmul.f32 %v785_v15, %v4079_v11 }
 0x1ee   : > { %v792_v22 = vadd.f32 %v790_v18, %v786_v13  ;;  %v806_v23 = vadd.f32 %v804_v19, %v800_v14 }
 0x1ef   : > { %v793_v25 = vadd.f32 %v791_v20, %v787_v16  ;;  %v807_v27 = vadd.f32 %v805_v21, %v801_v17 }
 0x1f0   : > { %v794_v28 = vadd.f32 1.0, %v792_v22  ;;  %v808_v29 = vadd.f32 1.0, %v806_v23 }
 0x1f1   : > { %v795_v30 = vadd.f32 1.0, %v793_v25  ;;  %v809_v4 = vadd.f32 1.0, %v807_v27 }
 0x1f2   : > { %3187 = vrcp.f32 %v794_v28 }
 0x1f3   : > { %3189 = vrcp.f32 %v795_v30 }
 0x1f4   : > { %3191 = vrcp.f32 %v808_v29 }
 0x1f5   : > { %3193 = vrcp.f32 %v809_v4 }
 0x1ff   : > { %v3188_v31 = vpop.eup %3187 }
 0x200   : > { %v3190_v32 = vpop.eup %3189  ;;  %v798_v33 = vmul.f32 %v3188_v31, %v4089_v24 }
 0x201   : > { %v3192_v34 = vpop.eup %3191  ;;  %v799_v35 = vmul.f32 %v3190_v32, %v4089_v24 }
 0x202   : > { %v3194_v36 = vpop.eup %3193  ;;  %v812_v37 = vmul.f32 %v3192_v34, %v4091_v26  ;;  %v814_v38 = vmul.f32 %v798_v33, %v4059_v2  ;;  %v828_v39 = vmul.f32 %v798_v33, %v4073_v8 }
 0x203   : > { %v813_v40 = vmul.f32 %v3194_v36, %v4091_v26  ;;  %v815_v41 = vmul.f32 %v799_v35, %v4059_v2  ;;  %v829_v42 = vmul.f32 %v799_v35, %v4073_v8 }
 0x204   : > { %v818_v43 = vmul.f32 %v812_v37, %v4067_v5  ;;  %v832_v44 = vmul.f32 %v812_v37, %v4079_v11 }
 0x205   : > { %v819_v45 = vmul.f32 %v813_v40, %v4067_v5  ;;  %v833_v46 = vmul.f32 %v813_v40, %v4079_v11 }
 0x206   : > { %v820_v47 = vadd.f32 %v818_v43, %v814_v38  ;;  %v834_v48 = vadd.f32 %v832_v44, %v828_v39 }
 0x207   : > { %v821_v49 = vadd.f32 %v819_v45, %v815_v41  ;;  %v835_v50 = vadd.f32 %v833_v46, %v829_v42 }
 0x208   : > { %v822_v51 = vadd.f32 1.0, %v820_v47  ;;  %v836_v52 = vadd.f32 1.0, %v834_v48  ;;  %v4325_v48 = vld [vmem:[%s4039_s27] sm:$0xff] }
 0x209   : > { %v823_v53 = vadd.f32 1.0, %v821_v49  ;;  %v837_v54 = vadd.f32 1.0, %v835_v50 }
 0x20a   : > { %3195 = vrcp.f32 %v822_v51  ;;  %v4329_v51 = vld [vmem:[%s4039_s27 + $0x8] sm:$0xff] }
 0x20b   : > { %3197 = vrcp.f32 %v823_v53 }
 0x20c   : > { %3199 = vrcp.f32 %v836_v52 }
 0x20d   : > { %3201 = vrcp.f32 %v837_v54  ;;  %v4333_v54 = vld [vmem:[%s4039_s27 + $0x10] sm:$0xff] }
 0x217   : > { %v3196_v55 = vpop.eup %3195 }
 0x218   : > { %v3198_v56 = vpop.eup %3197  ;;  %v826_v57 = vmul.f32 %v3196_v55, %v4054_v0 }
 0x219   : > { %v3200_v58 = vpop.eup %3199  ;;  %v827_v59 = vmul.f32 %v3198_v56, %v4057_v1 }
 0x21a   : > { %v3202_v60 = vpop.eup %3201  ;;  %v840_v61 = vmul.f32 %v3200_v58, %v4062_v3  ;;  %v842_v62 = vmul.f32 %v826_v57, %v4059_v2  ;;  %v856_v63 = vmul.f32 %v826_v57, %v4067_v5 }
 0x21b   : > { %v841_v7 = vmul.f32 %v4303_v6, %v3202_v60  ;;  %v843_v9 = vmul.f32 %v827_v59, %v4059_v2  ;;  %v857_v10 = vmul.f32 %v827_v59, %v4067_v5 }
 0x21c   : > { %v846_v0 = vmul.f32 %v840_v61, %v4073_v8  ;;  %v860_v12 = vmul.f32 %v840_v61, %v4079_v11 }
 0x21d   : > { %v847_v1 = vmul.f32 %v841_v7, %v4073_v8  ;;  %v861_v3 = vmul.f32 %v841_v7, %v4079_v11 }
 0x21e   : > { %v848_v13 = vadd.f32 %v846_v0, %v842_v62  ;;  %v862_v14 = vadd.f32 %v860_v12, %v856_v63 }
 0x21f   : > { %v849_v15 = vadd.f32 %v847_v1, %v843_v9  ;;  %v863_v16 = vadd.f32 %v861_v3, %v857_v10 }
 0x220   : > { %v850_v17 = vadd.f32 1.0, %v848_v13  ;;  %v864_v18 = vadd.f32 1.0, %v862_v14 }
 0x221   : > { %v851_v19 = vadd.f32 1.0, %v849_v15  ;;  %v865_v20 = vadd.f32 1.0, %v863_v16 }
 0x222   : > { %3203 = vrcp.f32 %v850_v17 }
 0x223   : > { %3205 = vrcp.f32 %v851_v19 }
 0x224   : > { %3207 = vrcp.f32 %v864_v18 }
 0x225   : > { %3209 = vrcp.f32 %v865_v20 }
 0x22f   : > { %v3204_v21 = vpop.eup %3203 }
 0x230   : > { %v3206_v22 = vpop.eup %3205  ;;  %v854_v23 = vmul.f32 %v3204_v21, %v4089_v24 }
 0x231   : > { %v3208_v25 = vpop.eup %3207  ;;  %v855_v27 = vmul.f32 %v3206_v22, %v4089_v24 }
 0x232   : > { %v3210_v28 = vpop.eup %3209  ;;  %v868_v29 = vmul.f32 %v3208_v25, %v4091_v26  ;;  %v870_v30 = vmul.f32 %v854_v23, %v4059_v2  ;;  %v884_v4 = vmul.f32 %v854_v23, %v4073_v8 }
 0x233   : > { %v869_v31 = vmul.f32 %v3210_v28, %v4091_v26  ;;  %v871_v32 = vmul.f32 %v855_v27, %v4059_v2  ;;  %v885_v33 = vmul.f32 %v855_v27, %v4073_v8 }
 0x234   : > { %v874_v34 = vmul.f32 %v868_v29, %v4067_v5  ;;  %v888_v35 = vmul.f32 %v868_v29, %v4079_v11 }
 0x235   : > { %v875_v36 = vmul.f32 %v869_v31, %v4067_v5  ;;  %v889_v37 = vmul.f32 %v869_v31, %v4079_v11 }
 0x236   : > { %v876_v38 = vadd.f32 %v874_v34, %v870_v30  ;;  %v890_v39 = vadd.f32 %v888_v35, %v884_v4 }
 0x237   : > { %v877_v40 = vadd.f32 %v875_v36, %v871_v32  ;;  %v891_v41 = vadd.f32 %v889_v37, %v885_v33 }
 0x238   : > { %v878_v42 = vadd.f32 1.0, %v876_v38  ;;  %v892_v43 = vadd.f32 1.0, %v890_v39 }
 0x239   : > { %v879_v44 = vadd.f32 1.0, %v877_v40  ;;  %v893_v45 = vadd.f32 1.0, %v891_v41 }
 0x23a   : > { %3211 = vrcp.f32 %v878_v42 }
 0x23b   : > { %3213 = vrcp.f32 %v879_v44 }
 0x23c   : > { %3215 = vrcp.f32 %v892_v43 }
 0x23d   : > { %3217 = vrcp.f32 %v893_v45 }
 0x247   : > { %v3212_v46 = vpop.eup %3211 }
 0x248   : > { %v3214_v47 = vpop.eup %3213  ;;  %v882_v49 = vmul.f32 %v4325_v48, %v3212_v46 }
 0x249   : > { %v3216_v50 = vpop.eup %3215  ;;  %v883_v52 = vmul.f32 %v4329_v51, %v3214_v47 }
 0x24a   : > { %v3218_v53 = vpop.eup %3217  ;;  %v896_v55 = vmul.f32 %v4333_v54, %v3216_v50  ;;  %v898_v56 = vmul.f32 %v882_v49, %v4059_v2  ;;  %v912_v57 = vmul.f32 %v882_v49, %v4067_v5 }
 0x24b   : > { %v897_v58 = vmul.f32 %v4303_v6, %v3218_v53  ;;  %v899_v59 = vmul.f32 %v883_v52, %v4059_v2  ;;  %v913_v60 = vmul.f32 %v883_v52, %v4067_v5 }
 0x24c   : > { %v902_v61 = vmul.f32 %v896_v55, %v4073_v8  ;;  %v916_v62 = vmul.f32 %v896_v55, %v4079_v11 }
 0x24d   : > { %v903_v63 = vmul.f32 %v897_v58, %v4073_v8  ;;  %v917_v7 = vmul.f32 %v897_v58, %v4079_v11 }
 0x24e   : > { %v904_v9 = vadd.f32 %v902_v61, %v898_v56  ;;  %v918_v10 = vadd.f32 %v916_v62, %v912_v57 }
 0x24f   : > { %v905_v0 = vadd.f32 %v903_v63, %v899_v59  ;;  %v919_v12 = vadd.f32 %v917_v7, %v913_v60 }
 0x250   : > { %v906_v1 = vadd.f32 1.0, %v904_v9  ;;  %v920_v3 = vadd.f32 1.0, %v918_v10 }
 0x251   : > { %v907_v13 = vadd.f32 1.0, %v905_v0  ;;  %v921_v14 = vadd.f32 1.0, %v919_v12 }
 0x252   : > { %3219 = vrcp.f32 %v906_v1 }
 0x253   : > { %3221 = vrcp.f32 %v907_v13 }
 0x254   : > { %3223 = vrcp.f32 %v920_v3 }
 0x255   : > { %3225 = vrcp.f32 %v921_v14 }
 0x25f   : > { %v3220_v15 = vpop.eup %3219 }
 0x260   : > { %v3222_v16 = vpop.eup %3221  ;;  %v910_v17 = vmul.f32 %v3220_v15, %v4089_v24 }
 0x261   : > { %v3224_v18 = vpop.eup %3223  ;;  %v911_v19 = vmul.f32 %v3222_v16, %v4089_v24 }
 0x262   : > { %v3226_v20 = vpop.eup %3225  ;;  %v924_v21 = vmul.f32 %v3224_v18, %v4091_v26  ;;  %v926_v22 = vmul.f32 %v910_v17, %v4059_v2  ;;  %v940_v23 = vmul.f32 %v910_v17, %v4073_v8 }
 0x263   : > { %v925_v25 = vmul.f32 %v3226_v20, %v4091_v26  ;;  %v927_v27 = vmul.f32 %v911_v19, %v4059_v2  ;;  %v941_v28 = vmul.f32 %v911_v19, %v4073_v8 }
 0x264   : > { %v930_v29 = vmul.f32 %v924_v21, %v4067_v5  ;;  %v944_v30 = vmul.f32 %v924_v21, %v4079_v11 }
 0x265   : > { %v931_v4 = vmul.f32 %v925_v25, %v4067_v5  ;;  %v945_v31 = vmul.f32 %v925_v25, %v4079_v11 }
 0x266   : > { %v932_v32 = vadd.f32 %v930_v29, %v926_v22  ;;  %v946_v33 = vadd.f32 %v944_v30, %v940_v23 }
 0x267   : > { %v933_v34 = vadd.f32 %v931_v4, %v927_v27  ;;  %v947_v35 = vadd.f32 %v945_v31, %v941_v28 }
 0x268   : > { %v934_v36 = vadd.f32 1.0, %v932_v32  ;;  %v948_v37 = vadd.f32 1.0, %v946_v33 }
 0x269   : > { %v935_v38 = vadd.f32 1.0, %v933_v34  ;;  %v949_v39 = vadd.f32 1.0, %v947_v35 }
 0x26a   : > { %3227 = vrcp.f32 %v934_v36 }
 0x26b   : > { %3229 = vrcp.f32 %v935_v38 }
 0x26c   : > { %3231 = vrcp.f32 %v948_v37 }
 0x26d   : > { %3233 = vrcp.f32 %v949_v39 }
 0x277   : > { %v3228_v40 = vpop.eup %3227 }
 0x278   : > { %v3230_v41 = vpop.eup %3229  ;;  %v938_v42 = vmul.f32 %v4325_v48, %v3228_v40 }
 0x279   : > { %v3232_v43 = vpop.eup %3231  ;;  %v939_v44 = vmul.f32 %v4329_v51, %v3230_v41 }
 0x27a   : > { %v3234_v45 = vpop.eup %3233  ;;  %v952_v46 = vmul.f32 %v4333_v54, %v3232_v43  ;;  %v954_v47 = vmul.f32 %v938_v42, %v4059_v2  ;;  %v968_v49 = vmul.f32 %v938_v42, %v4067_v5 }
 0x27b   : > { %v953_v50 = vmul.f32 %v4303_v6, %v3234_v45  ;;  %v955_v52 = vmul.f32 %v939_v44, %v4059_v2  ;;  %v969_v53 = vmul.f32 %v939_v44, %v4067_v5 }
 0x27c   : > { %v958_v55 = vmul.f32 %v952_v46, %v4073_v8  ;;  %v972_v56 = vmul.f32 %v952_v46, %v4079_v11 }
 0x27d   : > { %v959_v57 = vmul.f32 %v953_v50, %v4073_v8  ;;  %v973_v58 = vmul.f32 %v953_v50, %v4079_v11 }
 0x27e   : > { %v960_v59 = vadd.f32 %v958_v55, %v954_v47  ;;  %v974_v60 = vadd.f32 %v972_v56, %v968_v49 }
 0x27f   : > { %v961_v61 = vadd.f32 %v959_v57, %v955_v52  ;;  %v975_v62 = vadd.f32 %v973_v58, %v969_v53 }
 0x280   : > { %v962_v63 = vadd.f32 1.0, %v960_v59  ;;  %v976_v7 = vadd.f32 1.0, %v974_v60 }
 0x281   : > { %v963_v9 = vadd.f32 1.0, %v961_v61  ;;  %v977_v10 = vadd.f32 1.0, %v975_v62 }
 0x282   : > { %3235 = vrcp.f32 %v962_v63 }
 0x283   : > { %3237 = vrcp.f32 %v963_v9 }
 0x284   : > { %3239 = vrcp.f32 %v976_v7 }
 0x285   : > { %3241 = vrcp.f32 %v977_v10 }
 0x28f   : > { %v3236_v0 = vpop.eup %3235 }
 0x290   : > { %v3238_v12 = vpop.eup %3237  ;;  %v966_v1 = vmul.f32 %v3236_v0, %v4089_v24 }
 0x291   : > { %v3240_v3 = vpop.eup %3239  ;;  %v967_v13 = vmul.f32 %v3238_v12, %v4089_v24 }
 0x292   : > { %v3242_v14 = vpop.eup %3241  ;;  %v980_v15 = vmul.f32 %v3240_v3, %v4091_v26  ;;  %v982_v16 = vmul.f32 %v966_v1, %v4059_v2  ;;  %v996_v17 = vmul.f32 %v966_v1, %v4073_v8 }
 0x293   : > { %v981_v18 = vmul.f32 %v3242_v14, %v4091_v26  ;;  %v983_v19 = vmul.f32 %v967_v13, %v4059_v2  ;;  %v997_v20 = vmul.f32 %v967_v13, %v4073_v8 }
 0x294   : > { %v986_v21 = vmul.f32 %v980_v15, %v4067_v5  ;;  %v1000_v22 = vmul.f32 %v980_v15, %v4079_v11 }
 0x295   : > { %v987_v23 = vmul.f32 %v981_v18, %v4067_v5  ;;  %v1001_v25 = vmul.f32 %v981_v18, %v4079_v11 }
 0x296   : > { %v988_v27 = vadd.f32 %v986_v21, %v982_v16  ;;  %v1002_v28 = vadd.f32 %v1000_v22, %v996_v17 }
 0x297   : > { %v989_v29 = vadd.f32 %v987_v23, %v983_v19  ;;  %v1003_v30 = vadd.f32 %v1001_v25, %v997_v20 }
 0x298   : > { %v990_v4 = vadd.f32 1.0, %v988_v27  ;;  %v1004_v31 = vadd.f32 1.0, %v1002_v28 }
 0x299   : > { %v991_v32 = vadd.f32 1.0, %v989_v29  ;;  %v1005_v33 = vadd.f32 1.0, %v1003_v30 }
 0x29a   : > { %3243 = vrcp.f32 %v990_v4 }
 0x29b   : > { %3245 = vrcp.f32 %v991_v32 }
 0x29c   : > { %3247 = vrcp.f32 %v1004_v31 }
 0x29d   : > { %3249 = vrcp.f32 %v1005_v33 }
 0x2a7   : > { %v3244_v34 = vpop.eup %3243 }
 0x2a8   : > { %v3246_v35 = vpop.eup %3245  ;;  %v994_v36 = vmul.f32 %v4325_v48, %v3244_v34 }
 0x2a9   : > { %v3248_v37 = vpop.eup %3247  ;;  %v995_v38 = vmul.f32 %v4329_v51, %v3246_v35 }
 0x2aa   : > { %v3250_v39 = vpop.eup %3249  ;;  %v1008_v40 = vmul.f32 %v4333_v54, %v3248_v37  ;;  %v1010_v41 = vmul.f32 %v994_v36, %v4059_v2  ;;  %v1024_v42 = vmul.f32 %v994_v36, %v4067_v5 }
 0x2ab   : > { %v1009_v43 = vmul.f32 %v4303_v6, %v3250_v39  ;;  %v1011_v44 = vmul.f32 %v995_v38, %v4059_v2  ;;  %v1025_v45 = vmul.f32 %v995_v38, %v4067_v5 }
 0x2ac   : > { %v1014_v46 = vmul.f32 %v1008_v40, %v4073_v8  ;;  %v1028_v47 = vmul.f32 %v1008_v40, %v4079_v11 }
 0x2ad   : > { %v1015_v49 = vmul.f32 %v1009_v43, %v4073_v8  ;;  %v1029_v50 = vmul.f32 %v1009_v43, %v4079_v11 }
 0x2ae   : > { %v1016_v52 = vadd.f32 %v1014_v46, %v1010_v41  ;;  %v1030_v53 = vadd.f32 %v1028_v47, %v1024_v42 }
 0x2af   : > { %v1017_v55 = vadd.f32 %v1015_v49, %v1011_v44  ;;  %v1031_v56 = vadd.f32 %v1029_v50, %v1025_v45 }
 0x2b0   : > { %v1018_v57 = vadd.f32 1.0, %v1016_v52  ;;  %v1032_v58 = vadd.f32 1.0, %v1030_v53 }
 0x2b1   : > { %v1019_v59 = vadd.f32 1.0, %v1017_v55  ;;  %v1033_v60 = vadd.f32 1.0, %v1031_v56 }
 0x2b2   : > { %3251 = vrcp.f32 %v1018_v57 }
 0x2b3   : > { %3253 = vrcp.f32 %v1019_v59 }
 0x2b4   : > { %3255 = vrcp.f32 %v1032_v58 }
 0x2b5   : > { %3257 = vrcp.f32 %v1033_v60 }
 0x2bf   : > { %v3252_v61 = vpop.eup %3251 }
 0x2c0   : > { %v3254_v62 = vpop.eup %3253  ;;  %v1022_v63 = vmul.f32 %v3252_v61, %v4089_v24 }
 0x2c1   : > { %v3256_v7 = vpop.eup %3255  ;;  %v1023_v9 = vmul.f32 %v3254_v62, %v4089_v24 }
 0x2c2   : > { %v3258_v10 = vpop.eup %3257  ;;  %v1036_v0 = vmul.f32 %v3256_v7, %v4091_v26  ;;  %v1038_v12 = vmul.f32 %v1022_v63, %v4059_v2  ;;  %v1052_v1 = vmul.f32 %v1022_v63, %v4073_v8 }
 0x2c3   : > { %v1037_v3 = vmul.f32 %v3258_v10, %v4091_v26  ;;  %v1039_v13 = vmul.f32 %v1023_v9, %v4059_v2  ;;  %v1053_v14 = vmul.f32 %v1023_v9, %v4073_v8 }
 0x2c4   : > { %v1042_v15 = vmul.f32 %v1036_v0, %v4067_v5  ;;  %v1056_v16 = vmul.f32 %v1036_v0, %v4079_v11 }
 0x2c5   : > { %v1043_v17 = vmul.f32 %v1037_v3, %v4067_v5  ;;  %v1057_v18 = vmul.f32 %v1037_v3, %v4079_v11 }
 0x2c6   : > { %v1044_v19 = vadd.f32 %v1042_v15, %v1038_v12  ;;  %v1058_v20 = vadd.f32 %v1056_v16, %v1052_v1 }
 0x2c7   : > { %v1045_v21 = vadd.f32 %v1043_v17, %v1039_v13  ;;  %v1059_v22 = vadd.f32 %v1057_v18, %v1053_v14 }
 0x2c8   : > { %v1046_v23 = vadd.f32 1.0, %v1044_v19  ;;  %v1060_v25 = vadd.f32 1.0, %v1058_v20 }
 0x2c9   : > { %v1047_v27 = vadd.f32 1.0, %v1045_v21  ;;  %v1061_v28 = vadd.f32 1.0, %v1059_v22 }
 0x2ca   : > { %3259 = vrcp.f32 %v1046_v23 }
 0x2cb   : > { %3261 = vrcp.f32 %v1047_v27 }
 0x2cc   : > { %3263 = vrcp.f32 %v1060_v25 }
 0x2cd   : > { %3265 = vrcp.f32 %v1061_v28 }
 0x2d7   : > { %v3260_v29 = vpop.eup %3259 }
 0x2d8   : > { %v3262_v30 = vpop.eup %3261  ;;  %v1050_v4 = vmul.f32 %v4325_v48, %v3260_v29 }
 0x2d9   : > { %v3264_v31 = vpop.eup %3263  ;;  %v1051_v32 = vmul.f32 %v4329_v51, %v3262_v30 }
 0x2da   : > { %v3266_v33 = vpop.eup %3265  ;;  %v1064_v34 = vmul.f32 %v4333_v54, %v3264_v31  ;;  %v1066_v35 = vmul.f32 %v1050_v4, %v4059_v2  ;;  %v1080_v36 = vmul.f32 %v1050_v4, %v4067_v5 }
 0x2db   : > { %v1065_v37 = vmul.f32 %v4303_v6, %v3266_v33  ;;  %v1067_v38 = vmul.f32 %v1051_v32, %v4059_v2  ;;  %v1081_v39 = vmul.f32 %v1051_v32, %v4067_v5 }
 0x2dc   : > { %v1070_v40 = vmul.f32 %v1064_v34, %v4073_v8  ;;  %v1084_v41 = vmul.f32 %v1064_v34, %v4079_v11 }
 0x2dd   : > { %v1071_v42 = vmul.f32 %v1065_v37, %v4073_v8  ;;  %v1085_v43 = vmul.f32 %v1065_v37, %v4079_v11 }
 0x2de   : > { %v1072_v44 = vadd.f32 %v1070_v40, %v1066_v35  ;;  %v1086_v45 = vadd.f32 %v1084_v41, %v1080_v36 }
 0x2df   : > { %v1073_v46 = vadd.f32 %v1071_v42, %v1067_v38  ;;  %v1087_v47 = vadd.f32 %v1085_v43, %v1081_v39 }
 0x2e0   : > { %v1074_v49 = vadd.f32 1.0, %v1072_v44  ;;  %v1088_v50 = vadd.f32 1.0, %v1086_v45 }
 0x2e1   : > { %v1075_v52 = vadd.f32 1.0, %v1073_v46  ;;  %v1089_v53 = vadd.f32 1.0, %v1087_v47 }
 0x2e2   : > { %3267 = vrcp.f32 %v1074_v49 }
 0x2e3   : > { %3269 = vrcp.f32 %v1075_v52 }
 0x2e4   : > { %3271 = vrcp.f32 %v1088_v50 }
 0x2e5   : > { %3273 = vrcp.f32 %v1089_v53 }
 0x2ef   : > { %v3268_v55 = vpop.eup %3267 }
 0x2f0   : > { %v3270_v56 = vpop.eup %3269  ;;  %v1078_v57 = vmul.f32 %v3268_v55, %v4089_v24 }
 0x2f1   : > { %v3272_v58 = vpop.eup %3271  ;;  %v1079_v59 = vmul.f32 %v3270_v56, %v4089_v24 }
 0x2f2   : > { %v3274_v60 = vpop.eup %3273  ;;  %v1092_v61 = vmul.f32 %v3272_v58, %v4091_v26  ;;  %v1094_v62 = vmul.f32 %v1078_v57, %v4059_v2  ;;  %v1108_v63 = vmul.f32 %v1078_v57, %v4073_v8 }
 0x2f3   : > { %v1093_v7 = vmul.f32 %v3274_v60, %v4091_v26  ;;  %v1095_v9 = vmul.f32 %v1079_v59, %v4059_v2  ;;  %v1109_v10 = vmul.f32 %v1079_v59, %v4073_v8 }
 0x2f4   : > { %v1098_v0 = vmul.f32 %v1092_v61, %v4067_v5  ;;  %v1112_v12 = vmul.f32 %v1092_v61, %v4079_v11 }
 0x2f5   : > { %v1099_v1 = vmul.f32 %v1093_v7, %v4067_v5  ;;  %v1113_v3 = vmul.f32 %v1093_v7, %v4079_v11 }
 0x2f6   : > { %v1100_v13 = vadd.f32 %v1098_v0, %v1094_v62  ;;  %v1114_v14 = vadd.f32 %v1112_v12, %v1108_v63 }
 0x2f7   : > { %v1101_v15 = vadd.f32 %v1099_v1, %v1095_v9  ;;  %v1115_v16 = vadd.f32 %v1113_v3, %v1109_v10 }
 0x2f8   : > { %v1102_v17 = vadd.f32 1.0, %v1100_v13  ;;  %v1116_v18 = vadd.f32 1.0, %v1114_v14 }
 0x2f9   : > { %v1103_v19 = vadd.f32 1.0, %v1101_v15  ;;  %v1117_v20 = vadd.f32 1.0, %v1115_v16 }
 0x2fa   : > { %3275 = vrcp.f32 %v1102_v17 }
 0x2fb   : > { %3277 = vrcp.f32 %v1103_v19 }
 0x2fc   : > { %3279 = vrcp.f32 %v1116_v18 }
 0x2fd   : > { %3281 = vrcp.f32 %v1117_v20 }
 0x307   : > { %v3276_v21 = vpop.eup %3275 }
 0x308   : > { %v3278_v22 = vpop.eup %3277  ;;  %v1106_v23 = vmul.f32 %v4325_v48, %v3276_v21 }
 0x309   : > { %v3280_v25 = vpop.eup %3279  ;;  %v1107_v27 = vmul.f32 %v4329_v51, %v3278_v22 }
 0x30a   : > { %v3282_v28 = vpop.eup %3281  ;;  %v1120_v29 = vmul.f32 %v4333_v54, %v3280_v25  ;;  %v1122_v30 = vmul.f32 %v1106_v23, %v4059_v2  ;;  %v1136_v4 = vmul.f32 %v1106_v23, %v4067_v5 }
 0x30b   : > { %v1121_v31 = vmul.f32 %v4303_v6, %v3282_v28  ;;  %v1123_v32 = vmul.f32 %v1107_v27, %v4059_v2  ;;  %v1137_v33 = vmul.f32 %v1107_v27, %v4067_v5 }
 0x30c   : > { %v1126_v34 = vmul.f32 %v1120_v29, %v4073_v8  ;;  %v1140_v35 = vmul.f32 %v1120_v29, %v4079_v11 }
 0x30d   : > { %v1127_v36 = vmul.f32 %v1121_v31, %v4073_v8  ;;  %v1141_v37 = vmul.f32 %v1121_v31, %v4079_v11 }
 0x30e   : > { %v1128_v38 = vadd.f32 %v1126_v34, %v1122_v30  ;;  %v1142_v39 = vadd.f32 %v1140_v35, %v1136_v4 }
 0x30f   : > { %v1129_v40 = vadd.f32 %v1127_v36, %v1123_v32  ;;  %v1143_v41 = vadd.f32 %v1141_v37, %v1137_v33 }
 0x310   : > { %v1130_v42 = vadd.f32 1.0, %v1128_v38  ;;  %v1144_v43 = vadd.f32 1.0, %v1142_v39 }
 0x311   : > { %v1131_v44 = vadd.f32 1.0, %v1129_v40  ;;  %v1145_v45 = vadd.f32 1.0, %v1143_v41 }
 0x312   : > { %3283 = vrcp.f32 %v1130_v42 }
 0x313   : > { %3285 = vrcp.f32 %v1131_v44 }
 0x314   : > { %3287 = vrcp.f32 %v1144_v43 }
 0x315   : > { %3289 = vrcp.f32 %v1145_v45 }
 0x31f   : > { %v3284_v46 = vpop.eup %3283 }
 0x320   : > { %v3286_v47 = vpop.eup %3285  ;;  %v1134_v49 = vmul.f32 %v3284_v46, %v4089_v24 }
 0x321   : > { %v3288_v50 = vpop.eup %3287  ;;  %v1135_v52 = vmul.f32 %v3286_v47, %v4089_v24 }
 0x322   : > { %v3290_v53 = vpop.eup %3289  ;;  %v1148_v55 = vmul.f32 %v3288_v50, %v4091_v26  ;;  %v1150_v56 = vmul.f32 %v1134_v49, %v4059_v2  ;;  %v1164_v57 = vmul.f32 %v1134_v49, %v4073_v8 }
 0x323   : > { %v1149_v58 = vmul.f32 %v3290_v53, %v4091_v26  ;;  %v1151_v59 = vmul.f32 %v1135_v52, %v4059_v2  ;;  %v1165_v60 = vmul.f32 %v1135_v52, %v4073_v8 }
 0x324   : > { %v1154_v61 = vmul.f32 %v1148_v55, %v4067_v5  ;;  %v1168_v62 = vmul.f32 %v1148_v55, %v4079_v11 }
 0x325   : > { %v1155_v63 = vmul.f32 %v1149_v58, %v4067_v5  ;;  %v1169_v7 = vmul.f32 %v1149_v58, %v4079_v11 }
 0x326   : > { %v1156_v9 = vadd.f32 %v1154_v61, %v1150_v56  ;;  %v1170_v10 = vadd.f32 %v1168_v62, %v1164_v57 }
 0x327   : > { %v1157_v0 = vadd.f32 %v1155_v63, %v1151_v59  ;;  %v1171_v12 = vadd.f32 %v1169_v7, %v1165_v60 }
 0x328   : > { %v1158_v1 = vadd.f32 1.0, %v1156_v9  ;;  %v1172_v3 = vadd.f32 1.0, %v1170_v10 }
 0x329   : > { %v1159_v13 = vadd.f32 1.0, %v1157_v0  ;;  %v1173_v14 = vadd.f32 1.0, %v1171_v12 }
 0x32a   : > { %3291 = vrcp.f32 %v1158_v1 }
 0x32b   : > { %3293 = vrcp.f32 %v1159_v13 }
 0x32c   : > { %3295 = vrcp.f32 %v1172_v3 }
 0x32d   : > { %3297 = vrcp.f32 %v1173_v14 }
 0x337   : > { %v3292_v15 = vpop.eup %3291 }
 0x338   : > { %v3294_v16 = vpop.eup %3293  ;;  %v1162_v17 = vmul.f32 %v4325_v48, %v3292_v15 }
 0x339   : > { %v3296_v18 = vpop.eup %3295  ;;  %v1163_v19 = vmul.f32 %v4329_v51, %v3294_v16 }
 0x33a   : > { %v3298_v20 = vpop.eup %3297  ;;  %v1176_v21 = vmul.f32 %v4333_v54, %v3296_v18  ;;  %v1178_v22 = vmul.f32 %v1162_v17, %v4059_v2  ;;  %v1192_v23 = vmul.f32 %v1162_v17, %v4067_v5 }
 0x33b   : > { %v1177_v25 = vmul.f32 %v4303_v6, %v3298_v20  ;;  %v1179_v27 = vmul.f32 %v1163_v19, %v4059_v2  ;;  %v1193_v28 = vmul.f32 %v1163_v19, %v4067_v5 }
 0x33c   : > { %v1182_v29 = vmul.f32 %v1176_v21, %v4073_v8  ;;  %v1196_v30 = vmul.f32 %v1176_v21, %v4079_v11 }
 0x33d   : > { %v1183_v4 = vmul.f32 %v1177_v25, %v4073_v8  ;;  %v1197_v31 = vmul.f32 %v1177_v25, %v4079_v11 }
 0x33e   : > { %v1184_v32 = vadd.f32 %v1182_v29, %v1178_v22  ;;  %v1198_v33 = vadd.f32 %v1196_v30, %v1192_v23 }
 0x33f   : > { %v1185_v34 = vadd.f32 %v1183_v4, %v1179_v27  ;;  %v1199_v35 = vadd.f32 %v1197_v31, %v1193_v28 }
 0x340   : > { %v1186_v36 = vadd.f32 1.0, %v1184_v32  ;;  %v1200_v37 = vadd.f32 1.0, %v1198_v33 }
 0x341   : > { %v1187_v38 = vadd.f32 1.0, %v1185_v34  ;;  %v1201_v39 = vadd.f32 1.0, %v1199_v35 }
 0x342   : > { %3299 = vrcp.f32 %v1186_v36 }
 0x343   : > { %3301 = vrcp.f32 %v1187_v38 }
 0x344   : > { %3303 = vrcp.f32 %v1200_v37 }
 0x345   : > { %3305 = vrcp.f32 %v1201_v39 }
 0x34f   : > { %v3300_v40 = vpop.eup %3299 }
 0x350   : > { %v3302_v41 = vpop.eup %3301  ;;  %v1190_v42 = vmul.f32 %v3300_v40, %v4089_v24 }
 0x351   : > { %v3304_v43 = vpop.eup %3303  ;;  %v1191_v44 = vmul.f32 %v3302_v41, %v4089_v24 }
 0x352   : > { %v3306_v45 = vpop.eup %3305  ;;  %v1204_v46 = vmul.f32 %v3304_v43, %v4091_v26  ;;  %v1206_v47 = vmul.f32 %v1190_v42, %v4059_v2  ;;  %v1220_v49 = vmul.f32 %v1190_v42, %v4073_v8 }
 0x353   : > { %v1205_v50 = vmul.f32 %v3306_v45, %v4091_v26  ;;  %v1207_v52 = vmul.f32 %v1191_v44, %v4059_v2  ;;  %v1221_v53 = vmul.f32 %v1191_v44, %v4073_v8 }
 0x354   : > { %v1210_v55 = vmul.f32 %v1204_v46, %v4067_v5  ;;  %v1224_v56 = vmul.f32 %v1204_v46, %v4079_v11 }
 0x355   : > { %v1211_v57 = vmul.f32 %v1205_v50, %v4067_v5  ;;  %v1225_v58 = vmul.f32 %v1205_v50, %v4079_v11 }
 0x356   : > { %v1212_v59 = vadd.f32 %v1210_v55, %v1206_v47  ;;  %v1226_v60 = vadd.f32 %v1224_v56, %v1220_v49 }
 0x357   : > { %v1213_v61 = vadd.f32 %v1211_v57, %v1207_v52  ;;  %v1227_v62 = vadd.f32 %v1225_v58, %v1221_v53 }
 0x358   : > { %v1214_v63 = vadd.f32 1.0, %v1212_v59  ;;  %v1228_v7 = vadd.f32 1.0, %v1226_v60 }
 0x359   : > { %v1215_v9 = vadd.f32 1.0, %v1213_v61  ;;  %v1229_v10 = vadd.f32 1.0, %v1227_v62 }
 0x35a   : > { %3307 = vrcp.f32 %v1214_v63 }
 0x35b   : > { %3309 = vrcp.f32 %v1215_v9 }
 0x35c   : > { %3311 = vrcp.f32 %v1228_v7 }
 0x35d   : > { %3313 = vrcp.f32 %v1229_v10 }
 0x367   : > { %v3308_v0 = vpop.eup %3307 }
 0x368   : > { %v3310_v12 = vpop.eup %3309  ;;  %v1218_v1 = vmul.f32 %v4325_v48, %v3308_v0 }
 0x369   : > { %v3312_v3 = vpop.eup %3311  ;;  %v1219_v13 = vmul.f32 %v4329_v51, %v3310_v12 }
 0x36a   : > { %v3314_v14 = vpop.eup %3313  ;;  %v1232_v15 = vmul.f32 %v4333_v54, %v3312_v3  ;;  %v1234_v16 = vmul.f32 %v1218_v1, %v4059_v2  ;;  %v1248_v17 = vmul.f32 %v1218_v1, %v4067_v5 }
 0x36b   : > { %v1233_v18 = vmul.f32 %v4303_v6, %v3314_v14  ;;  %v1235_v19 = vmul.f32 %v1219_v13, %v4059_v2  ;;  %v1249_v20 = vmul.f32 %v1219_v13, %v4067_v5 }
 0x36c   : > { %v1238_v21 = vmul.f32 %v1232_v15, %v4073_v8  ;;  %v1252_v22 = vmul.f32 %v1232_v15, %v4079_v11 }
 0x36d   : > { %v1239_v23 = vmul.f32 %v1233_v18, %v4073_v8  ;;  %v1253_v25 = vmul.f32 %v1233_v18, %v4079_v11 }
 0x36e   : > { %v1240_v27 = vadd.f32 %v1238_v21, %v1234_v16  ;;  %v1254_v28 = vadd.f32 %v1252_v22, %v1248_v17 }
 0x36f   : > { %v1241_v29 = vadd.f32 %v1239_v23, %v1235_v19  ;;  %v1255_v30 = vadd.f32 %v1253_v25, %v1249_v20 }
 0x370   : > { %v1242_v4 = vadd.f32 1.0, %v1240_v27  ;;  %v1256_v31 = vadd.f32 1.0, %v1254_v28 }
 0x371   : > { %v1243_v32 = vadd.f32 1.0, %v1241_v29  ;;  %v1257_v33 = vadd.f32 1.0, %v1255_v30 }
 0x372   : > { %3315 = vrcp.f32 %v1242_v4 }
 0x373   : > { %3317 = vrcp.f32 %v1243_v32 }
 0x374   : > { %3319 = vrcp.f32 %v1256_v31 }
 0x375   : > { %3321 = vrcp.f32 %v1257_v33 }
 0x37f   : > { %v3316_v34 = vpop.eup %3315 }
 0x380   : > { %v3318_v35 = vpop.eup %3317  ;;  %v1246_v36 = vmul.f32 %v3316_v34, %v4089_v24 }
 0x381   : > { %v3320_v37 = vpop.eup %3319  ;;  %v1247_v38 = vmul.f32 %v3318_v35, %v4089_v24 }
 0x382   : > { %v3322_v39 = vpop.eup %3321  ;;  %v1260_v40 = vmul.f32 %v3320_v37, %v4091_v26  ;;  %v1262_v41 = vmul.f32 %v1246_v36, %v4059_v2  ;;  %v1276_v42 = vmul.f32 %v1246_v36, %v4073_v8 }
 0x383   : > { %v1261_v43 = vmul.f32 %v3322_v39, %v4091_v26  ;;  %v1263_v44 = vmul.f32 %v1247_v38, %v4059_v2  ;;  %v1277_v45 = vmul.f32 %v1247_v38, %v4073_v8 }
 0x384   : > { %v1266_v46 = vmul.f32 %v1260_v40, %v4067_v5  ;;  %v1280_v47 = vmul.f32 %v1260_v40, %v4079_v11 }
 0x385   : > { %v1267_v49 = vmul.f32 %v1261_v43, %v4067_v5  ;;  %v1281_v50 = vmul.f32 %v1261_v43, %v4079_v11 }
 0x386   : > { %v1268_v52 = vadd.f32 %v1266_v46, %v1262_v41  ;;  %v1282_v53 = vadd.f32 %v1280_v47, %v1276_v42 }
 0x387   : > { %v1269_v55 = vadd.f32 %v1267_v49, %v1263_v44  ;;  %v1283_v56 = vadd.f32 %v1281_v50, %v1277_v45 }
 0x388   : > { %v1270_v57 = vadd.f32 1.0, %v1268_v52  ;;  %v1284_v58 = vadd.f32 1.0, %v1282_v53 }
 0x389   : > { %v1271_v59 = vadd.f32 1.0, %v1269_v55  ;;  %v1285_v60 = vadd.f32 1.0, %v1283_v56 }
 0x38a   : > { %3323 = vrcp.f32 %v1270_v57 }
 0x38b   : > { %3325 = vrcp.f32 %v1271_v59 }
 0x38c   : > { %3327 = vrcp.f32 %v1284_v58 }
 0x38d   : > { %3329 = vrcp.f32 %v1285_v60 }
 0x397   : > { %v3324_v61 = vpop.eup %3323 }
 0x398   : > { %v3326_v62 = vpop.eup %3325  ;;  %v1274_v63 = vmul.f32 %v4325_v48, %v3324_v61 }
 0x399   : > { %v3328_v7 = vpop.eup %3327  ;;  %v1275_v9 = vmul.f32 %v4329_v51, %v3326_v62 }
 0x39a   : > { %v3330_v10 = vpop.eup %3329  ;;  %v1288_v0 = vmul.f32 %v4333_v54, %v3328_v7  ;;  %v1290_v12 = vmul.f32 %v1274_v63, %v4059_v2  ;;  %v1304_v1 = vmul.f32 %v1274_v63, %v4067_v5 }
 0x39b   : > { %v1289_v3 = vmul.f32 %v4303_v6, %v3330_v10  ;;  %v1291_v13 = vmul.f32 %v1275_v9, %v4059_v2  ;;  %v1305_v14 = vmul.f32 %v1275_v9, %v4067_v5 }
 0x39c   : > { %v1294_v15 = vmul.f32 %v1288_v0, %v4073_v8  ;;  %v1308_v16 = vmul.f32 %v1288_v0, %v4079_v11 }
 0x39d   : > { %v1295_v17 = vmul.f32 %v1289_v3, %v4073_v8  ;;  %v1309_v18 = vmul.f32 %v1289_v3, %v4079_v11 }
 0x39e   : > { %v1296_v19 = vadd.f32 %v1294_v15, %v1290_v12  ;;  %v1310_v20 = vadd.f32 %v1308_v16, %v1304_v1 }
 0x39f   : > { %v1297_v21 = vadd.f32 %v1295_v17, %v1291_v13  ;;  %v1311_v22 = vadd.f32 %v1309_v18, %v1305_v14 }
 0x3a0   : > { %v1298_v23 = vadd.f32 1.0, %v1296_v19  ;;  %v1312_v25 = vadd.f32 1.0, %v1310_v20 }
 0x3a1   : > { %v1299_v27 = vadd.f32 1.0, %v1297_v21  ;;  %v1313_v28 = vadd.f32 1.0, %v1311_v22 }
 0x3a2   : > { %3331 = vrcp.f32 %v1298_v23 }
 0x3a3   : > { %3333 = vrcp.f32 %v1299_v27 }
 0x3a4   : > { %3335 = vrcp.f32 %v1312_v25 }
 0x3a5   : > { %3337 = vrcp.f32 %v1313_v28 }
 0x3af   : > { %v3332_v29 = vpop.eup %3331 }
 0x3b0   : > { %v3334_v30 = vpop.eup %3333  ;;  %v1302_v4 = vmul.f32 %v3332_v29, %v4089_v24 }
 0x3b1   : > { %v3336_v31 = vpop.eup %3335  ;;  %v1303_v32 = vmul.f32 %v3334_v30, %v4089_v24 }
 0x3b2   : > { %v3338_v33 = vpop.eup %3337  ;;  %v1316_v34 = vmul.f32 %v3336_v31, %v4091_v26  ;;  %v1318_v35 = vmul.f32 %v1302_v4, %v4059_v2  ;;  %v1332_v36 = vmul.f32 %v1302_v4, %v4073_v8 }
 0x3b3   : > { %v1317_v37 = vmul.f32 %v3338_v33, %v4091_v26  ;;  %v1319_v38 = vmul.f32 %v1303_v32, %v4059_v2  ;;  %v1333_v39 = vmul.f32 %v1303_v32, %v4073_v8 }
 0x3b4   : > { %v1322_v40 = vmul.f32 %v1316_v34, %v4067_v5  ;;  %v1336_v41 = vmul.f32 %v1316_v34, %v4079_v11 }
 0x3b5   : > { %v1323_v42 = vmul.f32 %v1317_v37, %v4067_v5  ;;  %v1337_v43 = vmul.f32 %v1317_v37, %v4079_v11 }
 0x3b6   : > { %v1324_v44 = vadd.f32 %v1322_v40, %v1318_v35  ;;  %v1338_v45 = vadd.f32 %v1336_v41, %v1332_v36 }
 0x3b7   : > { %v1325_v46 = vadd.f32 %v1323_v42, %v1319_v38  ;;  %v1339_v47 = vadd.f32 %v1337_v43, %v1333_v39 }
 0x3b8   : > { %v1326_v49 = vadd.f32 1.0, %v1324_v44  ;;  %v1340_v50 = vadd.f32 1.0, %v1338_v45 }
 0x3b9   : > { %v1327_v52 = vadd.f32 1.0, %v1325_v46  ;;  %v1341_v53 = vadd.f32 1.0, %v1339_v47 }
 0x3ba   : > { %3339 = vrcp.f32 %v1326_v49 }
 0x3bb   : > { %3341 = vrcp.f32 %v1327_v52 }
 0x3bc   : > { %3343 = vrcp.f32 %v1340_v50 }
 0x3bd   : > { %3345 = vrcp.f32 %v1341_v53 }
 0x3c7   : > { %v3340_v55 = vpop.eup %3339 }
 0x3c8   : > { %v3342_v56 = vpop.eup %3341  ;;  %v1330_v57 = vmul.f32 %v4325_v48, %v3340_v55 }
 0x3c9   : > { %v3344_v58 = vpop.eup %3343  ;;  %v1331_v59 = vmul.f32 %v4329_v51, %v3342_v56 }
 0x3ca   : > { %v3346_v60 = vpop.eup %3345  ;;  %v1344_v61 = vmul.f32 %v4333_v54, %v3344_v58  ;;  %v1346_v62 = vmul.f32 %v1330_v57, %v4059_v2  ;;  %v1360_v63 = vmul.f32 %v1330_v57, %v4067_v5  ;;  %v4555_v57 = vld [vmem:[%s4039_s27 + $0x18] sm:$0xff] }
 0x3cb   : > { %v1345_v7 = vmul.f32 %v4303_v6, %v3346_v60  ;;  %v1347_v9 = vmul.f32 %v1331_v59, %v4059_v2  ;;  %v1361_v10 = vmul.f32 %v1331_v59, %v4067_v5 }
 0x3cc   : > { %v1350_v0 = vmul.f32 %v1344_v61, %v4073_v8  ;;  %v1364_v12 = vmul.f32 %v1344_v61, %v4079_v11 }
 0x3cd   : > { %v1351_v1 = vmul.f32 %v1345_v7, %v4073_v8  ;;  %v1365_v3 = vmul.f32 %v1345_v7, %v4079_v11 }
 0x3ce   : > { %v1352_v13 = vadd.f32 %v1350_v0, %v1346_v62  ;;  %v1366_v14 = vadd.f32 %v1364_v12, %v1360_v63 }
 0x3cf   : > { %v1353_v15 = vadd.f32 %v1351_v1, %v1347_v9  ;;  %v1367_v16 = vadd.f32 %v1365_v3, %v1361_v10 }
 0x3d0   : > { %v1354_v17 = vadd.f32 1.0, %v1352_v13  ;;  %v1368_v18 = vadd.f32 1.0, %v1366_v14 }
 0x3d1   : > { %v1355_v19 = vadd.f32 1.0, %v1353_v15  ;;  %v1369_v6 = vadd.f32 1.0, %v1367_v16 }
 0x3d2   : > { %3347 = vrcp.f32 %v1354_v17 }
 0x3d3   : > { %3349 = vrcp.f32 %v1355_v19 }
 0x3d4   : > { %3351 = vrcp.f32 %v1368_v18 }
 0x3d5   : > { %3353 = vrcp.f32 %v1369_v6 }
 0x3df   : > { %v3348_v20 = vpop.eup %3347 }
 0x3e0   : > { %v3350_v21 = vpop.eup %3349  ;;  %v1358_v22 = vmul.f32 %v3348_v20, %v4089_v24 }
 0x3e1   : > { %v3352_v23 = vpop.eup %3351  ;;  %v1359_v25 = vmul.f32 %v3350_v21, %v4089_v24 }
 0x3e2   : > { %v3354_v27 = vpop.eup %3353  ;;  %v1372_v28 = vmul.f32 %v3352_v23, %v4091_v26  ;;  %v1374_v29 = vmul.f32 %v1358_v22, %v4059_v2  ;;  %v1388_v30 = vmul.f32 %v1358_v22, %v4073_v8 }
 0x3e3   : > { %v1373_v4 = vmul.f32 %v3354_v27, %v4091_v26  ;;  %v1375_v31 = vmul.f32 %v1359_v25, %v4059_v2  ;;  %v1389_v32 = vmul.f32 %v1359_v25, %v4073_v8 }
 0x3e4   : > { %v1378_v33 = vmul.f32 %v1372_v28, %v4067_v5  ;;  %v1392_v34 = vmul.f32 %v1372_v28, %v4079_v11 }
 0x3e5   : > { %v1379_v35 = vmul.f32 %v1373_v4, %v4067_v5  ;;  %v1393_v36 = vmul.f32 %v1373_v4, %v4079_v11 }
 0x3e6   : > { %v1380_v37 = vadd.f32 %v1378_v33, %v1374_v29  ;;  %v1394_v38 = vadd.f32 %v1392_v34, %v1388_v30 }
 0x3e7   : > { %v1381_v39 = vadd.f32 %v1379_v35, %v1375_v31  ;;  %v1395_v40 = vadd.f32 %v1393_v36, %v1389_v32 }
 0x3e8   : > { %v1382_v41 = vadd.f32 1.0, %v1380_v37  ;;  %v1396_v42 = vadd.f32 1.0, %v1394_v38  ;;  %v4577_v38 = vld [vmem:[%s4039_s27] sm:$0xff] }
 0x3e9   : > { %v1383_v43 = vadd.f32 1.0, %v1381_v39  ;;  %v1397_v44 = vadd.f32 1.0, %v1395_v40 }
 0x3ea   : > { %3355 = vrcp.f32 %v1382_v41  ;;  %v4581_v41 = vld [vmem:[%s4039_s27 + $0x8] sm:$0xff] }
 0x3eb   : > { %3357 = vrcp.f32 %v1383_v43 }
 0x3ec   : > { %3359 = vrcp.f32 %v1396_v42 }
 0x3ed   : > { %3361 = vrcp.f32 %v1397_v44  ;;  %v4585_v44 = vld [vmem:[%s4039_s27 + $0x10] sm:$0xff] }
 0x3f7   : > { %v3356_v45 = vpop.eup %3355 }
 0x3f8   : > { %v3358_v46 = vpop.eup %3357  ;;  %v1386_v47 = vmul.f32 %v4325_v48, %v3356_v45 }
 0x3f9   : > { %v3360_v49 = vpop.eup %3359  ;;  %v1387_v50 = vmul.f32 %v4329_v51, %v3358_v46 }
 0x3fa   : > { %v3362_v52 = vpop.eup %3361  ;;  %v1400_v53 = vmul.f32 %v4333_v54, %v3360_v49  ;;  %v1402_v55 = vmul.f32 %v1386_v47, %v4059_v2  ;;  %v1416_v56 = vmul.f32 %v1386_v47, %v4067_v5 }
 0x3fb   : > { %v1401_v58 = vmul.f32 %v4555_v57, %v3362_v52  ;;  %v1403_v59 = vmul.f32 %v1387_v50, %v4059_v2  ;;  %v1417_v60 = vmul.f32 %v1387_v50, %v4067_v5 }
 0x3fc   : > { %v1406_v48 = vmul.f32 %v1400_v53, %v4073_v8  ;;  %v1420_v61 = vmul.f32 %v1400_v53, %v4079_v11 }
 0x3fd   : > { %v1407_v51 = vmul.f32 %v1401_v58, %v4073_v8  ;;  %v1421_v54 = vmul.f32 %v1401_v58, %v4079_v11 }
 0x3fe   : > { %v1408_v62 = vadd.f32 %v1406_v48, %v1402_v55  ;;  %v1422_v63 = vadd.f32 %v1420_v61, %v1416_v56 }
 0x3ff   : > { %v1409_v7 = vadd.f32 %v1407_v51, %v1403_v59  ;;  %v1423_v9 = vadd.f32 %v1421_v54, %v1417_v60 }
 0x400   : > { %v1410_v10 = vadd.f32 1.0, %v1408_v62  ;;  %v1424_v0 = vadd.f32 1.0, %v1422_v63 }
 0x401   : > { %v1411_v12 = vadd.f32 1.0, %v1409_v7  ;;  %v1425_v1 = vadd.f32 1.0, %v1423_v9 }
 0x402   : > { %3363 = vrcp.f32 %v1410_v10 }
 0x403   : > { %3365 = vrcp.f32 %v1411_v12 }
 0x404   : > { %3367 = vrcp.f32 %v1424_v0 }
 0x405   : > { %3369 = vrcp.f32 %v1425_v1 }
 0x40f   : > { %v3364_v3 = vpop.eup %3363 }
 0x410   : > { %v3366_v13 = vpop.eup %3365  ;;  %v1414_v14 = vmul.f32 %v3364_v3, %v4089_v24 }
 0x411   : > { %v3368_v15 = vpop.eup %3367  ;;  %v1415_v16 = vmul.f32 %v3366_v13, %v4089_v24 }
 0x412   : > { %v3370_v17 = vpop.eup %3369  ;;  %v1428_v18 = vmul.f32 %v3368_v15, %v4091_v26  ;;  %v1430_v19 = vmul.f32 %v1414_v14, %v4059_v2  ;;  %v1444_v6 = vmul.f32 %v1414_v14, %v4073_v8 }
 0x413   : > { %v1429_v20 = vmul.f32 %v3370_v17, %v4091_v26  ;;  %v1431_v21 = vmul.f32 %v1415_v16, %v4059_v2  ;;  %v1445_v22 = vmul.f32 %v1415_v16, %v4073_v8 }
 0x414   : > { %v1434_v23 = vmul.f32 %v1428_v18, %v4067_v5  ;;  %v1448_v25 = vmul.f32 %v1428_v18, %v4079_v11 }
 0x415   : > { %v1435_v27 = vmul.f32 %v1429_v20, %v4067_v5  ;;  %v1449_v28 = vmul.f32 %v1429_v20, %v4079_v11 }
 0x416   : > { %v1436_v29 = vadd.f32 %v1434_v23, %v1430_v19  ;;  %v1450_v30 = vadd.f32 %v1448_v25, %v1444_v6 }
 0x417   : > { %v1437_v4 = vadd.f32 %v1435_v27, %v1431_v21  ;;  %v1451_v31 = vadd.f32 %v1449_v28, %v1445_v22 }
 0x418   : > { %v1438_v32 = vadd.f32 1.0, %v1436_v29  ;;  %v1452_v33 = vadd.f32 1.0, %v1450_v30 }
 0x419   : > { %v1439_v34 = vadd.f32 1.0, %v1437_v4  ;;  %v1453_v35 = vadd.f32 1.0, %v1451_v31 }
 0x41a   : > { %3371 = vrcp.f32 %v1438_v32 }
 0x41b   : > { %3373 = vrcp.f32 %v1439_v34 }
 0x41c   : > { %3375 = vrcp.f32 %v1452_v33 }
 0x41d   : > { %3377 = vrcp.f32 %v1453_v35 }
 0x427   : > { %v3372_v36 = vpop.eup %3371 }
 0x428   : > { %v3374_v37 = vpop.eup %3373  ;;  %v1442_v39 = vmul.f32 %v4577_v38, %v3372_v36 }
 0x429   : > { %v3376_v40 = vpop.eup %3375  ;;  %v1443_v42 = vmul.f32 %v4581_v41, %v3374_v37 }
 0x42a   : > { %v3378_v43 = vpop.eup %3377  ;;  %v1456_v45 = vmul.f32 %v4585_v44, %v3376_v40  ;;  %v1458_v46 = vmul.f32 %v1442_v39, %v4059_v2  ;;  %v1472_v47 = vmul.f32 %v1442_v39, %v4067_v5 }
 0x42b   : > { %v1457_v49 = vmul.f32 %v4555_v57, %v3378_v43  ;;  %v1459_v50 = vmul.f32 %v1443_v42, %v4059_v2  ;;  %v1473_v52 = vmul.f32 %v1443_v42, %v4067_v5 }
 0x42c   : > { %v1462_v53 = vmul.f32 %v1456_v45, %v4073_v8  ;;  %v1476_v55 = vmul.f32 %v1456_v45, %v4079_v11 }
 0x42d   : > { %v1463_v56 = vmul.f32 %v1457_v49, %v4073_v8  ;;  %v1477_v58 = vmul.f32 %v1457_v49, %v4079_v11 }
 0x42e   : > { %v1464_v59 = vadd.f32 %v1462_v53, %v1458_v46  ;;  %v1478_v60 = vadd.f32 %v1476_v55, %v1472_v47 }
 0x42f   : > { %v1465_v48 = vadd.f32 %v1463_v56, %v1459_v50  ;;  %v1479_v61 = vadd.f32 %v1477_v58, %v1473_v52 }
 0x430   : > { %v1466_v51 = vadd.f32 1.0, %v1464_v59  ;;  %v1480_v54 = vadd.f32 1.0, %v1478_v60 }
 0x431   : > { %v1467_v62 = vadd.f32 1.0, %v1465_v48  ;;  %v1481_v63 = vadd.f32 1.0, %v1479_v61 }
 0x432   : > { %3379 = vrcp.f32 %v1466_v51 }
 0x433   : > { %3381 = vrcp.f32 %v1467_v62 }
 0x434   : > { %3383 = vrcp.f32 %v1480_v54 }
 0x435   : > { %3385 = vrcp.f32 %v1481_v63 }
 0x43f   : > { %v3380_v7 = vpop.eup %3379 }
 0x440   : > { %v3382_v9 = vpop.eup %3381  ;;  %v1470_v10 = vmul.f32 %v3380_v7, %v4089_v24 }
 0x441   : > { %v3384_v0 = vpop.eup %3383  ;;  %v1471_v12 = vmul.f32 %v3382_v9, %v4089_v24 }
 0x442   : > { %v3386_v1 = vpop.eup %3385  ;;  %v1484_v3 = vmul.f32 %v3384_v0, %v4091_v26  ;;  %v1486_v13 = vmul.f32 %v1470_v10, %v4059_v2  ;;  %v1500_v14 = vmul.f32 %v1470_v10, %v4073_v8 }
 0x443   : > { %v1485_v15 = vmul.f32 %v3386_v1, %v4091_v26  ;;  %v1487_v16 = vmul.f32 %v1471_v12, %v4059_v2  ;;  %v1501_v17 = vmul.f32 %v1471_v12, %v4073_v8 }
 0x444   : > { %v1490_v18 = vmul.f32 %v1484_v3, %v4067_v5  ;;  %v1504_v19 = vmul.f32 %v1484_v3, %v4079_v11 }
 0x445   : > { %v1491_v6 = vmul.f32 %v1485_v15, %v4067_v5  ;;  %v1505_v20 = vmul.f32 %v1485_v15, %v4079_v11 }
 0x446   : > { %v1492_v21 = vadd.f32 %v1490_v18, %v1486_v13  ;;  %v1506_v22 = vadd.f32 %v1504_v19, %v1500_v14 }
 0x447   : > { %v1493_v23 = vadd.f32 %v1491_v6, %v1487_v16  ;;  %v1507_v25 = vadd.f32 %v1505_v20, %v1501_v17 }
 0x448   : > { %v1494_v27 = vadd.f32 1.0, %v1492_v21  ;;  %v1508_v28 = vadd.f32 1.0, %v1506_v22 }
 0x449   : > { %v1495_v29 = vadd.f32 1.0, %v1493_v23  ;;  %v1509_v30 = vadd.f32 1.0, %v1507_v25 }
 0x44a   : > { %3387 = vrcp.f32 %v1494_v27 }
 0x44b   : > { %3389 = vrcp.f32 %v1495_v29 }
 0x44c   : > { %3391 = vrcp.f32 %v1508_v28 }
 0x44d   : > { %3393 = vrcp.f32 %v1509_v30 }
 0x457   : > { %v3388_v4 = vpop.eup %3387 }
 0x458   : > { %v3390_v31 = vpop.eup %3389  ;;  %v1498_v32 = vmul.f32 %v4577_v38, %v3388_v4 }
 0x459   : > { %v3392_v33 = vpop.eup %3391  ;;  %v1499_v34 = vmul.f32 %v4581_v41, %v3390_v31 }
 0x45a   : > { %v3394_v35 = vpop.eup %3393  ;;  %v1512_v36 = vmul.f32 %v4585_v44, %v3392_v33  ;;  %v1514_v37 = vmul.f32 %v1498_v32, %v4059_v2  ;;  %v1528_v39 = vmul.f32 %v1498_v32, %v4067_v5 }
 0x45b   : > { %v1513_v40 = vmul.f32 %v4555_v57, %v3394_v35  ;;  %v1515_v42 = vmul.f32 %v1499_v34, %v4059_v2  ;;  %v1529_v43 = vmul.f32 %v1499_v34, %v4067_v5 }
 0x45c   : > { %v1518_v45 = vmul.f32 %v1512_v36, %v4073_v8  ;;  %v1532_v46 = vmul.f32 %v1512_v36, %v4079_v11 }
 0x45d   : > { %v1519_v47 = vmul.f32 %v1513_v40, %v4073_v8  ;;  %v1533_v49 = vmul.f32 %v1513_v40, %v4079_v11 }
 0x45e   : > { %v1520_v50 = vadd.f32 %v1518_v45, %v1514_v37  ;;  %v1534_v52 = vadd.f32 %v1532_v46, %v1528_v39 }
 0x45f   : > { %v1521_v53 = vadd.f32 %v1519_v47, %v1515_v42  ;;  %v1535_v55 = vadd.f32 %v1533_v49, %v1529_v43 }
 0x460   : > { %v1522_v56 = vadd.f32 1.0, %v1520_v50  ;;  %v1536_v58 = vadd.f32 1.0, %v1534_v52 }
 0x461   : > { %v1523_v59 = vadd.f32 1.0, %v1521_v53  ;;  %v1537_v60 = vadd.f32 1.0, %v1535_v55 }
 0x462   : > { %3395 = vrcp.f32 %v1522_v56 }
 0x463   : > { %3397 = vrcp.f32 %v1523_v59 }
 0x464   : > { %3399 = vrcp.f32 %v1536_v58 }
 0x465   : > { %3401 = vrcp.f32 %v1537_v60 }
 0x46f   : > { %v3396_v48 = vpop.eup %3395 }
 0x470   : > { %v3398_v61 = vpop.eup %3397  ;;  %v1526_v51 = vmul.f32 %v3396_v48, %v4089_v24 }
 0x471   : > { %v3400_v54 = vpop.eup %3399  ;;  %v1527_v62 = vmul.f32 %v3398_v61, %v4089_v24 }
 0x472   : > { %v3402_v63 = vpop.eup %3401  ;;  %v1540_v7 = vmul.f32 %v3400_v54, %v4091_v26  ;;  %v1542_v9 = vmul.f32 %v1526_v51, %v4059_v2  ;;  %v1556_v10 = vmul.f32 %v1526_v51, %v4073_v8 }
 0x473   : > { %v1541_v0 = vmul.f32 %v3402_v63, %v4091_v26  ;;  %v1543_v12 = vmul.f32 %v1527_v62, %v4059_v2  ;;  %v1557_v1 = vmul.f32 %v1527_v62, %v4073_v8 }
 0x474   : > { %v1546_v3 = vmul.f32 %v1540_v7, %v4067_v5  ;;  %v1560_v13 = vmul.f32 %v1540_v7, %v4079_v11 }
 0x475   : > { %v1547_v14 = vmul.f32 %v1541_v0, %v4067_v5  ;;  %v1561_v15 = vmul.f32 %v1541_v0, %v4079_v11 }
 0x476   : > { %v1548_v16 = vadd.f32 %v1546_v3, %v1542_v9  ;;  %v1562_v17 = vadd.f32 %v1560_v13, %v1556_v10 }
 0x477   : > { %v1549_v18 = vadd.f32 %v1547_v14, %v1543_v12  ;;  %v1563_v19 = vadd.f32 %v1561_v15, %v1557_v1 }
 0x478   : > { %v1550_v6 = vadd.f32 1.0, %v1548_v16  ;;  %v1564_v20 = vadd.f32 1.0, %v1562_v17 }
 0x479   : > { %v1551_v21 = vadd.f32 1.0, %v1549_v18  ;;  %v1565_v22 = vadd.f32 1.0, %v1563_v19 }
 0x47a   : > { %3403 = vrcp.f32 %v1550_v6 }
 0x47b   : > { %3405 = vrcp.f32 %v1551_v21 }
 0x47c   : > { %3407 = vrcp.f32 %v1564_v20 }
 0x47d   : > { %3409 = vrcp.f32 %v1565_v22 }
 0x487   : > { %v3404_v23 = vpop.eup %3403 }
 0x488   : > { %v3406_v25 = vpop.eup %3405  ;;  %v1554_v27 = vmul.f32 %v4577_v38, %v3404_v23 }
 0x489   : > { %v3408_v28 = vpop.eup %3407  ;;  %v1555_v29 = vmul.f32 %v4581_v41, %v3406_v25 }
 0x48a   : > { %v3410_v30 = vpop.eup %3409  ;;  %v1568_v4 = vmul.f32 %v4585_v44, %v3408_v28  ;;  %v1570_v31 = vmul.f32 %v1554_v27, %v4059_v2  ;;  %v1584_v32 = vmul.f32 %v1554_v27, %v4067_v5 }
 0x48b   : > { %v1569_v33 = vmul.f32 %v4555_v57, %v3410_v30  ;;  %v1571_v34 = vmul.f32 %v1555_v29, %v4059_v2  ;;  %v1585_v35 = vmul.f32 %v1555_v29, %v4067_v5 }
 0x48c   : > { %v1574_v36 = vmul.f32 %v1568_v4, %v4073_v8  ;;  %v1588_v37 = vmul.f32 %v1568_v4, %v4079_v11 }
 0x48d   : > { %v1575_v39 = vmul.f32 %v1569_v33, %v4073_v8  ;;  %v1589_v40 = vmul.f32 %v1569_v33, %v4079_v11 }
 0x48e   : > { %v1576_v42 = vadd.f32 %v1574_v36, %v1570_v31  ;;  %v1590_v43 = vadd.f32 %v1588_v37, %v1584_v32 }
 0x48f   : > { %v1577_v45 = vadd.f32 %v1575_v39, %v1571_v34  ;;  %v1591_v46 = vadd.f32 %v1589_v40, %v1585_v35 }
 0x490   : > { %v1578_v47 = vadd.f32 1.0, %v1576_v42  ;;  %v1592_v49 = vadd.f32 1.0, %v1590_v43 }
 0x491   : > { %v1579_v50 = vadd.f32 1.0, %v1577_v45  ;;  %v1593_v52 = vadd.f32 1.0, %v1591_v46 }
 0x492   : > { %3411 = vrcp.f32 %v1578_v47 }
 0x493   : > { %3413 = vrcp.f32 %v1579_v50 }
 0x494   : > { %3415 = vrcp.f32 %v1592_v49 }
 0x495   : > { %3417 = vrcp.f32 %v1593_v52 }
 0x49f   : > { %v3412_v53 = vpop.eup %3411 }
 0x4a0   : > { %v3414_v55 = vpop.eup %3413  ;;  %v1582_v56 = vmul.f32 %v3412_v53, %v4089_v24 }
 0x4a1   : > { %v3416_v58 = vpop.eup %3415  ;;  %v1583_v59 = vmul.f32 %v3414_v55, %v4089_v24 }
 0x4a2   : > { %v3418_v60 = vpop.eup %3417  ;;  %v1596_v48 = vmul.f32 %v3416_v58, %v4091_v26  ;;  %v1598_v61 = vmul.f32 %v1582_v56, %v4059_v2  ;;  %v1612_v51 = vmul.f32 %v1582_v56, %v4073_v8 }
 0x4a3   : > { %v1597_v54 = vmul.f32 %v3418_v60, %v4091_v26  ;;  %v1599_v62 = vmul.f32 %v1583_v59, %v4059_v2  ;;  %v1613_v63 = vmul.f32 %v1583_v59, %v4073_v8 }
 0x4a4   : > { %v1602_v7 = vmul.f32 %v1596_v48, %v4067_v5  ;;  %v1616_v9 = vmul.f32 %v1596_v48, %v4079_v11 }
 0x4a5   : > { %v1603_v10 = vmul.f32 %v1597_v54, %v4067_v5  ;;  %v1617_v0 = vmul.f32 %v1597_v54, %v4079_v11 }
 0x4a6   : > { %v1604_v12 = vadd.f32 %v1602_v7, %v1598_v61  ;;  %v1618_v1 = vadd.f32 %v1616_v9, %v1612_v51 }
 0x4a7   : > { %v1605_v3 = vadd.f32 %v1603_v10, %v1599_v62  ;;  %v1619_v13 = vadd.f32 %v1617_v0, %v1613_v63 }
 0x4a8   : > { %v1606_v14 = vadd.f32 1.0, %v1604_v12  ;;  %v1620_v15 = vadd.f32 1.0, %v1618_v1 }
 0x4a9   : > { %v1607_v16 = vadd.f32 1.0, %v1605_v3  ;;  %v1621_v17 = vadd.f32 1.0, %v1619_v13 }
 0x4aa   : > { %3419 = vrcp.f32 %v1606_v14 }
 0x4ab   : > { %3421 = vrcp.f32 %v1607_v16 }
 0x4ac   : > { %3423 = vrcp.f32 %v1620_v15 }
 0x4ad   : > { %3425 = vrcp.f32 %v1621_v17 }
 0x4b7   : > { %v3420_v18 = vpop.eup %3419 }
 0x4b8   : > { %v3422_v19 = vpop.eup %3421  ;;  %v1610_v6 = vmul.f32 %v4577_v38, %v3420_v18 }
 0x4b9   : > { %v3424_v20 = vpop.eup %3423  ;;  %v1611_v21 = vmul.f32 %v4581_v41, %v3422_v19 }
 0x4ba   : > { %v3426_v22 = vpop.eup %3425  ;;  %v1624_v23 = vmul.f32 %v4585_v44, %v3424_v20  ;;  %v1626_v25 = vmul.f32 %v1610_v6, %v4059_v2  ;;  %v1640_v27 = vmul.f32 %v1610_v6, %v4067_v5 }
 0x4bb   : > { %v1625_v28 = vmul.f32 %v4555_v57, %v3426_v22  ;;  %v1627_v29 = vmul.f32 %v1611_v21, %v4059_v2  ;;  %v1641_v30 = vmul.f32 %v1611_v21, %v4067_v5 }
 0x4bc   : > { %v1630_v4 = vmul.f32 %v1624_v23, %v4073_v8  ;;  %v1644_v31 = vmul.f32 %v1624_v23, %v4079_v11 }
 0x4bd   : > { %v1631_v32 = vmul.f32 %v1625_v28, %v4073_v8  ;;  %v1645_v33 = vmul.f32 %v1625_v28, %v4079_v11 }
 0x4be   : > { %v1632_v34 = vadd.f32 %v1630_v4, %v1626_v25  ;;  %v1646_v35 = vadd.f32 %v1644_v31, %v1640_v27 }
 0x4bf   : > { %v1633_v36 = vadd.f32 %v1631_v32, %v1627_v29  ;;  %v1647_v37 = vadd.f32 %v1645_v33, %v1641_v30 }
 0x4c0   : > { %v1634_v39 = vadd.f32 1.0, %v1632_v34  ;;  %v1648_v40 = vadd.f32 1.0, %v1646_v35 }
 0x4c1   : > { %v1635_v42 = vadd.f32 1.0, %v1633_v36  ;;  %v1649_v43 = vadd.f32 1.0, %v1647_v37 }
 0x4c2   : > { %3427 = vrcp.f32 %v1634_v39 }
 0x4c3   : > { %3429 = vrcp.f32 %v1635_v42 }
 0x4c4   : > { %3431 = vrcp.f32 %v1648_v40 }
 0x4c5   : > { %3433 = vrcp.f32 %v1649_v43 }
 0x4cf   : > { %v3428_v45 = vpop.eup %3427 }
 0x4d0   : > { %v3430_v46 = vpop.eup %3429  ;;  %v1638_v47 = vmul.f32 %v3428_v45, %v4089_v24 }
 0x4d1   : > { %v3432_v49 = vpop.eup %3431  ;;  %v1639_v50 = vmul.f32 %v3430_v46, %v4089_v24 }
 0x4d2   : > { %v3434_v52 = vpop.eup %3433  ;;  %v1652_v53 = vmul.f32 %v3432_v49, %v4091_v26  ;;  %v1654_v55 = vmul.f32 %v1638_v47, %v4059_v2  ;;  %v1668_v56 = vmul.f32 %v1638_v47, %v4073_v8 }
 0x4d3   : > { %v1653_v58 = vmul.f32 %v3434_v52, %v4091_v26  ;;  %v1655_v59 = vmul.f32 %v1639_v50, %v4059_v2  ;;  %v1669_v60 = vmul.f32 %v1639_v50, %v4073_v8 }
 0x4d4   : > { %v1658_v48 = vmul.f32 %v1652_v53, %v4067_v5  ;;  %v1672_v61 = vmul.f32 %v1652_v53, %v4079_v11 }
 0x4d5   : > { %v1659_v51 = vmul.f32 %v1653_v58, %v4067_v5  ;;  %v1673_v54 = vmul.f32 %v1653_v58, %v4079_v11 }
 0x4d6   : > { %v1660_v62 = vadd.f32 %v1658_v48, %v1654_v55  ;;  %v1674_v63 = vadd.f32 %v1672_v61, %v1668_v56 }
 0x4d7   : > { %v1661_v7 = vadd.f32 %v1659_v51, %v1655_v59  ;;  %v1675_v9 = vadd.f32 %v1673_v54, %v1669_v60 }
 0x4d8   : > { %v1662_v10 = vadd.f32 1.0, %v1660_v62  ;;  %v1676_v0 = vadd.f32 1.0, %v1674_v63 }
 0x4d9   : > { %v1663_v12 = vadd.f32 1.0, %v1661_v7  ;;  %v1677_v1 = vadd.f32 1.0, %v1675_v9 }
 0x4da   : > { %3435 = vrcp.f32 %v1662_v10 }
 0x4db   : > { %3437 = vrcp.f32 %v1663_v12 }
 0x4dc   : > { %3439 = vrcp.f32 %v1676_v0 }
 0x4dd   : > { %3441 = vrcp.f32 %v1677_v1 }
 0x4e7   : > { %v3436_v3 = vpop.eup %3435 }
 0x4e8   : > { %v3438_v13 = vpop.eup %3437  ;;  %v1666_v14 = vmul.f32 %v4577_v38, %v3436_v3 }
 0x4e9   : > { %v3440_v15 = vpop.eup %3439  ;;  %v1667_v16 = vmul.f32 %v4581_v41, %v3438_v13 }
 0x4ea   : > { %v3442_v17 = vpop.eup %3441  ;;  %v1680_v18 = vmul.f32 %v4585_v44, %v3440_v15  ;;  %v1682_v19 = vmul.f32 %v1666_v14, %v4059_v2  ;;  %v1696_v6 = vmul.f32 %v1666_v14, %v4067_v5 }
 0x4eb   : > { %v1681_v20 = vmul.f32 %v4555_v57, %v3442_v17  ;;  %v1683_v21 = vmul.f32 %v1667_v16, %v4059_v2  ;;  %v1697_v22 = vmul.f32 %v1667_v16, %v4067_v5 }
 0x4ec   : > { %v1686_v23 = vmul.f32 %v1680_v18, %v4073_v8  ;;  %v1700_v25 = vmul.f32 %v1680_v18, %v4079_v11 }
 0x4ed   : > { %v1687_v27 = vmul.f32 %v1681_v20, %v4073_v8  ;;  %v1701_v28 = vmul.f32 %v1681_v20, %v4079_v11 }
 0x4ee   : > { %v1688_v29 = vadd.f32 %v1686_v23, %v1682_v19  ;;  %v1702_v30 = vadd.f32 %v1700_v25, %v1696_v6 }
 0x4ef   : > { %v1689_v4 = vadd.f32 %v1687_v27, %v1683_v21  ;;  %v1703_v31 = vadd.f32 %v1701_v28, %v1697_v22 }
 0x4f0   : > { %v1690_v32 = vadd.f32 1.0, %v1688_v29  ;;  %v1704_v33 = vadd.f32 1.0, %v1702_v30 }
 0x4f1   : > { %v1691_v34 = vadd.f32 1.0, %v1689_v4  ;;  %v1705_v35 = vadd.f32 1.0, %v1703_v31 }
 0x4f2   : > { %3443 = vrcp.f32 %v1690_v32 }
 0x4f3   : > { %3445 = vrcp.f32 %v1691_v34 }
 0x4f4   : > { %3447 = vrcp.f32 %v1704_v33 }
 0x4f5   : > { %3449 = vrcp.f32 %v1705_v35 }
 0x4ff   : > { %v3444_v36 = vpop.eup %3443 }
 0x500   : > { %v3446_v37 = vpop.eup %3445  ;;  %v1694_v39 = vmul.f32 %v3444_v36, %v4089_v24 }
 0x501   : > { %v3448_v40 = vpop.eup %3447  ;;  %v1695_v42 = vmul.f32 %v3446_v37, %v4089_v24 }
 0x502   : > { %v3450_v43 = vpop.eup %3449  ;;  %v1708_v45 = vmul.f32 %v3448_v40, %v4091_v26  ;;  %v1710_v46 = vmul.f32 %v1694_v39, %v4059_v2  ;;  %v1724_v47 = vmul.f32 %v1694_v39, %v4073_v8 }
 0x503   : > { %v1709_v49 = vmul.f32 %v3450_v43, %v4091_v26  ;;  %v1711_v50 = vmul.f32 %v1695_v42, %v4059_v2  ;;  %v1725_v52 = vmul.f32 %v1695_v42, %v4073_v8 }
 0x504   : > { %v1714_v53 = vmul.f32 %v1708_v45, %v4067_v5  ;;  %v1728_v55 = vmul.f32 %v1708_v45, %v4079_v11 }
 0x505   : > { %v1715_v56 = vmul.f32 %v1709_v49, %v4067_v5  ;;  %v1729_v58 = vmul.f32 %v1709_v49, %v4079_v11 }
 0x506   : > { %v1716_v59 = vadd.f32 %v1714_v53, %v1710_v46  ;;  %v1730_v60 = vadd.f32 %v1728_v55, %v1724_v47 }
 0x507   : > { %v1717_v48 = vadd.f32 %v1715_v56, %v1711_v50  ;;  %v1731_v61 = vadd.f32 %v1729_v58, %v1725_v52 }
 0x508   : > { %v1718_v51 = vadd.f32 1.0, %v1716_v59  ;;  %v1732_v54 = vadd.f32 1.0, %v1730_v60 }
 0x509   : > { %v1719_v62 = vadd.f32 1.0, %v1717_v48  ;;  %v1733_v63 = vadd.f32 1.0, %v1731_v61 }
 0x50a   : > { %3451 = vrcp.f32 %v1718_v51 }
 0x50b   : > { %3453 = vrcp.f32 %v1719_v62 }
 0x50c   : > { %3455 = vrcp.f32 %v1732_v54 }
 0x50d   : > { %3457 = vrcp.f32 %v1733_v63 }
 0x517   : > { %v3452_v7 = vpop.eup %3451 }
 0x518   : > { %v3454_v9 = vpop.eup %3453  ;;  %v1722_v10 = vmul.f32 %v4577_v38, %v3452_v7 }
 0x519   : > { %v3456_v0 = vpop.eup %3455  ;;  %v1723_v12 = vmul.f32 %v4581_v41, %v3454_v9 }
 0x51a   : > { %v3458_v1 = vpop.eup %3457  ;;  %v1736_v3 = vmul.f32 %v4585_v44, %v3456_v0  ;;  %v1738_v13 = vmul.f32 %v1722_v10, %v4059_v2  ;;  %v1752_v14 = vmul.f32 %v1722_v10, %v4067_v5 }
 0x51b   : > { %v1737_v15 = vmul.f32 %v4555_v57, %v3458_v1  ;;  %v1739_v16 = vmul.f32 %v1723_v12, %v4059_v2  ;;  %v1753_v17 = vmul.f32 %v1723_v12, %v4067_v5 }
 0x51c   : > { %v1742_v18 = vmul.f32 %v1736_v3, %v4073_v8  ;;  %v1756_v19 = vmul.f32 %v1736_v3, %v4079_v11 }
 0x51d   : > { %v1743_v6 = vmul.f32 %v1737_v15, %v4073_v8  ;;  %v1757_v20 = vmul.f32 %v1737_v15, %v4079_v11 }
 0x51e   : > { %v1744_v21 = vadd.f32 %v1742_v18, %v1738_v13  ;;  %v1758_v22 = vadd.f32 %v1756_v19, %v1752_v14 }
 0x51f   : > { %v1745_v23 = vadd.f32 %v1743_v6, %v1739_v16  ;;  %v1759_v25 = vadd.f32 %v1757_v20, %v1753_v17 }
 0x520   : > { %v1746_v27 = vadd.f32 1.0, %v1744_v21  ;;  %v1760_v28 = vadd.f32 1.0, %v1758_v22 }
 0x521   : > { %v1747_v29 = vadd.f32 1.0, %v1745_v23  ;;  %v1761_v30 = vadd.f32 1.0, %v1759_v25 }
 0x522   : > { %3459 = vrcp.f32 %v1746_v27 }
 0x523   : > { %3461 = vrcp.f32 %v1747_v29 }
 0x524   : > { %3463 = vrcp.f32 %v1760_v28 }
 0x525   : > { %3465 = vrcp.f32 %v1761_v30 }
 0x52f   : > { %v3460_v4 = vpop.eup %3459 }
 0x530   : > { %v3462_v31 = vpop.eup %3461  ;;  %v1750_v32 = vmul.f32 %v3460_v4, %v4089_v24 }
 0x531   : > { %v3464_v33 = vpop.eup %3463  ;;  %v1751_v34 = vmul.f32 %v3462_v31, %v4089_v24 }
 0x532   : > { %v3466_v35 = vpop.eup %3465  ;;  %v1764_v36 = vmul.f32 %v3464_v33, %v4091_v26  ;;  %v1766_v37 = vmul.f32 %v1750_v32, %v4059_v2  ;;  %v1780_v39 = vmul.f32 %v1750_v32, %v4073_v8 }
 0x533   : > { %v1765_v40 = vmul.f32 %v3466_v35, %v4091_v26  ;;  %v1767_v42 = vmul.f32 %v1751_v34, %v4059_v2  ;;  %v1781_v43 = vmul.f32 %v1751_v34, %v4073_v8 }
 0x534   : > { %v1770_v45 = vmul.f32 %v1764_v36, %v4067_v5  ;;  %v1784_v46 = vmul.f32 %v1764_v36, %v4079_v11 }
 0x535   : > { %v1771_v47 = vmul.f32 %v1765_v40, %v4067_v5  ;;  %v1785_v49 = vmul.f32 %v1765_v40, %v4079_v11 }
 0x536   : > { %v1772_v50 = vadd.f32 %v1770_v45, %v1766_v37  ;;  %v1786_v52 = vadd.f32 %v1784_v46, %v1780_v39 }
 0x537   : > { %v1773_v53 = vadd.f32 %v1771_v47, %v1767_v42  ;;  %v1787_v55 = vadd.f32 %v1785_v49, %v1781_v43 }
 0x538   : > { %v1774_v56 = vadd.f32 1.0, %v1772_v50  ;;  %v1788_v58 = vadd.f32 1.0, %v1786_v52 }
 0x539   : > { %v1775_v59 = vadd.f32 1.0, %v1773_v53  ;;  %v1789_v60 = vadd.f32 1.0, %v1787_v55 }
 0x53a   : > { %3467 = vrcp.f32 %v1774_v56 }
 0x53b   : > { %3469 = vrcp.f32 %v1775_v59 }
 0x53c   : > { %3471 = vrcp.f32 %v1788_v58 }
 0x53d   : > { %3473 = vrcp.f32 %v1789_v60 }
 0x547   : > { %v3468_v48 = vpop.eup %3467 }
 0x548   : > { %v3470_v61 = vpop.eup %3469  ;;  %v1778_v51 = vmul.f32 %v4577_v38, %v3468_v48 }
 0x549   : > { %v3472_v54 = vpop.eup %3471  ;;  %v1779_v62 = vmul.f32 %v4581_v41, %v3470_v61 }
 0x54a   : > { %v3474_v63 = vpop.eup %3473  ;;  %v1792_v7 = vmul.f32 %v4585_v44, %v3472_v54  ;;  %v1794_v9 = vmul.f32 %v1778_v51, %v4059_v2  ;;  %v1808_v10 = vmul.f32 %v1778_v51, %v4067_v5 }
 0x54b   : > { %v1793_v0 = vmul.f32 %v4555_v57, %v3474_v63  ;;  %v1795_v12 = vmul.f32 %v1779_v62, %v4059_v2  ;;  %v1809_v1 = vmul.f32 %v1779_v62, %v4067_v5 }
 0x54c   : > { %v1798_v3 = vmul.f32 %v1792_v7, %v4073_v8  ;;  %v1812_v13 = vmul.f32 %v1792_v7, %v4079_v11 }
 0x54d   : > { %v1799_v14 = vmul.f32 %v1793_v0, %v4073_v8  ;;  %v1813_v15 = vmul.f32 %v1793_v0, %v4079_v11 }
 0x54e   : > { %v1800_v16 = vadd.f32 %v1798_v3, %v1794_v9  ;;  %v1814_v17 = vadd.f32 %v1812_v13, %v1808_v10 }
 0x54f   : > { %v1801_v18 = vadd.f32 %v1799_v14, %v1795_v12  ;;  %v1815_v19 = vadd.f32 %v1813_v15, %v1809_v1 }
 0x550   : > { %v1802_v6 = vadd.f32 1.0, %v1800_v16  ;;  %v1816_v20 = vadd.f32 1.0, %v1814_v17 }
 0x551   : > { %v1803_v21 = vadd.f32 1.0, %v1801_v18  ;;  %v1817_v22 = vadd.f32 1.0, %v1815_v19 }
 0x552   : > { %3475 = vrcp.f32 %v1802_v6 }
 0x553   : > { %3477 = vrcp.f32 %v1803_v21 }
 0x554   : > { %3479 = vrcp.f32 %v1816_v20 }
 0x555   : > { %3481 = vrcp.f32 %v1817_v22 }
 0x55f   : > { %v3476_v23 = vpop.eup %3475 }
 0x560   : > { %v3478_v25 = vpop.eup %3477  ;;  %v1806_v27 = vmul.f32 %v3476_v23, %v4089_v24 }
 0x561   : > { %v3480_v28 = vpop.eup %3479  ;;  %v1807_v29 = vmul.f32 %v3478_v25, %v4089_v24 }
 0x562   : > { %v3482_v30 = vpop.eup %3481  ;;  %v1820_v4 = vmul.f32 %v3480_v28, %v4091_v26  ;;  %v1822_v31 = vmul.f32 %v1806_v27, %v4059_v2  ;;  %v1836_v32 = vmul.f32 %v1806_v27, %v4073_v8 }
 0x563   : > { %v1821_v33 = vmul.f32 %v3482_v30, %v4091_v26  ;;  %v1823_v34 = vmul.f32 %v1807_v29, %v4059_v2  ;;  %v1837_v35 = vmul.f32 %v1807_v29, %v4073_v8 }
 0x564   : > { %v1826_v36 = vmul.f32 %v1820_v4, %v4067_v5  ;;  %v1840_v37 = vmul.f32 %v1820_v4, %v4079_v11 }
 0x565   : > { %v1827_v39 = vmul.f32 %v1821_v33, %v4067_v5  ;;  %v1841_v40 = vmul.f32 %v1821_v33, %v4079_v11 }
 0x566   : > { %v1828_v42 = vadd.f32 %v1826_v36, %v1822_v31  ;;  %v1842_v43 = vadd.f32 %v1840_v37, %v1836_v32 }
 0x567   : > { %v1829_v45 = vadd.f32 %v1827_v39, %v1823_v34  ;;  %v1843_v46 = vadd.f32 %v1841_v40, %v1837_v35 }
 0x568   : > { %v1830_v47 = vadd.f32 1.0, %v1828_v42  ;;  %v1844_v49 = vadd.f32 1.0, %v1842_v43 }
 0x569   : > { %v1831_v50 = vadd.f32 1.0, %v1829_v45  ;;  %v1845_v52 = vadd.f32 1.0, %v1843_v46 }
 0x56a   : > { %3483 = vrcp.f32 %v1830_v47 }
 0x56b   : > { %3485 = vrcp.f32 %v1831_v50 }
 0x56c   : > { %3487 = vrcp.f32 %v1844_v49 }
 0x56d   : > { %3489 = vrcp.f32 %v1845_v52 }
 0x577   : > { %v3484_v53 = vpop.eup %3483 }
 0x578   : > { %v3486_v55 = vpop.eup %3485  ;;  %v1834_v56 = vmul.f32 %v4577_v38, %v3484_v53 }
 0x579   : > { %v3488_v58 = vpop.eup %3487  ;;  %v1835_v59 = vmul.f32 %v4581_v41, %v3486_v55 }
 0x57a   : > { %v3490_v60 = vpop.eup %3489  ;;  %v1848_v48 = vmul.f32 %v4585_v44, %v3488_v58  ;;  %v1850_v61 = vmul.f32 %v1834_v56, %v4059_v2  ;;  %v1864_v51 = vmul.f32 %v1834_v56, %v4067_v5 }
 0x57b   : > { %v1849_v54 = vmul.f32 %v4555_v57, %v3490_v60  ;;  %v1851_v62 = vmul.f32 %v1835_v59, %v4059_v2  ;;  %v1865_v63 = vmul.f32 %v1835_v59, %v4067_v5 }
 0x57c   : > { %v1854_v7 = vmul.f32 %v1848_v48, %v4073_v8  ;;  %v1868_v9 = vmul.f32 %v1848_v48, %v4079_v11 }
 0x57d   : > { %v1855_v10 = vmul.f32 %v1849_v54, %v4073_v8  ;;  %v1869_v0 = vmul.f32 %v1849_v54, %v4079_v11 }
 0x57e   : > { %v1856_v12 = vadd.f32 %v1854_v7, %v1850_v61  ;;  %v1870_v1 = vadd.f32 %v1868_v9, %v1864_v51 }
 0x57f   : > { %v1857_v3 = vadd.f32 %v1855_v10, %v1851_v62  ;;  %v1871_v13 = vadd.f32 %v1869_v0, %v1865_v63 }
 0x580   : > { %v1858_v14 = vadd.f32 1.0, %v1856_v12  ;;  %v1872_v15 = vadd.f32 1.0, %v1870_v1 }
 0x581   : > { %v1859_v16 = vadd.f32 1.0, %v1857_v3  ;;  %v1873_v17 = vadd.f32 1.0, %v1871_v13 }
 0x582   : > { %3491 = vrcp.f32 %v1858_v14 }
 0x583   : > { %3493 = vrcp.f32 %v1859_v16 }
 0x584   : > { %3495 = vrcp.f32 %v1872_v15 }
 0x585   : > { %3497 = vrcp.f32 %v1873_v17 }
 0x58f   : > { %v3492_v18 = vpop.eup %3491 }
 0x590   : > { %v3494_v19 = vpop.eup %3493  ;;  %v1862_v6 = vmul.f32 %v3492_v18, %v4089_v24 }
 0x591   : > { %v3496_v20 = vpop.eup %3495  ;;  %v1863_v21 = vmul.f32 %v3494_v19, %v4089_v24 }
 0x592   : > { %v3498_v22 = vpop.eup %3497  ;;  %v1876_v23 = vmul.f32 %v3496_v20, %v4091_v26  ;;  %v1878_v25 = vmul.f32 %v1862_v6, %v4059_v2  ;;  %v1892_v27 = vmul.f32 %v1862_v6, %v4073_v8 }
 0x593   : > { %v1877_v28 = vmul.f32 %v3498_v22, %v4091_v26  ;;  %v1879_v29 = vmul.f32 %v1863_v21, %v4059_v2  ;;  %v1893_v30 = vmul.f32 %v1863_v21, %v4073_v8 }
 0x594   : > { %v1882_v4 = vmul.f32 %v1876_v23, %v4067_v5  ;;  %v1896_v31 = vmul.f32 %v1876_v23, %v4079_v11 }
 0x595   : > { %v1883_v32 = vmul.f32 %v1877_v28, %v4067_v5  ;;  %v1897_v33 = vmul.f32 %v1877_v28, %v4079_v11 }
 0x596   : > { %v1884_v34 = vadd.f32 %v1882_v4, %v1878_v25  ;;  %v1898_v35 = vadd.f32 %v1896_v31, %v1892_v27 }
 0x597   : > { %v1885_v36 = vadd.f32 %v1883_v32, %v1879_v29  ;;  %v1899_v37 = vadd.f32 %v1897_v33, %v1893_v30 }
 0x598   : > { %v1886_v39 = vadd.f32 1.0, %v1884_v34  ;;  %v1900_v40 = vadd.f32 1.0, %v1898_v35 }
 0x599   : > { %v1887_v42 = vadd.f32 1.0, %v1885_v36  ;;  %v1901_v43 = vadd.f32 1.0, %v1899_v37 }
 0x59a   : > { %3499 = vrcp.f32 %v1886_v39 }
 0x59b   : > { %3501 = vrcp.f32 %v1887_v42 }
 0x59c   : > { %3503 = vrcp.f32 %v1900_v40 }
 0x59d   : > { %3505 = vrcp.f32 %v1901_v43 }
 0x5a7   : > { %v3500_v45 = vpop.eup %3499 }
 0x5a8   : > { %v3502_v46 = vpop.eup %3501  ;;  %v1890_v47 = vmul.f32 %v4577_v38, %v3500_v45 }
 0x5a9   : > { %v3504_v49 = vpop.eup %3503  ;;  %v1891_v50 = vmul.f32 %v4581_v41, %v3502_v46 }
 0x5aa   : > { %v3506_v52 = vpop.eup %3505  ;;  %v1904_v53 = vmul.f32 %v4585_v44, %v3504_v49  ;;  %v1906_v55 = vmul.f32 %v1890_v47, %v4059_v2  ;;  %v1920_v56 = vmul.f32 %v1890_v47, %v4067_v5  ;;  %v4807_v47 = vld [vmem:[%s4039_s27 + $0x18] sm:$0xff] }
 0x5ab   : > { %v1905_v58 = vmul.f32 %v4555_v57, %v3506_v52  ;;  %v1907_v59 = vmul.f32 %v1891_v50, %v4059_v2  ;;  %v1921_v60 = vmul.f32 %v1891_v50, %v4067_v5 }
 0x5ac   : > { %v1910_v48 = vmul.f32 %v1904_v53, %v4073_v8  ;;  %v1924_v61 = vmul.f32 %v1904_v53, %v4079_v11 }
 0x5ad   : > { %v1911_v51 = vmul.f32 %v1905_v58, %v4073_v8  ;;  %v1925_v54 = vmul.f32 %v1905_v58, %v4079_v11 }
 0x5ae   : > { %v1912_v62 = vadd.f32 %v1910_v48, %v1906_v55  ;;  %v1926_v63 = vadd.f32 %v1924_v61, %v1920_v56 }
 0x5af   : > { %v1913_v7 = vadd.f32 %v1911_v51, %v1907_v59  ;;  %v1927_v9 = vadd.f32 %v1925_v54, %v1921_v60 }
 0x5b0   : > { %v1914_v10 = vadd.f32 1.0, %v1912_v62  ;;  %v1928_v0 = vadd.f32 1.0, %v1926_v63 }
 0x5b1   : > { %v1915_v12 = vadd.f32 1.0, %v1913_v7  ;;  %v1929_v57 = vadd.f32 1.0, %v1927_v9 }
 0x5b2   : > { %3507 = vrcp.f32 %v1914_v10 }
 0x5b3   : > { %3509 = vrcp.f32 %v1915_v12 }
 0x5b4   : > { %3511 = vrcp.f32 %v1928_v0 }
 0x5b5   : > { %3513 = vrcp.f32 %v1929_v57 }
 0x5bf   : > { %v3508_v1 = vpop.eup %3507 }
 0x5c0   : > { %v3510_v3 = vpop.eup %3509  ;;  %v1918_v13 = vmul.f32 %v3508_v1, %v4089_v24 }
 0x5c1   : > { %v3512_v14 = vpop.eup %3511  ;;  %v1919_v15 = vmul.f32 %v3510_v3, %v4089_v24 }
 0x5c2   : > { %v3514_v16 = vpop.eup %3513  ;;  %v1932_v17 = vmul.f32 %v3512_v14, %v4091_v26  ;;  %v1934_v18 = vmul.f32 %v1918_v13, %v4059_v2  ;;  %v1948_v19 = vmul.f32 %v1918_v13, %v4073_v8 }
 0x5c3   : > { %v1933_v6 = vmul.f32 %v3514_v16, %v4091_v26  ;;  %v1935_v20 = vmul.f32 %v1919_v15, %v4059_v2  ;;  %v1949_v21 = vmul.f32 %v1919_v15, %v4073_v8 }
 0x5c4   : > { %v1938_v22 = vmul.f32 %v1932_v17, %v4067_v5  ;;  %v1952_v23 = vmul.f32 %v1932_v17, %v4079_v11 }
 0x5c5   : > { %v1939_v25 = vmul.f32 %v1933_v6, %v4067_v5  ;;  %v1953_v27 = vmul.f32 %v1933_v6, %v4079_v11 }
 0x5c6   : > { %v1940_v28 = vadd.f32 %v1938_v22, %v1934_v18  ;;  %v1954_v29 = vadd.f32 %v1952_v23, %v1948_v19 }
 0x5c7   : > { %v1941_v30 = vadd.f32 %v1939_v25, %v1935_v20  ;;  %v1955_v4 = vadd.f32 %v1953_v27, %v1949_v21 }
 0x5c8   : > { %v1942_v31 = vadd.f32 1.0, %v1940_v28  ;;  %v1956_v32 = vadd.f32 1.0, %v1954_v29  ;;  %v4829_v29 = vld [vmem:[%s4039_s27] sm:$0xff] }
 0x5c9   : > { %v1943_v33 = vadd.f32 1.0, %v1941_v30  ;;  %v1957_v34 = vadd.f32 1.0, %v1955_v4 }
 0x5ca   : > { %3515 = vrcp.f32 %v1942_v31  ;;  %v4833_v31 = vld [vmem:[%s4039_s27 + $0x8] sm:$0xff] }
 0x5cb   : > { %3517 = vrcp.f32 %v1943_v33 }
 0x5cc   : > { %3519 = vrcp.f32 %v1956_v32 }
 0x5cd   : > { %3521 = vrcp.f32 %v1957_v34  ;;  %v4837_v34 = vld [vmem:[%s4039_s27 + $0x10] sm:$0xff] }
 0x5d7   : > { %v3516_v35 = vpop.eup %3515 }
 0x5d8   : > { %v3518_v36 = vpop.eup %3517  ;;  %v1946_v37 = vmul.f32 %v4577_v38, %v3516_v35 }
 0x5d9   : > { %v3520_v39 = vpop.eup %3519  ;;  %v1947_v40 = vmul.f32 %v4581_v41, %v3518_v36 }
 0x5da   : > { %v3522_v42 = vpop.eup %3521  ;;  %v1960_v43 = vmul.f32 %v4585_v44, %v3520_v39  ;;  %v1962_v45 = vmul.f32 %v1946_v37, %v4059_v2  ;;  %v1976_v46 = vmul.f32 %v1946_v37, %v4067_v5 }
 0x5db   : > { %v1961_v49 = vmul.f32 %v4807_v47, %v3522_v42  ;;  %v1963_v50 = vmul.f32 %v1947_v40, %v4059_v2  ;;  %v1977_v52 = vmul.f32 %v1947_v40, %v4067_v5 }
 0x5dc   : > { %v1966_v38 = vmul.f32 %v1960_v43, %v4073_v8  ;;  %v1980_v53 = vmul.f32 %v1960_v43, %v4079_v11 }
 0x5dd   : > { %v1967_v41 = vmul.f32 %v1961_v49, %v4073_v8  ;;  %v1981_v44 = vmul.f32 %v1961_v49, %v4079_v11 }
 0x5de   : > { %v1968_v55 = vadd.f32 %v1966_v38, %v1962_v45  ;;  %v1982_v56 = vadd.f32 %v1980_v53, %v1976_v46 }
 0x5df   : > { %v1969_v58 = vadd.f32 %v1967_v41, %v1963_v50  ;;  %v1983_v59 = vadd.f32 %v1981_v44, %v1977_v52 }
 0x5e0   : > { %v1970_v60 = vadd.f32 1.0, %v1968_v55  ;;  %v1984_v48 = vadd.f32 1.0, %v1982_v56 }
 0x5e1   : > { %v1971_v61 = vadd.f32 1.0, %v1969_v58  ;;  %v1985_v51 = vadd.f32 1.0, %v1983_v59 }
 0x5e2   : > { %3523 = vrcp.f32 %v1970_v60 }
 0x5e3   : > { %3525 = vrcp.f32 %v1971_v61 }
 0x5e4   : > { %3527 = vrcp.f32 %v1984_v48 }
 0x5e5   : > { %3529 = vrcp.f32 %v1985_v51 }
 0x5ef   : > { %v3524_v54 = vpop.eup %3523 }
 0x5f0   : > { %v3526_v62 = vpop.eup %3525  ;;  %v1974_v63 = vmul.f32 %v3524_v54, %v4089_v24 }
 0x5f1   : > { %v3528_v7 = vpop.eup %3527  ;;  %v1975_v9 = vmul.f32 %v3526_v62, %v4089_v24 }
 0x5f2   : > { %v3530_v10 = vpop.eup %3529  ;;  %v1988_v0 = vmul.f32 %v3528_v7, %v4091_v26  ;;  %v1990_v12 = vmul.f32 %v1974_v63, %v4059_v2  ;;  %v2004_v57 = vmul.f32 %v1974_v63, %v4073_v8 }
 0x5f3   : > { %v1989_v1 = vmul.f32 %v3530_v10, %v4091_v26  ;;  %v1991_v3 = vmul.f32 %v1975_v9, %v4059_v2  ;;  %v2005_v13 = vmul.f32 %v1975_v9, %v4073_v8 }
 0x5f4   : > { %v1994_v14 = vmul.f32 %v1988_v0, %v4067_v5  ;;  %v2008_v15 = vmul.f32 %v1988_v0, %v4079_v11 }
 0x5f5   : > { %v1995_v16 = vmul.f32 %v1989_v1, %v4067_v5  ;;  %v2009_v17 = vmul.f32 %v1989_v1, %v4079_v11 }
 0x5f6   : > { %v1996_v18 = vadd.f32 %v1994_v14, %v1990_v12  ;;  %v2010_v19 = vadd.f32 %v2008_v15, %v2004_v57 }
 0x5f7   : > { %v1997_v6 = vadd.f32 %v1995_v16, %v1991_v3  ;;  %v2011_v20 = vadd.f32 %v2009_v17, %v2005_v13 }
 0x5f8   : > { %v1998_v21 = vadd.f32 1.0, %v1996_v18  ;;  %v2012_v22 = vadd.f32 1.0, %v2010_v19 }
 0x5f9   : > { %v1999_v23 = vadd.f32 1.0, %v1997_v6  ;;  %v2013_v25 = vadd.f32 1.0, %v2011_v20 }
 0x5fa   : > { %3531 = vrcp.f32 %v1998_v21 }
 0x5fb   : > { %3533 = vrcp.f32 %v1999_v23 }
 0x5fc   : > { %3535 = vrcp.f32 %v2012_v22 }
 0x5fd   : > { %3537 = vrcp.f32 %v2013_v25 }
 0x607   : > { %v3532_v27 = vpop.eup %3531 }
 0x608   : > { %v3534_v28 = vpop.eup %3533  ;;  %v2002_v30 = vmul.f32 %v4829_v29, %v3532_v27 }
 0x609   : > { %v3536_v4 = vpop.eup %3535  ;;  %v2003_v32 = vmul.f32 %v4833_v31, %v3534_v28 }
 0x60a   : > { %v3538_v33 = vpop.eup %3537  ;;  %v2016_v35 = vmul.f32 %v4837_v34, %v3536_v4  ;;  %v2018_v36 = vmul.f32 %v2002_v30, %v4059_v2  ;;  %v2032_v37 = vmul.f32 %v2002_v30, %v4067_v5 }
 0x60b   : > { %v2017_v39 = vmul.f32 %v4807_v47, %v3538_v33  ;;  %v2019_v40 = vmul.f32 %v2003_v32, %v4059_v2  ;;  %v2033_v42 = vmul.f32 %v2003_v32, %v4067_v5 }
 0x60c   : > { %v2022_v43 = vmul.f32 %v2016_v35, %v4073_v8  ;;  %v2036_v45 = vmul.f32 %v2016_v35, %v4079_v11 }
 0x60d   : > { %v2023_v46 = vmul.f32 %v2017_v39, %v4073_v8  ;;  %v2037_v49 = vmul.f32 %v2017_v39, %v4079_v11 }
 0x60e   : > { %v2024_v50 = vadd.f32 %v2022_v43, %v2018_v36  ;;  %v2038_v52 = vadd.f32 %v2036_v45, %v2032_v37 }
 0x60f   : > { %v2025_v38 = vadd.f32 %v2023_v46, %v2019_v40  ;;  %v2039_v53 = vadd.f32 %v2037_v49, %v2033_v42 }
 0x610   : > { %v2026_v41 = vadd.f32 1.0, %v2024_v50  ;;  %v2040_v44 = vadd.f32 1.0, %v2038_v52 }
 0x611   : > { %v2027_v55 = vadd.f32 1.0, %v2025_v38  ;;  %v2041_v56 = vadd.f32 1.0, %v2039_v53 }
 0x612   : > { %3539 = vrcp.f32 %v2026_v41 }
 0x613   : > { %3541 = vrcp.f32 %v2027_v55 }
 0x614   : > { %3543 = vrcp.f32 %v2040_v44 }
 0x615   : > { %3545 = vrcp.f32 %v2041_v56 }
 0x61f   : > { %v3540_v58 = vpop.eup %3539 }
 0x620   : > { %v3542_v59 = vpop.eup %3541  ;;  %v2030_v60 = vmul.f32 %v3540_v58, %v4089_v24 }
 0x621   : > { %v3544_v48 = vpop.eup %3543  ;;  %v2031_v61 = vmul.f32 %v3542_v59, %v4089_v24 }
 0x622   : > { %v3546_v51 = vpop.eup %3545  ;;  %v2044_v54 = vmul.f32 %v3544_v48, %v4091_v26  ;;  %v2046_v62 = vmul.f32 %v2030_v60, %v4059_v2  ;;  %v2060_v63 = vmul.f32 %v2030_v60, %v4073_v8 }
 0x623   : > { %v2045_v7 = vmul.f32 %v3546_v51, %v4091_v26  ;;  %v2047_v9 = vmul.f32 %v2031_v61, %v4059_v2  ;;  %v2061_v10 = vmul.f32 %v2031_v61, %v4073_v8 }
 0x624   : > { %v2050_v0 = vmul.f32 %v2044_v54, %v4067_v5  ;;  %v2064_v12 = vmul.f32 %v2044_v54, %v4079_v11 }
 0x625   : > { %v2051_v57 = vmul.f32 %v2045_v7, %v4067_v5  ;;  %v2065_v1 = vmul.f32 %v2045_v7, %v4079_v11 }
 0x626   : > { %v2052_v3 = vadd.f32 %v2050_v0, %v2046_v62  ;;  %v2066_v13 = vadd.f32 %v2064_v12, %v2060_v63 }
 0x627   : > { %v2053_v14 = vadd.f32 %v2051_v57, %v2047_v9  ;;  %v2067_v15 = vadd.f32 %v2065_v1, %v2061_v10 }
 0x628   : > { %v2054_v16 = vadd.f32 1.0, %v2052_v3  ;;  %v2068_v17 = vadd.f32 1.0, %v2066_v13 }
 0x629   : > { %v2055_v18 = vadd.f32 1.0, %v2053_v14  ;;  %v2069_v19 = vadd.f32 1.0, %v2067_v15 }
 0x62a   : > { %3547 = vrcp.f32 %v2054_v16 }
 0x62b   : > { %3549 = vrcp.f32 %v2055_v18 }
 0x62c   : > { %3551 = vrcp.f32 %v2068_v17 }
 0x62d   : > { %3553 = vrcp.f32 %v2069_v19 }
 0x637   : > { %v3548_v6 = vpop.eup %3547 }
 0x638   : > { %v3550_v20 = vpop.eup %3549  ;;  %v2058_v21 = vmul.f32 %v4829_v29, %v3548_v6 }
 0x639   : > { %v3552_v22 = vpop.eup %3551  ;;  %v2059_v23 = vmul.f32 %v4833_v31, %v3550_v20 }
 0x63a   : > { %v3554_v25 = vpop.eup %3553  ;;  %v2072_v27 = vmul.f32 %v4837_v34, %v3552_v22  ;;  %v2074_v28 = vmul.f32 %v2058_v21, %v4059_v2  ;;  %v2088_v30 = vmul.f32 %v2058_v21, %v4067_v5 }
 0x63b   : > { %v2073_v4 = vmul.f32 %v4807_v47, %v3554_v25  ;;  %v2075_v32 = vmul.f32 %v2059_v23, %v4059_v2  ;;  %v2089_v33 = vmul.f32 %v2059_v23, %v4067_v5 }
 0x63c   : > { %v2078_v35 = vmul.f32 %v2072_v27, %v4073_v8  ;;  %v2092_v36 = vmul.f32 %v2072_v27, %v4079_v11 }
 0x63d   : > { %v2079_v37 = vmul.f32 %v2073_v4, %v4073_v8  ;;  %v2093_v39 = vmul.f32 %v2073_v4, %v4079_v11 }
 0x63e   : > { %v2080_v40 = vadd.f32 %v2078_v35, %v2074_v28  ;;  %v2094_v42 = vadd.f32 %v2092_v36, %v2088_v30 }
 0x63f   : > { %v2081_v43 = vadd.f32 %v2079_v37, %v2075_v32  ;;  %v2095_v45 = vadd.f32 %v2093_v39, %v2089_v33 }
 0x640   : > { %v2082_v46 = vadd.f32 1.0, %v2080_v40  ;;  %v2096_v49 = vadd.f32 1.0, %v2094_v42 }
 0x641   : > { %v2083_v50 = vadd.f32 1.0, %v2081_v43  ;;  %v2097_v52 = vadd.f32 1.0, %v2095_v45 }
 0x642   : > { %3555 = vrcp.f32 %v2082_v46 }
 0x643   : > { %3557 = vrcp.f32 %v2083_v50 }
 0x644   : > { %3559 = vrcp.f32 %v2096_v49 }
 0x645   : > { %3561 = vrcp.f32 %v2097_v52 }
 0x64f   : > { %v3556_v38 = vpop.eup %3555 }
 0x650   : > { %v3558_v53 = vpop.eup %3557  ;;  %v2086_v41 = vmul.f32 %v3556_v38, %v4089_v24 }
 0x651   : > { %v3560_v44 = vpop.eup %3559  ;;  %v2087_v55 = vmul.f32 %v3558_v53, %v4089_v24 }
 0x652   : > { %v3562_v56 = vpop.eup %3561  ;;  %v2100_v58 = vmul.f32 %v3560_v44, %v4091_v26  ;;  %v2102_v59 = vmul.f32 %v2086_v41, %v4059_v2  ;;  %v2116_v60 = vmul.f32 %v2086_v41, %v4073_v8 }
 0x653   : > { %v2101_v48 = vmul.f32 %v3562_v56, %v4091_v26  ;;  %v2103_v61 = vmul.f32 %v2087_v55, %v4059_v2  ;;  %v2117_v51 = vmul.f32 %v2087_v55, %v4073_v8 }
 0x654   : > { %v2106_v54 = vmul.f32 %v2100_v58, %v4067_v5  ;;  %v2120_v62 = vmul.f32 %v2100_v58, %v4079_v11 }
 0x655   : > { %v2107_v63 = vmul.f32 %v2101_v48, %v4067_v5  ;;  %v2121_v7 = vmul.f32 %v2101_v48, %v4079_v11 }
 0x656   : > { %v2108_v9 = vadd.f32 %v2106_v54, %v2102_v59  ;;  %v2122_v10 = vadd.f32 %v2120_v62, %v2116_v60 }
 0x657   : > { %v2109_v0 = vadd.f32 %v2107_v63, %v2103_v61  ;;  %v2123_v12 = vadd.f32 %v2121_v7, %v2117_v51 }
 0x658   : > { %v2110_v57 = vadd.f32 1.0, %v2108_v9  ;;  %v2124_v1 = vadd.f32 1.0, %v2122_v10 }
 0x659   : > { %v2111_v3 = vadd.f32 1.0, %v2109_v0  ;;  %v2125_v13 = vadd.f32 1.0, %v2123_v12 }
 0x65a   : > { %3563 = vrcp.f32 %v2110_v57 }
 0x65b   : > { %3565 = vrcp.f32 %v2111_v3 }
 0x65c   : > { %3567 = vrcp.f32 %v2124_v1 }
 0x65d   : > { %3569 = vrcp.f32 %v2125_v13 }
 0x667   : > { %v3564_v14 = vpop.eup %3563 }
 0x668   : > { %v3566_v15 = vpop.eup %3565  ;;  %v2114_v16 = vmul.f32 %v4829_v29, %v3564_v14 }
 0x669   : > { %v3568_v17 = vpop.eup %3567  ;;  %v2115_v18 = vmul.f32 %v4833_v31, %v3566_v15 }
 0x66a   : > { %v3570_v19 = vpop.eup %3569  ;;  %v2128_v6 = vmul.f32 %v4837_v34, %v3568_v17  ;;  %v2130_v20 = vmul.f32 %v2114_v16, %v4059_v2  ;;  %v2144_v21 = vmul.f32 %v2114_v16, %v4067_v5 }
 0x66b   : > { %v2129_v22 = vmul.f32 %v4807_v47, %v3570_v19  ;;  %v2131_v23 = vmul.f32 %v2115_v18, %v4059_v2  ;;  %v2145_v25 = vmul.f32 %v2115_v18, %v4067_v5 }
 0x66c   : > { %v2134_v27 = vmul.f32 %v2128_v6, %v4073_v8  ;;  %v2148_v28 = vmul.f32 %v2128_v6, %v4079_v11 }
 0x66d   : > { %v2135_v30 = vmul.f32 %v2129_v22, %v4073_v8  ;;  %v2149_v4 = vmul.f32 %v2129_v22, %v4079_v11 }
 0x66e   : > { %v2136_v32 = vadd.f32 %v2134_v27, %v2130_v20  ;;  %v2150_v33 = vadd.f32 %v2148_v28, %v2144_v21 }
 0x66f   : > { %v2137_v35 = vadd.f32 %v2135_v30, %v2131_v23  ;;  %v2151_v36 = vadd.f32 %v2149_v4, %v2145_v25 }
 0x670   : > { %v2138_v37 = vadd.f32 1.0, %v2136_v32  ;;  %v2152_v39 = vadd.f32 1.0, %v2150_v33 }
 0x671   : > { %v2139_v40 = vadd.f32 1.0, %v2137_v35  ;;  %v2153_v42 = vadd.f32 1.0, %v2151_v36 }
 0x672   : > { %3571 = vrcp.f32 %v2138_v37 }
 0x673   : > { %3573 = vrcp.f32 %v2139_v40 }
 0x674   : > { %3575 = vrcp.f32 %v2152_v39 }
 0x675   : > { %3577 = vrcp.f32 %v2153_v42 }
 0x67f   : > { %v3572_v43 = vpop.eup %3571 }
 0x680   : > { %v3574_v45 = vpop.eup %3573  ;;  %v2142_v46 = vmul.f32 %v3572_v43, %v4089_v24 }
 0x681   : > { %v3576_v49 = vpop.eup %3575  ;;  %v2143_v50 = vmul.f32 %v3574_v45, %v4089_v24 }
 0x682   : > { %v3578_v52 = vpop.eup %3577  ;;  %v2156_v38 = vmul.f32 %v3576_v49, %v4091_v26  ;;  %v2158_v53 = vmul.f32 %v2142_v46, %v4059_v2  ;;  %v2172_v41 = vmul.f32 %v2142_v46, %v4073_v8 }
 0x683   : > { %v2157_v44 = vmul.f32 %v3578_v52, %v4091_v26  ;;  %v2159_v55 = vmul.f32 %v2143_v50, %v4059_v2  ;;  %v2173_v56 = vmul.f32 %v2143_v50, %v4073_v8 }
 0x684   : > { %v2162_v58 = vmul.f32 %v2156_v38, %v4067_v5  ;;  %v2176_v59 = vmul.f32 %v2156_v38, %v4079_v11 }
 0x685   : > { %v2163_v60 = vmul.f32 %v2157_v44, %v4067_v5  ;;  %v2177_v48 = vmul.f32 %v2157_v44, %v4079_v11 }
 0x686   : > { %v2164_v61 = vadd.f32 %v2162_v58, %v2158_v53  ;;  %v2178_v51 = vadd.f32 %v2176_v59, %v2172_v41 }
 0x687   : > { %v2165_v54 = vadd.f32 %v2163_v60, %v2159_v55  ;;  %v2179_v62 = vadd.f32 %v2177_v48, %v2173_v56 }
 0x688   : > { %v2166_v63 = vadd.f32 1.0, %v2164_v61  ;;  %v2180_v7 = vadd.f32 1.0, %v2178_v51 }
 0x689   : > { %v2167_v9 = vadd.f32 1.0, %v2165_v54  ;;  %v2181_v10 = vadd.f32 1.0, %v2179_v62 }
 0x68a   : > { %3579 = vrcp.f32 %v2166_v63 }
 0x68b   : > { %3581 = vrcp.f32 %v2167_v9 }
 0x68c   : > { %3583 = vrcp.f32 %v2180_v7 }
 0x68d   : > { %3585 = vrcp.f32 %v2181_v10 }
 0x697   : > { %v3580_v0 = vpop.eup %3579 }
 0x698   : > { %v3582_v12 = vpop.eup %3581  ;;  %v2170_v57 = vmul.f32 %v4829_v29, %v3580_v0 }
 0x699   : > { %v3584_v1 = vpop.eup %3583  ;;  %v2171_v3 = vmul.f32 %v4833_v31, %v3582_v12 }
 0x69a   : > { %v3586_v13 = vpop.eup %3585  ;;  %v2184_v14 = vmul.f32 %v4837_v34, %v3584_v1  ;;  %v2186_v15 = vmul.f32 %v2170_v57, %v4059_v2  ;;  %v2200_v16 = vmul.f32 %v2170_v57, %v4067_v5 }
 0x69b   : > { %v2185_v17 = vmul.f32 %v4807_v47, %v3586_v13  ;;  %v2187_v18 = vmul.f32 %v2171_v3, %v4059_v2  ;;  %v2201_v19 = vmul.f32 %v2171_v3, %v4067_v5 }
 0x69c   : > { %v2190_v6 = vmul.f32 %v2184_v14, %v4073_v8  ;;  %v2204_v20 = vmul.f32 %v2184_v14, %v4079_v11 }
 0x69d   : > { %v2191_v21 = vmul.f32 %v2185_v17, %v4073_v8  ;;  %v2205_v22 = vmul.f32 %v2185_v17, %v4079_v11 }
 0x69e   : > { %v2192_v23 = vadd.f32 %v2190_v6, %v2186_v15  ;;  %v2206_v25 = vadd.f32 %v2204_v20, %v2200_v16 }
 0x69f   : > { %v2193_v27 = vadd.f32 %v2191_v21, %v2187_v18  ;;  %v2207_v28 = vadd.f32 %v2205_v22, %v2201_v19 }
 0x6a0   : > { %v2194_v30 = vadd.f32 1.0, %v2192_v23  ;;  %v2208_v4 = vadd.f32 1.0, %v2206_v25 }
 0x6a1   : > { %v2195_v32 = vadd.f32 1.0, %v2193_v27  ;;  %v2209_v33 = vadd.f32 1.0, %v2207_v28 }
 0x6a2   : > { %3587 = vrcp.f32 %v2194_v30 }
 0x6a3   : > { %3589 = vrcp.f32 %v2195_v32 }
 0x6a4   : > { %3591 = vrcp.f32 %v2208_v4 }
 0x6a5   : > { %3593 = vrcp.f32 %v2209_v33 }
 0x6af   : > { %v3588_v35 = vpop.eup %3587 }
 0x6b0   : > { %v3590_v36 = vpop.eup %3589  ;;  %v2198_v37 = vmul.f32 %v3588_v35, %v4089_v24 }
 0x6b1   : > { %v3592_v39 = vpop.eup %3591  ;;  %v2199_v40 = vmul.f32 %v3590_v36, %v4089_v24 }
 0x6b2   : > { %v3594_v42 = vpop.eup %3593  ;;  %v2212_v43 = vmul.f32 %v3592_v39, %v4091_v26  ;;  %v2214_v45 = vmul.f32 %v2198_v37, %v4059_v2  ;;  %v2228_v46 = vmul.f32 %v2198_v37, %v4073_v8 }
 0x6b3   : > { %v2213_v49 = vmul.f32 %v3594_v42, %v4091_v26  ;;  %v2215_v50 = vmul.f32 %v2199_v40, %v4059_v2  ;;  %v2229_v52 = vmul.f32 %v2199_v40, %v4073_v8 }
 0x6b4   : > { %v2218_v38 = vmul.f32 %v2212_v43, %v4067_v5  ;;  %v2232_v53 = vmul.f32 %v2212_v43, %v4079_v11 }
 0x6b5   : > { %v2219_v41 = vmul.f32 %v2213_v49, %v4067_v5  ;;  %v2233_v44 = vmul.f32 %v2213_v49, %v4079_v11 }
 0x6b6   : > { %v2220_v55 = vadd.f32 %v2218_v38, %v2214_v45  ;;  %v2234_v56 = vadd.f32 %v2232_v53, %v2228_v46 }
 0x6b7   : > { %v2221_v58 = vadd.f32 %v2219_v41, %v2215_v50  ;;  %v2235_v59 = vadd.f32 %v2233_v44, %v2229_v52 }
 0x6b8   : > { %v2222_v60 = vadd.f32 1.0, %v2220_v55  ;;  %v2236_v48 = vadd.f32 1.0, %v2234_v56 }
 0x6b9   : > { %v2223_v61 = vadd.f32 1.0, %v2221_v58  ;;  %v2237_v51 = vadd.f32 1.0, %v2235_v59 }
 0x6ba   : > { %3595 = vrcp.f32 %v2222_v60 }
 0x6bb   : > { %3597 = vrcp.f32 %v2223_v61 }
 0x6bc   : > { %3599 = vrcp.f32 %v2236_v48 }
 0x6bd   : > { %3601 = vrcp.f32 %v2237_v51 }
 0x6c7   : > { %v3596_v54 = vpop.eup %3595 }
 0x6c8   : > { %v3598_v62 = vpop.eup %3597  ;;  %v2226_v63 = vmul.f32 %v4829_v29, %v3596_v54 }
 0x6c9   : > { %v3600_v7 = vpop.eup %3599  ;;  %v2227_v9 = vmul.f32 %v4833_v31, %v3598_v62 }
 0x6ca   : > { %v3602_v10 = vpop.eup %3601  ;;  %v2240_v0 = vmul.f32 %v4837_v34, %v3600_v7  ;;  %v2242_v12 = vmul.f32 %v2226_v63, %v4059_v2  ;;  %v2256_v57 = vmul.f32 %v2226_v63, %v4067_v5 }
 0x6cb   : > { %v2241_v1 = vmul.f32 %v4807_v47, %v3602_v10  ;;  %v2243_v3 = vmul.f32 %v2227_v9, %v4059_v2  ;;  %v2257_v13 = vmul.f32 %v2227_v9, %v4067_v5 }
 0x6cc   : > { %v2246_v14 = vmul.f32 %v2240_v0, %v4073_v8  ;;  %v2260_v15 = vmul.f32 %v2240_v0, %v4079_v11 }
 0x6cd   : > { %v2247_v16 = vmul.f32 %v2241_v1, %v4073_v8  ;;  %v2261_v17 = vmul.f32 %v2241_v1, %v4079_v11 }
 0x6ce   : > { %v2248_v18 = vadd.f32 %v2246_v14, %v2242_v12  ;;  %v2262_v19 = vadd.f32 %v2260_v15, %v2256_v57 }
 0x6cf   : > { %v2249_v6 = vadd.f32 %v2247_v16, %v2243_v3  ;;  %v2263_v20 = vadd.f32 %v2261_v17, %v2257_v13 }
 0x6d0   : > { %v2250_v21 = vadd.f32 1.0, %v2248_v18  ;;  %v2264_v22 = vadd.f32 1.0, %v2262_v19 }
 0x6d1   : > { %v2251_v23 = vadd.f32 1.0, %v2249_v6  ;;  %v2265_v25 = vadd.f32 1.0, %v2263_v20 }
 0x6d2   : > { %3603 = vrcp.f32 %v2250_v21 }
 0x6d3   : > { %3605 = vrcp.f32 %v2251_v23 }
 0x6d4   : > { %3607 = vrcp.f32 %v2264_v22 }
 0x6d5   : > { %3609 = vrcp.f32 %v2265_v25 }
 0x6df   : > { %v3604_v27 = vpop.eup %3603 }
 0x6e0   : > { %v3606_v28 = vpop.eup %3605  ;;  %v2254_v30 = vmul.f32 %v3604_v27, %v4089_v24 }
 0x6e1   : > { %v3608_v4 = vpop.eup %3607  ;;  %v2255_v32 = vmul.f32 %v3606_v28, %v4089_v24 }
 0x6e2   : > { %v3610_v33 = vpop.eup %3609  ;;  %v2268_v35 = vmul.f32 %v3608_v4, %v4091_v26  ;;  %v2270_v36 = vmul.f32 %v2254_v30, %v4059_v2  ;;  %v2284_v37 = vmul.f32 %v2254_v30, %v4073_v8 }
 0x6e3   : > { %v2269_v39 = vmul.f32 %v3610_v33, %v4091_v26  ;;  %v2271_v40 = vmul.f32 %v2255_v32, %v4059_v2  ;;  %v2285_v42 = vmul.f32 %v2255_v32, %v4073_v8 }
 0x6e4   : > { %v2274_v43 = vmul.f32 %v2268_v35, %v4067_v5  ;;  %v2288_v45 = vmul.f32 %v2268_v35, %v4079_v11 }
 0x6e5   : > { %v2275_v46 = vmul.f32 %v2269_v39, %v4067_v5  ;;  %v2289_v49 = vmul.f32 %v2269_v39, %v4079_v11 }
 0x6e6   : > { %v2276_v50 = vadd.f32 %v2274_v43, %v2270_v36  ;;  %v2290_v52 = vadd.f32 %v2288_v45, %v2284_v37 }
 0x6e7   : > { %v2277_v38 = vadd.f32 %v2275_v46, %v2271_v40  ;;  %v2291_v53 = vadd.f32 %v2289_v49, %v2285_v42 }
 0x6e8   : > { %v2278_v41 = vadd.f32 1.0, %v2276_v50  ;;  %v2292_v44 = vadd.f32 1.0, %v2290_v52 }
 0x6e9   : > { %v2279_v55 = vadd.f32 1.0, %v2277_v38  ;;  %v2293_v56 = vadd.f32 1.0, %v2291_v53 }
 0x6ea   : > { %3611 = vrcp.f32 %v2278_v41 }
 0x6eb   : > { %3613 = vrcp.f32 %v2279_v55 }
 0x6ec   : > { %3615 = vrcp.f32 %v2292_v44 }
 0x6ed   : > { %3617 = vrcp.f32 %v2293_v56 }
 0x6f7   : > { %v3612_v58 = vpop.eup %3611 }
 0x6f8   : > { %v3614_v59 = vpop.eup %3613  ;;  %v2282_v60 = vmul.f32 %v4829_v29, %v3612_v58 }
 0x6f9   : > { %v3616_v48 = vpop.eup %3615  ;;  %v2283_v61 = vmul.f32 %v4833_v31, %v3614_v59 }
 0x6fa   : > { %v3618_v51 = vpop.eup %3617  ;;  %v2296_v54 = vmul.f32 %v4837_v34, %v3616_v48  ;;  %v2298_v62 = vmul.f32 %v2282_v60, %v4059_v2  ;;  %v2312_v63 = vmul.f32 %v2282_v60, %v4067_v5 }
 0x6fb   : > { %v2297_v7 = vmul.f32 %v4807_v47, %v3618_v51  ;;  %v2299_v9 = vmul.f32 %v2283_v61, %v4059_v2  ;;  %v2313_v10 = vmul.f32 %v2283_v61, %v4067_v5 }
 0x6fc   : > { %v2302_v0 = vmul.f32 %v2296_v54, %v4073_v8  ;;  %v2316_v12 = vmul.f32 %v2296_v54, %v4079_v11 }
 0x6fd   : > { %v2303_v57 = vmul.f32 %v2297_v7, %v4073_v8  ;;  %v2317_v1 = vmul.f32 %v2297_v7, %v4079_v11 }
 0x6fe   : > { %v2304_v3 = vadd.f32 %v2302_v0, %v2298_v62  ;;  %v2318_v13 = vadd.f32 %v2316_v12, %v2312_v63 }
 0x6ff   : > { %v2305_v14 = vadd.f32 %v2303_v57, %v2299_v9  ;;  %v2319_v15 = vadd.f32 %v2317_v1, %v2313_v10 }
 0x700   : > { %v2306_v16 = vadd.f32 1.0, %v2304_v3  ;;  %v2320_v17 = vadd.f32 1.0, %v2318_v13 }
 0x701   : > { %v2307_v18 = vadd.f32 1.0, %v2305_v14  ;;  %v2321_v19 = vadd.f32 1.0, %v2319_v15 }
 0x702   : > { %3619 = vrcp.f32 %v2306_v16 }
 0x703   : > { %3621 = vrcp.f32 %v2307_v18 }
 0x704   : > { %3623 = vrcp.f32 %v2320_v17 }
 0x705   : > { %3625 = vrcp.f32 %v2321_v19 }
 0x70f   : > { %v3620_v6 = vpop.eup %3619 }
 0x710   : > { %v3622_v20 = vpop.eup %3621  ;;  %v2310_v21 = vmul.f32 %v3620_v6, %v4089_v24 }
 0x711   : > { %v3624_v22 = vpop.eup %3623  ;;  %v2311_v23 = vmul.f32 %v3622_v20, %v4089_v24 }
 0x712   : > { %v3626_v25 = vpop.eup %3625  ;;  %v2324_v27 = vmul.f32 %v3624_v22, %v4091_v26  ;;  %v2326_v28 = vmul.f32 %v2310_v21, %v4059_v2  ;;  %v2340_v30 = vmul.f32 %v2310_v21, %v4073_v8 }
 0x713   : > { %v2325_v4 = vmul.f32 %v3626_v25, %v4091_v26  ;;  %v2327_v32 = vmul.f32 %v2311_v23, %v4059_v2  ;;  %v2341_v33 = vmul.f32 %v2311_v23, %v4073_v8 }
 0x714   : > { %v2330_v35 = vmul.f32 %v2324_v27, %v4067_v5  ;;  %v2344_v36 = vmul.f32 %v2324_v27, %v4079_v11 }
 0x715   : > { %v2331_v37 = vmul.f32 %v2325_v4, %v4067_v5  ;;  %v2345_v39 = vmul.f32 %v2325_v4, %v4079_v11 }
 0x716   : > { %v2332_v40 = vadd.f32 %v2330_v35, %v2326_v28  ;;  %v2346_v42 = vadd.f32 %v2344_v36, %v2340_v30 }
 0x717   : > { %v2333_v43 = vadd.f32 %v2331_v37, %v2327_v32  ;;  %v2347_v45 = vadd.f32 %v2345_v39, %v2341_v33 }
 0x718   : > { %v2334_v46 = vadd.f32 1.0, %v2332_v40  ;;  %v2348_v49 = vadd.f32 1.0, %v2346_v42 }
 0x719   : > { %v2335_v50 = vadd.f32 1.0, %v2333_v43  ;;  %v2349_v52 = vadd.f32 1.0, %v2347_v45 }
 0x71a   : > { %3627 = vrcp.f32 %v2334_v46 }
 0x71b   : > { %3629 = vrcp.f32 %v2335_v50 }
 0x71c   : > { %3631 = vrcp.f32 %v2348_v49 }
 0x71d   : > { %3633 = vrcp.f32 %v2349_v52 }
 0x727   : > { %v3628_v38 = vpop.eup %3627 }
 0x728   : > { %v3630_v53 = vpop.eup %3629  ;;  %v2338_v41 = vmul.f32 %v4829_v29, %v3628_v38 }
 0x729   : > { %v3632_v44 = vpop.eup %3631  ;;  %v2339_v55 = vmul.f32 %v4833_v31, %v3630_v53 }
 0x72a   : > { %v3634_v56 = vpop.eup %3633  ;;  %v2352_v58 = vmul.f32 %v4837_v34, %v3632_v44  ;;  %v2354_v59 = vmul.f32 %v2338_v41, %v4059_v2  ;;  %v2374_v60 = vmul.f32 %v2338_v41, %v4067_v5 }
 0x72b   : > { %v2353_v48 = vmul.f32 %v4807_v47, %v3634_v56  ;;  %v2355_v61 = vmul.f32 %v2339_v55, %v4059_v2  ;;  %v2375_v51 = vmul.f32 %v2339_v55, %v4067_v5 }
 0x72c   : > { %v2358_v54 = vmul.f32 %v2352_v58, %v4073_v8  ;;  %v2378_v62 = vmul.f32 %v2352_v58, %v4079_v11 }
 0x72d   : > { %v2359_v63 = vmul.f32 %v2353_v48, %v4073_v8  ;;  %v2379_v7 = vmul.f32 %v2353_v48, %v4079_v11 }
 0x72e   : > { %v2360_v9 = vadd.f32 %v2358_v54, %v2354_v59  ;;  %v2380_v10 = vadd.f32 %v2378_v62, %v2374_v60 }
 0x72f   : > { %v2361_v0 = vadd.f32 %v2359_v63, %v2355_v61  ;;  %v2381_v12 = vadd.f32 %v2379_v7, %v2375_v51 }
 0x730   : > { %v2362_v57 = vadd.f32 1.0, %v2360_v9  ;;  %v2382_v1 = vadd.f32 1.0, %v2380_v10 }
 0x731   : > { %v2363_v3 = vadd.f32 1.0, %v2361_v0  ;;  %v2383_v13 = vadd.f32 1.0, %v2381_v12 }
 0x732   : > { %3635 = vrcp.f32 %v2362_v57 }
 0x733   : > { %3637 = vrcp.f32 %v2363_v3 }
 0x734   : > { %3639 = vrcp.f32 %v2382_v1 }
 0x735   : > { %3641 = vrcp.f32 %v2383_v13 }
 0x73f   : > { %v3636_v14 = vpop.eup %3635 }
 0x740   : > { %v3638_v15 = vpop.eup %3637  ;;  %v2366_v16 = vmul.f32 %v3636_v14, %v2362_v57 }
 0x741   : > { %v3640_v17 = vpop.eup %3639  ;;  %v2367_v18 = vmul.f32 %v3638_v15, %v2363_v3 }
 0x742   : > { %v3642_v19 = vpop.eup %3641  ;;  %v2368_v6 = vsub.f32 2.0, %v2366_v16  ;;  %v2386_v20 = vmul.f32 %v3640_v17, %v2382_v1 }
 0x743   : > { %v2369_v21 = vsub.f32 2.0, %v2367_v18  ;;  %v2387_v22 = vmul.f32 %v3642_v19, %v2383_v13 }
 0x744   : > { %v2370_v23 = vmul.f32 %v3636_v14, %v2368_v6  ;;  %v2388_v25 = vsub.f32 2.0, %v2386_v20 }
 0x745   : > { %v2371_v27 = vmul.f32 %v3638_v15, %v2369_v21  ;;  %v2389_v28 = vsub.f32 2.0, %v2387_v22 }
 0x746   : > { %v2372_v30 = vmul.f32 %v2370_v23, %v4089_v24  ;;  %v2390_v4 = vmul.f32 %v3640_v17, %v2388_v25 }
 0x747   : > { %v2373_v32 = vmul.f32 %v2371_v27, %v4089_v24  ;;  %v2391_v33 = vmul.f32 %v3642_v19, %v2389_v28 }
 0x748   : > { %v2392_v35 = vmul.f32 %v2390_v4, %v4091_v26  ;;  %v2394_v36 = vmul.f32 %v2372_v30, %v4059_v2  ;;  %v2414_v37 = vmul.f32 %v2372_v30, %v4073_v8 }
 0x749   : > { %v2393_v39 = vmul.f32 %v2391_v33, %v4091_v26  ;;  %v2395_v40 = vmul.f32 %v2373_v32, %v4059_v2  ;;  %v2415_v42 = vmul.f32 %v2373_v32, %v4073_v8 }
 0x74a   : > { %v2398_v43 = vmul.f32 %v2392_v35, %v4067_v5  ;;  %v2418_v45 = vmul.f32 %v2392_v35, %v4079_v11 }
 0x74b   : > { %v2399_v46 = vmul.f32 %v2393_v39, %v4067_v5  ;;  %v2419_v49 = vmul.f32 %v2393_v39, %v4079_v11 }
 0x74c   : > { %v2400_v50 = vadd.f32 %v2398_v43, %v2394_v36  ;;  %v2420_v52 = vadd.f32 %v2418_v45, %v2414_v37 }
 0x74d   : > { %v2401_v38 = vadd.f32 %v2399_v46, %v2395_v40  ;;  %v2421_v53 = vadd.f32 %v2419_v49, %v2415_v42 }
 0x74e   : > { %v2402_v41 = vadd.f32 1.0, %v2400_v50  ;;  %v2422_v44 = vadd.f32 1.0, %v2420_v52 }
 0x74f   : > { %v2403_v55 = vadd.f32 1.0, %v2401_v38  ;;  %v2423_v56 = vadd.f32 1.0, %v2421_v53 }
 0x750   : > { %3643 = vrcp.f32 %v2402_v41 }
 0x751   : > { %3645 = vrcp.f32 %v2403_v55 }
 0x752   : > { %3647 = vrcp.f32 %v2422_v44 }
 0x753   : > { %3649 = vrcp.f32 %v2423_v56 }
 0x75d   : > { %v3644_v58 = vpop.eup %3643 }
 0x75e   : > { %v3646_v59 = vpop.eup %3645  ;;  %v2406_v60 = vmul.f32 %v3644_v58, %v2402_v41 }
 0x75f   : > { %v3648_v48 = vpop.eup %3647  ;;  %v2407_v61 = vmul.f32 %v3646_v59, %v2403_v55 }
 0x760   : > { %v3650_v51 = vpop.eup %3649  ;;  %v2408_v54 = vsub.f32 2.0, %v2406_v60  ;;  %v2426_v62 = vmul.f32 %v3648_v48, %v2422_v44 }
 0x761   : > { %v2409_v63 = vsub.f32 2.0, %v2407_v61  ;;  %v2427_v7 = vmul.f32 %v3650_v51, %v2423_v56 }
 0x762   : > { %v2410_v9 = vmul.f32 %v3644_v58, %v2408_v54  ;;  %v2428_v10 = vsub.f32 2.0, %v2426_v62 }
 0x763   : > { %v2411_v0 = vmul.f32 %v3646_v59, %v2409_v63  ;;  %v2429_v12 = vsub.f32 2.0, %v2427_v7 }
 0x764   : > { %v2412_v57 = vmul.f32 %v4829_v29, %v2410_v9  ;;  %v2430_v1 = vmul.f32 %v3648_v48, %v2428_v10 }
 0x765   : > { %v2413_v3 = vmul.f32 %v4833_v31, %v2411_v0  ;;  %v2431_v13 = vmul.f32 %v3650_v51, %v2429_v12 }
 0x766   : > { %v2432_v14 = vmul.f32 %v4837_v34, %v2430_v1  ;;  %v2434_v15 = vmul.f32 %v2412_v57, %v4059_v2  ;;  %v2454_v16 = vmul.f32 %v2412_v57, %v4067_v5 }
 0x767   : > { %v2433_v17 = vmul.f32 %v4807_v47, %v2431_v13  ;;  %v2435_v18 = vmul.f32 %v2413_v3, %v4059_v2  ;;  %v2455_v19 = vmul.f32 %v2413_v3, %v4067_v5 }
 0x768   : > { %v2438_v6 = vmul.f32 %v2432_v14, %v4073_v8  ;;  %v2458_v20 = vmul.f32 %v2432_v14, %v4079_v11 }
 0x769   : > { %v2439_v21 = vmul.f32 %v2433_v17, %v4073_v8  ;;  %v2459_v22 = vmul.f32 %v2433_v17, %v4079_v11 }
 0x76a   : > { %v2440_v23 = vadd.f32 %v2438_v6, %v2434_v15  ;;  %v2460_v25 = vadd.f32 %v2458_v20, %v2454_v16 }
 0x76b   : > { %v2441_v27 = vadd.f32 %v2439_v21, %v2435_v18  ;;  %v2461_v28 = vadd.f32 %v2459_v22, %v2455_v19 }
 0x76c   : > { %v2442_v30 = vadd.f32 1.0, %v2440_v23  ;;  %v2462_v4 = vadd.f32 1.0, %v2460_v25 }
 0x76d   : > { %v2443_v32 = vadd.f32 1.0, %v2441_v27  ;;  %v2463_v47 = vadd.f32 1.0, %v2461_v28 }
 0x76e   : > { %3651 = vrcp.f32 %v2442_v30 }
 0x76f   : > { %3653 = vrcp.f32 %v2443_v32 }
 0x770   : > { %3655 = vrcp.f32 %v2462_v4 }
 0x771   : > { %3657 = vrcp.f32 %v2463_v47 }
 0x77b   : > { %v3652_v33 = vpop.eup %3651 }
 0x77c   : > { %v3654_v35 = vpop.eup %3653  ;;  %v2446_v36 = vmul.f32 %v3652_v33, %v2442_v30 }
 0x77d   : > { %v3656_v37 = vpop.eup %3655  ;;  %v2447_v39 = vmul.f32 %v3654_v35, %v2443_v32 }
 0x77e   : > { %v3658_v40 = vpop.eup %3657  ;;  %v2448_v42 = vsub.f32 2.0, %v2446_v36  ;;  %v2466_v43 = vmul.f32 %v3656_v37, %v2462_v4  ;;  %v5035_v36 = vld [vmem:[%s4039_s27 + $0x18] sm:$0xff] }
 0x77f   : > { %v2449_v45 = vsub.f32 2.0, %v2447_v39  ;;  %v2467_v46 = vmul.f32 %v3658_v40, %v2463_v47 }
 0x780   : > { %v2450_v49 = vmul.f32 %v3652_v33, %v2448_v42  ;;  %v2468_v50 = vsub.f32 2.0, %v2466_v43 }
 0x781   : > { %v2451_v52 = vmul.f32 %v3654_v35, %v2449_v45  ;;  %v2469_v38 = vsub.f32 2.0, %v2467_v46 }
 0x782   : > { %v2452_v53 = vmul.f32 %v2450_v49, %v4089_v24  ;;  %v2470_v41 = vmul.f32 %v3656_v37, %v2468_v50 }
 0x783   : > { %v2453_v44 = vmul.f32 %v2451_v52, %v4089_v24  ;;  %v2471_v55 = vmul.f32 %v3658_v40, %v2469_v38 }
 0x784   : > { %v2472_v56 = vmul.f32 %v2470_v41, %v4091_v26  ;;  %v2474_v58 = vmul.f32 %v2452_v53, %v4059_v2  ;;  %v2494_v59 = vmul.f32 %v2452_v53, %v4073_v8 }
 0x785   : > { %v2473_v60 = vmul.f32 %v2471_v55, %v4091_v26  ;;  %v2475_v48 = vmul.f32 %v2453_v44, %v4059_v2  ;;  %v2495_v61 = vmul.f32 %v2453_v44, %v4073_v8 }
 0x786   : > { %v2478_v51 = vmul.f32 %v2472_v56, %v4067_v5  ;;  %v2498_v54 = vmul.f32 %v2472_v56, %v4079_v11 }
 0x787   : > { %v2479_v62 = vmul.f32 %v2473_v60, %v4067_v5  ;;  %v2499_v63 = vmul.f32 %v2473_v60, %v4079_v11 }
 0x788   : > { %v2480_v7 = vadd.f32 %v2478_v51, %v2474_v58  ;;  %v2500_v9 = vadd.f32 %v2498_v54, %v2494_v59 }
 0x789   : > { %v2481_v10 = vadd.f32 %v2479_v62, %v2475_v48  ;;  %v2501_v0 = vadd.f32 %v2499_v63, %v2495_v61 }
 0x78a   : > { %v2482_v12 = vadd.f32 1.0, %v2480_v7  ;;  %v2502_v57 = vadd.f32 1.0, %v2500_v9 }
 0x78b   : > { %v2483_v1 = vadd.f32 1.0, %v2481_v10  ;;  %v2503_v3 = vadd.f32 1.0, %v2501_v0 }
 0x78c   : > { %3659 = vrcp.f32 %v2482_v12 }
 0x78d   : > { %3661 = vrcp.f32 %v2483_v1 }
 0x78e   : > { %3663 = vrcp.f32 %v2502_v57 }
 0x78f   : > { %3665 = vrcp.f32 %v2503_v3 }
 0x799   : > { %v3660_v13 = vpop.eup %3659 }
 0x79a   : > { %v3662_v14 = vpop.eup %3661  ;;  %v2486_v15 = vmul.f32 %v3660_v13, %v2482_v12 }
 0x79b   : > { %v3664_v16 = vpop.eup %3663  ;;  %v2487_v17 = vmul.f32 %v3662_v14, %v2483_v1 }
 0x79c   : > { %v3666_v18 = vpop.eup %3665  ;;  %v2488_v19 = vsub.f32 2.0, %v2486_v15  ;;  %v2506_v6 = vmul.f32 %v3664_v16, %v2502_v57 }
 0x79d   : > { %v2489_v20 = vsub.f32 2.0, %v2487_v17  ;;  %v2507_v21 = vmul.f32 %v3666_v18, %v2503_v3 }
 0x79e   : > { %v2490_v22 = vmul.f32 %v3660_v13, %v2488_v19  ;;  %v2508_v23 = vsub.f32 2.0, %v2506_v6 }
 0x79f   : > { %v2491_v25 = vmul.f32 %v3662_v14, %v2489_v20  ;;  %v2509_v27 = vsub.f32 2.0, %v2507_v21 }
 0x7a0   : > { %v2492_v28 = vmul.f32 %v4829_v29, %v2490_v22  ;;  %v2510_v30 = vmul.f32 %v3664_v16, %v2508_v23 }
 0x7a1   : > { %v2493_v4 = vmul.f32 %v4833_v31, %v2491_v25  ;;  %v2511_v32 = vmul.f32 %v3666_v18, %v2509_v27 }
 0x7a2   : > { %v2512_v47 = vmul.f32 %v4837_v34, %v2510_v30  ;;  %v2514_v33 = vmul.f32 %v2492_v28, %v4059_v2  ;;  %v2534_v35 = vmul.f32 %v2492_v28, %v4067_v5 }
 0x7a3   : > { %v2513_v37 = vmul.f32 %v5035_v36, %v2511_v32  ;;  %v2515_v39 = vmul.f32 %v2493_v4, %v4059_v2  ;;  %v2535_v40 = vmul.f32 %v2493_v4, %v4067_v5 }
 0x7a4   : > { %v2518_v29 = vmul.f32 %v2512_v47, %v4073_v8  ;;  %v2538_v42 = vmul.f32 %v2512_v47, %v4079_v11 }
 0x7a5   : > { %v2519_v31 = vmul.f32 %v2513_v37, %v4073_v8  ;;  %v2539_v34 = vmul.f32 %v2513_v37, %v4079_v11 }
 0x7a6   : > { %v2520_v43 = vadd.f32 %v2518_v29, %v2514_v33  ;;  %v2540_v45 = vadd.f32 %v2538_v42, %v2534_v35 }
 0x7a7   : > { %v2521_v46 = vadd.f32 %v2519_v31, %v2515_v39  ;;  %v2541_v49 = vadd.f32 %v2539_v34, %v2535_v40 }
 0x7a8   : > { %v2522_v50 = vadd.f32 1.0, %v2520_v43  ;;  %v2542_v52 = vadd.f32 1.0, %v2540_v45  ;;  %v5057_v45 = vld [vmem:[%s4039_s27] sm:$0xff] }
 0x7a9   : > { %v2523_v38 = vadd.f32 1.0, %v2521_v46  ;;  %v2543_v53 = vadd.f32 1.0, %v2541_v49 }
 0x7aa   : > { %3667 = vrcp.f32 %v2522_v50 }
 0x7ab   : > { %3669 = vrcp.f32 %v2523_v38 }
 0x7ac   : > { %3671 = vrcp.f32 %v2542_v52 }
 0x7ad   : > { %3673 = vrcp.f32 %v2543_v53 }
 0x7b7   : > { %v3668_v41 = vpop.eup %3667 }
 0x7b8   : > { %v3670_v44 = vpop.eup %3669  ;;  %v2526_v55 = vmul.f32 %v3668_v41, %v2522_v50  ;;  %v5061_v50 = vld [vmem:[%s4039_s27 + $0x8] sm:$0xff] }
 0x7b9   : > { %v3672_v56 = vpop.eup %3671  ;;  %v2527_v58 = vmul.f32 %v3670_v44, %v2523_v38 }
 0x7ba   : > { %v3674_v59 = vpop.eup %3673  ;;  %v2528_v60 = vsub.f32 2.0, %v2526_v55  ;;  %v2546_v48 = vmul.f32 %v3672_v56, %v2542_v52 }
 0x7bb   : > { %v2529_v61 = vsub.f32 2.0, %v2527_v58  ;;  %v2547_v51 = vmul.f32 %v3674_v59, %v2543_v53  ;;  %v5065_v53 = vld [vmem:[%s4039_s27 + $0x10] sm:$0xff] }
 0x7bc   : > { %v2530_v54 = vmul.f32 %v3668_v41, %v2528_v60  ;;  %v2548_v62 = vsub.f32 2.0, %v2546_v48 }
 0x7bd   : > { %v2531_v63 = vmul.f32 %v3670_v44, %v2529_v61  ;;  %v2549_v7 = vsub.f32 2.0, %v2547_v51 }
 0x7be   : > { %v2532_v9 = vmul.f32 %v2530_v54, %v4089_v24  ;;  %v2550_v10 = vmul.f32 %v3672_v56, %v2548_v62 }
 0x7bf   : > { %v2533_v0 = vmul.f32 %v2531_v63, %v4089_v24  ;;  %v2551_v12 = vmul.f32 %v3674_v59, %v2549_v7 }
 0x7c0   : > { %v2552_v57 = vmul.f32 %v2550_v10, %v4091_v26  ;;  %v2554_v1 = vmul.f32 %v2532_v9, %v4059_v2  ;;  %v2574_v3 = vmul.f32 %v2532_v9, %v4073_v8 }
 0x7c1   : > { %v2553_v13 = vmul.f32 %v2551_v12, %v4091_v26  ;;  %v2555_v14 = vmul.f32 %v2533_v0, %v4059_v2  ;;  %v2575_v15 = vmul.f32 %v2533_v0, %v4073_v8 }
 0x7c2   : > { %v2558_v16 = vmul.f32 %v2552_v57, %v4067_v5  ;;  %v2578_v17 = vmul.f32 %v2552_v57, %v4079_v11 }
 0x7c3   : > { %v2559_v18 = vmul.f32 %v2553_v13, %v4067_v5  ;;  %v2579_v19 = vmul.f32 %v2553_v13, %v4079_v11 }
 0x7c4   : > { %v2560_v6 = vadd.f32 %v2558_v16, %v2554_v1  ;;  %v2580_v20 = vadd.f32 %v2578_v17, %v2574_v3 }
 0x7c5   : > { %v2561_v21 = vadd.f32 %v2559_v18, %v2555_v14  ;;  %v2581_v22 = vadd.f32 %v2579_v19, %v2575_v15 }
 0x7c6   : > { %v2562_v23 = vadd.f32 1.0, %v2560_v6  ;;  %v2582_v25 = vadd.f32 1.0, %v2580_v20 }
 0x7c7   : > { %v2563_v27 = vadd.f32 1.0, %v2561_v21  ;;  %v2583_v28 = vadd.f32 1.0, %v2581_v22 }
 0x7c8   : > { %3675 = vrcp.f32 %v2562_v23 }
 0x7c9   : > { %3677 = vrcp.f32 %v2563_v27 }
 0x7ca   : > { %3679 = vrcp.f32 %v2582_v25 }
 0x7cb   : > { %3681 = vrcp.f32 %v2583_v28 }
 0x7d5   : > { %v3676_v30 = vpop.eup %3675 }
 0x7d6   : > { %v3678_v4 = vpop.eup %3677  ;;  %v2566_v32 = vmul.f32 %v3676_v30, %v2562_v23 }
 0x7d7   : > { %v3680_v47 = vpop.eup %3679  ;;  %v2567_v33 = vmul.f32 %v3678_v4, %v2563_v27 }
 0x7d8   : > { %v3682_v35 = vpop.eup %3681  ;;  %v2568_v37 = vsub.f32 2.0, %v2566_v32  ;;  %v2586_v39 = vmul.f32 %v3680_v47, %v2582_v25 }
 0x7d9   : > { %v2569_v40 = vsub.f32 2.0, %v2567_v33  ;;  %v2587_v29 = vmul.f32 %v3682_v35, %v2583_v28 }
 0x7da   : > { %v2570_v42 = vmul.f32 %v3676_v30, %v2568_v37  ;;  %v2588_v31 = vsub.f32 2.0, %v2586_v39 }
 0x7db   : > { %v2571_v34 = vmul.f32 %v3678_v4, %v2569_v40  ;;  %v2589_v43 = vsub.f32 2.0, %v2587_v29 }
 0x7dc   : > { %v2572_v46 = vmul.f32 %v5057_v45, %v2570_v42  ;;  %v2590_v49 = vmul.f32 %v3680_v47, %v2588_v31 }
 0x7dd   : > { %v2573_v52 = vmul.f32 %v5061_v50, %v2571_v34  ;;  %v2591_v38 = vmul.f32 %v3682_v35, %v2589_v43 }
 0x7de   : > { %v2592_v41 = vmul.f32 %v5065_v53, %v2590_v49  ;;  %v2594_v44 = vmul.f32 %v2572_v46, %v4059_v2  ;;  %v2614_v55 = vmul.f32 %v2572_v46, %v4067_v5 }
 0x7df   : > { %v2593_v56 = vmul.f32 %v5035_v36, %v2591_v38  ;;  %v2595_v58 = vmul.f32 %v2573_v52, %v4059_v2  ;;  %v2615_v59 = vmul.f32 %v2573_v52, %v4067_v5 }
 0x7e0   : > { %v2598_v60 = vmul.f32 %v2592_v41, %v4073_v8  ;;  %v2618_v48 = vmul.f32 %v2592_v41, %v4079_v11 }
 0x7e1   : > { %v2599_v61 = vmul.f32 %v2593_v56, %v4073_v8  ;;  %v2619_v51 = vmul.f32 %v2593_v56, %v4079_v11 }
 0x7e2   : > { %v2600_v54 = vadd.f32 %v2598_v60, %v2594_v44  ;;  %v2620_v62 = vadd.f32 %v2618_v48, %v2614_v55 }
 0x7e3   : > { %v2601_v63 = vadd.f32 %v2599_v61, %v2595_v58  ;;  %v2621_v7 = vadd.f32 %v2619_v51, %v2615_v59 }
 0x7e4   : > { %v2602_v9 = vadd.f32 1.0, %v2600_v54  ;;  %v2622_v10 = vadd.f32 1.0, %v2620_v62 }
 0x7e5   : > { %v2603_v0 = vadd.f32 1.0, %v2601_v63  ;;  %v2623_v12 = vadd.f32 1.0, %v2621_v7 }
 0x7e6   : > { %3683 = vrcp.f32 %v2602_v9 }
 0x7e7   : > { %3685 = vrcp.f32 %v2603_v0 }
 0x7e8   : > { %3687 = vrcp.f32 %v2622_v10 }
 0x7e9   : > { %3689 = vrcp.f32 %v2623_v12 }
 0x7f3   : > { %v3684_v57 = vpop.eup %3683 }
 0x7f4   : > { %v3686_v1 = vpop.eup %3685  ;;  %v2606_v3 = vmul.f32 %v3684_v57, %v2602_v9 }
 0x7f5   : > { %v3688_v13 = vpop.eup %3687  ;;  %v2607_v14 = vmul.f32 %v3686_v1, %v2603_v0 }
 0x7f6   : > { %v3690_v15 = vpop.eup %3689  ;;  %v2608_v16 = vsub.f32 2.0, %v2606_v3  ;;  %v2626_v17 = vmul.f32 %v3688_v13, %v2622_v10 }
 0x7f7   : > { %v2609_v18 = vsub.f32 2.0, %v2607_v14  ;;  %v2627_v19 = vmul.f32 %v3690_v15, %v2623_v12 }
 0x7f8   : > { %v2610_v6 = vmul.f32 %v3684_v57, %v2608_v16  ;;  %v2628_v20 = vsub.f32 2.0, %v2626_v17 }
 0x7f9   : > { %v2611_v21 = vmul.f32 %v3686_v1, %v2609_v18  ;;  %v2629_v22 = vsub.f32 2.0, %v2627_v19 }
 0x7fa   : > { %v2612_v23 = vmul.f32 %v2610_v6, %v4089_v24  ;;  %v2630_v25 = vmul.f32 %v3688_v13, %v2628_v20 }
 0x7fb   : > { %v2613_v27 = vmul.f32 %v2611_v21, %v4089_v24  ;;  %v2631_v28 = vmul.f32 %v3690_v15, %v2629_v22 }
 0x7fc   : > { %v2632_v30 = vmul.f32 %v2630_v25, %v4091_v26  ;;  %v2634_v4 = vmul.f32 %v2612_v23, %v4059_v2  ;;  %v2654_v32 = vmul.f32 %v2612_v23, %v4073_v8 }
 0x7fd   : > { %v2633_v47 = vmul.f32 %v2631_v28, %v4091_v26  ;;  %v2635_v33 = vmul.f32 %v2613_v27, %v4059_v2  ;;  %v2655_v35 = vmul.f32 %v2613_v27, %v4073_v8 }
 0x7fe   : > { %v2638_v37 = vmul.f32 %v2632_v30, %v4067_v5  ;;  %v2658_v39 = vmul.f32 %v2632_v30, %v4079_v11 }
 0x7ff   : > { %v2639_v40 = vmul.f32 %v2633_v47, %v4067_v5  ;;  %v2659_v29 = vmul.f32 %v2633_v47, %v4079_v11 }
 0x800   : > { %v2640_v42 = vadd.f32 %v2638_v37, %v2634_v4  ;;  %v2660_v31 = vadd.f32 %v2658_v39, %v2654_v32 }
 0x801   : > { %v2641_v34 = vadd.f32 %v2639_v40, %v2635_v33  ;;  %v2661_v43 = vadd.f32 %v2659_v29, %v2655_v35 }
 0x802   : > { %v2642_v46 = vadd.f32 1.0, %v2640_v42  ;;  %v2662_v49 = vadd.f32 1.0, %v2660_v31 }
 0x803   : > { %v2643_v52 = vadd.f32 1.0, %v2641_v34  ;;  %v2663_v38 = vadd.f32 1.0, %v2661_v43 }
 0x804   : > { %3691 = vrcp.f32 %v2642_v46 }
 0x805   : > { %3693 = vrcp.f32 %v2643_v52 }
 0x806   : > { %3695 = vrcp.f32 %v2662_v49 }
 0x807   : > { %3697 = vrcp.f32 %v2663_v38 }
 0x811   : > { %v3692_v41 = vpop.eup %3691 }
 0x812   : > { %v3694_v44 = vpop.eup %3693  ;;  %v2646_v55 = vmul.f32 %v3692_v41, %v2642_v46 }
 0x813   : > { %v3696_v56 = vpop.eup %3695  ;;  %v2647_v58 = vmul.f32 %v3694_v44, %v2643_v52 }
 0x814   : > { %v3698_v59 = vpop.eup %3697  ;;  %v2648_v60 = vsub.f32 2.0, %v2646_v55  ;;  %v2666_v48 = vmul.f32 %v3696_v56, %v2662_v49 }
 0x815   : > { %v2649_v61 = vsub.f32 2.0, %v2647_v58  ;;  %v2667_v51 = vmul.f32 %v3698_v59, %v2663_v38 }
 0x816   : > { %v2650_v54 = vmul.f32 %v3692_v41, %v2648_v60  ;;  %v2668_v62 = vsub.f32 2.0, %v2666_v48 }
 0x817   : > { %v2651_v63 = vmul.f32 %v3694_v44, %v2649_v61  ;;  %v2669_v7 = vsub.f32 2.0, %v2667_v51 }
 0x818   : > { %v2652_v9 = vmul.f32 %v5057_v45, %v2650_v54  ;;  %v2670_v10 = vmul.f32 %v3696_v56, %v2668_v62 }
 0x819   : > { %v2653_v0 = vmul.f32 %v5061_v50, %v2651_v63  ;;  %v2671_v12 = vmul.f32 %v3698_v59, %v2669_v7 }
 0x81a   : > { %v2672_v57 = vmul.f32 %v5065_v53, %v2670_v10  ;;  %v2674_v1 = vmul.f32 %v2652_v9, %v4059_v2  ;;  %v2694_v3 = vmul.f32 %v2652_v9, %v4067_v5 }
 0x81b   : > { %v2673_v13 = vmul.f32 %v5035_v36, %v2671_v12  ;;  %v2675_v14 = vmul.f32 %v2653_v0, %v4059_v2  ;;  %v2695_v15 = vmul.f32 %v2653_v0, %v4067_v5 }
 0x81c   : > { %v2678_v16 = vmul.f32 %v2672_v57, %v4073_v8  ;;  %v2698_v17 = vmul.f32 %v2672_v57, %v4079_v11 }
 0x81d   : > { %v2679_v18 = vmul.f32 %v2673_v13, %v4073_v8  ;;  %v2699_v19 = vmul.f32 %v2673_v13, %v4079_v11 }
 0x81e   : > { %v2680_v6 = vadd.f32 %v2678_v16, %v2674_v1  ;;  %v2700_v20 = vadd.f32 %v2698_v17, %v2694_v3 }
 0x81f   : > { %v2681_v21 = vadd.f32 %v2679_v18, %v2675_v14  ;;  %v2701_v22 = vadd.f32 %v2699_v19, %v2695_v15 }
 0x820   : > { %v2682_v23 = vadd.f32 1.0, %v2680_v6  ;;  %v2702_v25 = vadd.f32 1.0, %v2700_v20 }
 0x821   : > { %v2683_v27 = vadd.f32 1.0, %v2681_v21  ;;  %v2703_v28 = vadd.f32 1.0, %v2701_v22 }
 0x822   : > { %3699 = vrcp.f32 %v2682_v23 }
 0x823   : > { %3701 = vrcp.f32 %v2683_v27 }
 0x824   : > { %3703 = vrcp.f32 %v2702_v25 }
 0x825   : > { %3705 = vrcp.f32 %v2703_v28 }
 0x82f   : > { %v3700_v30 = vpop.eup %3699 }
 0x830   : > { %v3702_v4 = vpop.eup %3701  ;;  %v2686_v32 = vmul.f32 %v3700_v30, %v2682_v23 }
 0x831   : > { %v3704_v47 = vpop.eup %3703  ;;  %v2687_v33 = vmul.f32 %v3702_v4, %v2683_v27 }
 0x832   : > { %v3706_v35 = vpop.eup %3705  ;;  %v2688_v37 = vsub.f32 2.0, %v2686_v32  ;;  %v2706_v39 = vmul.f32 %v3704_v47, %v2702_v25 }
 0x833   : > { %v2689_v40 = vsub.f32 2.0, %v2687_v33  ;;  %v2707_v29 = vmul.f32 %v3706_v35, %v2703_v28 }
 0x834   : > { %v2690_v42 = vmul.f32 %v3700_v30, %v2688_v37  ;;  %v2708_v31 = vsub.f32 2.0, %v2706_v39 }
 0x835   : > { %v2691_v34 = vmul.f32 %v3702_v4, %v2689_v40  ;;  %v2709_v43 = vsub.f32 2.0, %v2707_v29 }
 0x836   : > { %v2692_v46 = vmul.f32 %v2690_v42, %v4089_v24  ;;  %v2710_v49 = vmul.f32 %v3704_v47, %v2708_v31 }
 0x837   : > { %v2693_v52 = vmul.f32 %v2691_v34, %v4089_v24  ;;  %v2711_v38 = vmul.f32 %v3706_v35, %v2709_v43 }
 0x838   : > { %v2712_v41 = vmul.f32 %v2710_v49, %v4091_v26  ;;  %v2714_v44 = vmul.f32 %v2692_v46, %v4059_v2  ;;  %v2734_v55 = vmul.f32 %v2692_v46, %v4073_v8 }
 0x839   : > { %v2713_v56 = vmul.f32 %v2711_v38, %v4091_v26  ;;  %v2715_v58 = vmul.f32 %v2693_v52, %v4059_v2  ;;  %v2735_v59 = vmul.f32 %v2693_v52, %v4073_v8 }
 0x83a   : > { %v2718_v60 = vmul.f32 %v2712_v41, %v4067_v5  ;;  %v2738_v48 = vmul.f32 %v2712_v41, %v4079_v11 }
 0x83b   : > { %v2719_v61 = vmul.f32 %v2713_v56, %v4067_v5  ;;  %v2739_v51 = vmul.f32 %v2713_v56, %v4079_v11 }
 0x83c   : > { %v2720_v54 = vadd.f32 %v2718_v60, %v2714_v44  ;;  %v2740_v62 = vadd.f32 %v2738_v48, %v2734_v55 }
 0x83d   : > { %v2721_v63 = vadd.f32 %v2719_v61, %v2715_v58  ;;  %v2741_v7 = vadd.f32 %v2739_v51, %v2735_v59  ;;  %v323_v61 = vstv %s5125_s9  ;;  %v325_v51 = vstv %s5127_s10 }
 0x83e   : > { %v2722_v9 = vadd.f32 1.0, %v2720_v54  ;;  %v2742_v10 = vadd.f32 1.0, %v2740_v62 }
 0x83f   : > { %v2723_v0 = vadd.f32 1.0, %v2721_v63  ;;  %v2743_v12 = vadd.f32 1.0, %v2741_v7  ;;  %v327_v63 = vstv %s5129_s12 }
 0x840   : > { %3707 = vrcp.f32 %v2722_v9 }
 0x841   : > { %3709 = vrcp.f32 %v2723_v0 }
 0x842   : > { %3711 = vrcp.f32 %v2742_v10 }
 0x843   : > { %3713 = vrcp.f32 %v2743_v12 }
 0x84d   : > { %v3708_v57 = vpop.eup %3707 }
 0x84e   : > { %v3710_v1 = vpop.eup %3709  ;;  %v2726_v3 = vmul.f32 %v3708_v57, %v2722_v9 }
 0x84f   : > { %v3712_v13 = vpop.eup %3711  ;;  %v2727_v14 = vmul.f32 %v3710_v1, %v2723_v0  ;;  %v331_v0 = vstv %s5131_s13 }
 0x850   : > { %v3714_v15 = vpop.eup %3713  ;;  %v2728_v16 = vsub.f32 2.0, %v2726_v3  ;;  %v2746_v17 = vmul.f32 %v3712_v13, %v2742_v10 }
 0x851   : > { %v2729_v18 = vsub.f32 2.0, %v2727_v14  ;;  %v2747_v19 = vmul.f32 %v3714_v15, %v2743_v12 }
 0x852   : > { %v2730_v6 = vmul.f32 %v3708_v57, %v2728_v16  ;;  %v2748_v20 = vsub.f32 2.0, %v2746_v17 }
 0x853   : > { %v2731_v21 = vmul.f32 %v3710_v1, %v2729_v18  ;;  %v2749_v22 = vsub.f32 2.0, %v2747_v19 }
 0x854   : > { %v2732_v23 = vmul.f32 %v5057_v45, %v2730_v6  ;;  %v2750_v25 = vmul.f32 %v3712_v13, %v2748_v20 }
 0x855   : > { %v2733_v27 = vmul.f32 %v5061_v50, %v2731_v21  ;;  %v2751_v28 = vmul.f32 %v3714_v15, %v2749_v22  ;;  %v329_v15 = vstv %s5133_s14 }
 0x856   : > { %v2752_v30 = vmul.f32 %v5065_v53, %v2750_v25  ;;  %v2754_v4 = vmul.f32 %v2732_v23, %v4059_v2  ;;  %v2774_v32 = vmul.f32 %v2732_v23, %v4067_v5 }
 0x857   : > { %v2753_v47 = vmul.f32 %v5035_v36, %v2751_v28  ;;  %v2755_v33 = vmul.f32 %v2733_v27, %v4059_v2  ;;  %v2775_v35 = vmul.f32 %v2733_v27, %v4067_v5 }
 0x858   : > { %v2758_v37 = vmul.f32 %v2752_v30, %v4073_v8  ;;  %v2778_v45 = vmul.f32 %v2752_v30, %v4079_v11 }
 0x859   : > { %v2759_v39 = vmul.f32 %v2753_v47, %v4073_v8  ;;  %v2779_v50 = vmul.f32 %v2753_v47, %v4079_v11 }
 0x85a   : > { %v2760_v40 = vadd.f32 %v2758_v37, %v2754_v4  ;;  %v2780_v53 = vadd.f32 %v2778_v45, %v2774_v32 }
 0x85b   : > { %v2761_v29 = vadd.f32 %v2759_v39, %v2755_v33  ;;  %v2781_v42 = vadd.f32 %v2779_v50, %v2775_v35 }
 0x85c   : > { %v2762_v31 = vadd.f32 1.0, %v2760_v40  ;;  %v2782_v34 = vadd.f32 1.0, %v2780_v53 }
 0x85d   : > { %v2763_v43 = vadd.f32 1.0, %v2761_v29  ;;  %v2783_v36 = vadd.f32 1.0, %v2781_v42 }
 0x85e   : > { %3715 = vrcp.f32 %v2762_v31 }
 0x85f   : > { %3717 = vrcp.f32 %v2763_v43 }
 0x860   : > { %3719 = vrcp.f32 %v2782_v34 }
 0x861   : > { %3721 = vrcp.f32 %v2783_v36 }
 0x86b   : > { %v3716_v2 = vpop.eup %3715 }
 0x86c   : > { %v3718_v5 = vpop.eup %3717  ;;  %v2766_v8 = vmul.f32 %v3716_v2, %v2762_v31 }
 0x86d   : > { %v3720_v11 = vpop.eup %3719  ;;  %v2767_v46 = vmul.f32 %v3718_v5, %v2763_v43 }
 0x86e   : > { %v3722_v49 = vpop.eup %3721  ;;  %v2768_v52 = vsub.f32 2.0, %v2766_v8  ;;  %v2786_v38 = vmul.f32 %v3720_v11, %v2782_v34 }
 0x86f   : > { %v2769_v41 = vsub.f32 2.0, %v2767_v46  ;;  %v2787_v44 = vmul.f32 %v3722_v49, %v2783_v36 }
 0x870   : > { %v2770_v55 = vmul.f32 %v3716_v2, %v2768_v52  ;;  %v2788_v56 = vsub.f32 2.0, %v2786_v38 }
 0x871   : > { %v2771_v58 = vmul.f32 %v3718_v5, %v2769_v41  ;;  %v2789_v59 = vsub.f32 2.0, %v2787_v44 }
 0x872   : > { %v2772_v60 = vmul.f32 %v2770_v55, %v4089_v24  ;;  %v2790_v48 = vmul.f32 %v3720_v11, %v2788_v56 }
 0x873   : > { %v2773_v54 = vmul.f32 %v2771_v58, %v4089_v24  ;;  %v2791_v62 = vmul.f32 %v3722_v49, %v2789_v59 }
 0x874   : > { %v2792_v7 = vmul.f32 %v2790_v48, %v4091_v26  ;;  %v2794_v9 = vmul.f32 %v2772_v60, %v2732_v23  ;;  %v2798_v10 = vmul.f32 %v2772_v60, %v2752_v30 }
 0x875   : > { %v2793_v12 = vmul.f32 %v2791_v62, %v4091_v26  ;;  %v2795_v57 = vmul.f32 %v2773_v54, %v2733_v27  ;;  %v2799_v1 = vmul.f32 %v2773_v54, %v2753_v47 }
 0x876   : > { %v2796_v3 = vmul.f32 %v2792_v7, %v2732_v23  ;;  %v2800_v13 = vmul.f32 %v2792_v7, %v2752_v30  ;;  %v2802_v14 = vmul.f32 %v2794_v9, %v323_v61  ;;  %v2810_v6 = vmul.f32 %v2798_v10, %v327_v63 }
 0x877   : > { %v2797_v16 = vmul.f32 %v2793_v12, %v2733_v27  ;;  %v2801_v17 = vmul.f32 %v2793_v12, %v2753_v47  ;;  %v2803_v24 = vmul.f32 %v2795_v57, %v323_v61  ;;  %v2811_v22 = vmul.f32 %v2799_v1, %v327_v63 }
 0x878   : > { %v2804_v18 = vadd.f32 %v2802_v14, %v331_v0  ;;  %v2806_v19 = vmul.f32 %v2796_v3, %v325_v51  ;;  %v2814_v28 = vmul.f32 %v2800_v13, %v329_v15 }
 0x879   : > { %v2805_v20 = vadd.f32 %v2803_v24, %v331_v0  ;;  %v2807_v21 = vmul.f32 %v2797_v16, %v325_v51  ;;  %v2815_v4 = vmul.f32 %v2801_v17, %v329_v15 }
 0x87a   : > { %v2808_v25 = vadd.f32 %v2806_v19, %v2804_v18 }
 0x87b   : > { %v2809_v26 = vadd.f32 %v2807_v21, %v2805_v20 }
 0x87c   : > { %v2812_v23 = vadd.f32 %v2810_v6, %v2808_v25 }
 0x87d   : > { %v2813_v30 = vadd.f32 %v2811_v22, %v2809_v26 }
 0x87e   : > { %v2816_v27 = vadd.f32 %v2814_v28, %v2812_v23 }
 0x87f   : > { %v2817_v32 = vadd.f32 %v2815_v4, %v2813_v30 }
 0x880   : > { %2818 = vst [vmem:[%s307_s26] sm:$0xff] %v2816_v27 }
 0x881   : > { %2819 = vst [vmem:[%s307_s26 + $0x8] sm:$0xff] %v2817_v32 }
 0x882   : > { %3797 = shalt.err (!%p3794_p3)
}
 0x883   : > { %s3798_s9 = scalar_lea.hbm %s5149_s30, 256  ;;  %s3802_s13 = scalar_lea.hbm %s5199_s5, 512 }
 0x884   : > { %p3799_p10 = scmp.ne.s32.totalorder %s5149_s30, %s3798_s9  ;;  %p3803_p7 = scmp.lt.s32.totalorder %s5149_s30, %s5199_s5 }
 0x885   : > { %p3804_p4 = scmp.lt.s32.totalorder %s3802_s13, %s3798_s9 }
 0x886   : > { %p3800_p1 = pnand %p3799_p10, %p5218_p12 }
 0x887   : > { %p3805_p8 = por %p3804_p4, %p3803_p7 }
 0x888   : > { %p3801_p2 = pneg %p3800_p1 }
 0x88a   : > { %p3806_p11 = pnand %p3805_p8, %p3801_p2 }
 0x88c   : > { %3809 = shalt.err (!%p3806_p11)
}
 0x88d   : > { %s3868_s17 = smov 128   ;;  %s3869_s26 = smov 8  }
 0x88e   : > { %2993 = dma.vmem_to_hbm [thread:$0]  (%p5218_p12), %s5151_s24, 256, %s5149_s30, %s2821_s8, %s3868_s17, %s3868_s17, %s3869_s26  }
 0x88f PF: > { %s2849_s27 = sand.u32 1, %s3844_s20   ;;  %p5219_p9 = scmp.ne.s32.totalorder %s5208_s7, 0 }
 0x890   : > { %s2850_s29 = scalar_lea.sflag [#allocation5], %s2849_s27 }
 0x891   : > { %p3006_p5 = pnand %p2944_p13, %p5219_p9 }
 0x893   : > { %p3007_p6 = pneg %p3006_p5 }
 0x895   : > { %3839 = dma.done.wait (%p3007_p6), %s2850_s29, 256  }
 0x896   : > { %3841 = vsyncadd (%p3007_p6), %s2850_s29, 4294967040  ;;  %p21_p0 = scmp.ge.s32.totalorder %s3928_s25, 4   ;;  %s5220_s20 = smov %s3848_s21 }
 0x897   : > { %s5221_s21 = smov %s3852_s22  ;;  %s5222_s22 = smov %s3940_s28 }
 0x898   : > { %s5223_s23 = smov %s3928_s25  ;;  %23 = sbr.rel (!%p21_p0) target bundleno = 9 (0x9), region = 104 }
 0x89d   :  { %2855 = vsyncpa [#allocation4], 1 }
 0x89e   :  { %2857 = vsyncpa [#allocation4 + $0x1], 1 }
 0x89f   :  { %2858 = vsyncpa [#allocation5], 1 }
 0x8a0   :  { %2860 = vsyncpa [#allocation5 + $0x1], 1 }
 0x8a1   :  { %2861 = vsyncpa [#allocation6], 1 }
 0x8a2   :  { %2863 = vsyncpa [#allocation6 + $0x1], 1 }
 0x8a3   :  { %2864 = vsyncpa [#allocation9], 1 }

</bundles_post_ra>
